<compile_context>
chip_gen: v5e
topology: v5e:2x2
jax: 0.10.0
libtpu: 0.0.40
codegen_flags: <defaults>
</compile_context>

<pallas_src>
import functools

import jax
import jax.numpy as jnp
from jax.experimental import pallas as pl
from jax.experimental.pallas import tpu as pltpu

EPSILON = 1e10  # matches the registered buffer `epsilon` in the torch module


def _round_up(x, m):
    return ((x + m - 1) // m) * m


def _exclusive_cumprod_lanes(x):
    """Exact exclusive cumprod along the last (lane) axis via Hillis-Steele scan."""
    tr, s = x.shape
    y = x
    shift = 1
    while shift < s:                      # unrolled at trace time (log2(S) steps)
        y = y * jnp.concatenate(
            [jnp.ones((tr, shift), y.dtype), y[:, :s - shift]], axis=-1)
        shift *= 2
    # exclusive: T[0] = 1, T[j] = inclusive[j-1]
    return jnp.concatenate([jnp.ones((tr, 1), y.dtype), y[:, :s - 1]], axis=-1)


def _volume_render_kernel(rf_ref, depth_ref, dn_ref,
                          w_ref, mw_ref, pr_ref,
                          *, attenuation_threshold, white_background):
    f32 = jnp.float32
    depth = depth_ref[...].astype(f32)                 # (TR, S)
    sigma = rf_ref[3].astype(f32)                      # (TR, S)  channel 3 = sigma
    dir_norm = dn_ref[...].astype(f32)                 # (TR, 1)
    TR, S = depth.shape

    # deltas: depth[i+1] - depth[i], last entry = 1e10, scaled by ||ray_dir||.
    deltas = jnp.concatenate(
        [depth[:, 1:] - depth[:, :-1],
         jnp.full((TR, 1), EPSILON, dtype=f32)], axis=-1)
    deltas = deltas * dir_norm

    # TODO(synk): radiance_field_noise_std > 0 would need pltpu.prng_* noise; the
    # module defaults to 0.0 (train and eval), so no noise is added here.
    sig = jnp.maximum(sigma, 0.0)                      # relu
    alpha = 1.0 - jnp.exp(-sig * deltas)
    x = 1.0 - alpha + 1e-10

    # Exact exclusive cumprod along samples (pure VPU / lane-shift math).
    T_i = _exclusive_cumprod_lanes(x)                  # (TR, S)

    weights = alpha * T_i                              # (TR, S)
    mask_w = (T_i > attenuation_threshold).astype(f32)

    acc = jnp.sum(weights, axis=-1, keepdims=True)             # (TR, 1)
    dmap = jnp.sum(weights * depth, axis=-1, keepdims=True)    # (TR, 1)
    disp = 1.0 / jnp.maximum(1e-10, dmap / acc)
    disp = jnp.where(jnp.isnan(disp), 0.0, disp)

    rgb_cols = [jnp.sum(weights * rf_ref[c].astype(f32), axis=-1, keepdims=True)
                for c in range(3)]
    if white_background:
        rgb_cols = [col + (1.0 - acc) for col in rgb_cols]

    w_ref[...] = weights
    mw_ref[...] = mask_w
    pr_ref[...] = jnp.concatenate(rgb_cols + [acc, dmap, disp], axis=-1)  # (TR, 6)


def volume_render(radiance_field, depth_values, ray_directions, *,
                  attenuation_threshold=1e-3, white_background=False,
                  tile_rays=1024):
    """radiance_field: (R, S, 4); depth_values: (R, S); ray_directions: (R, 3)."""
    R, S, C = radiance_field.shape
    assert C == 4, "radiance_field must have 4 channels (rgb + sigma)"
    f32 = jnp.float32

    # Single wrapper-side transform (see module docstring / TODO above).
    rf_cm = jnp.moveaxis(radiance_field, -1, 0)                  # (4, R, S)

    # Precompute ||ray_dir|| (tiny) so the kernel gets a lane-1 block instead of a
    # lane-padded (tile, 3) block plus a sqrt/3-lane reduce.
    rd = ray_directions.astype(f32)
    dir_norm = jnp.sqrt(jnp.sum(rd * rd, axis=-1, keepdims=True))  # (R, 1)

    # Tile selection: biggest tile up to tile_rays, but keep grid >= 2 whenever
    # possible so v7x can shard the parallel axis across its two TensorCores.
    # Ragged last block (R not a tile multiple) is masked by Pallas.
    tile = max(8, min(int(tile_rays), _round_up(pl.cdiv(R, 2), 8)))
    grid = (pl.cdiv(R, tile),)

    kern = functools.partial(_volume_render_kernel,
                             attenuation_threshold=attenuation_threshold,
                             white_background=white_background)

    out_shapes = (
        jax.ShapeDtypeStruct((R, S), f32),   # weights
        jax.ShapeDtypeStruct((R, S), f32),   # mask_weights
        jax.ShapeDtypeStruct((R, 6), f32),   # [r, g, b, acc, depth, disp]
    )
    in_specs = [
        pl.BlockSpec((4, tile, S), lambda i: (0, i, 0)),   # radiance field (chan-major)
        pl.BlockSpec((tile, S), lambda i: (i, 0)),         # depth values
        pl.BlockSpec((tile, 1), lambda i: (i, 0)),         # ||ray_dir||
    ]
    out_specs = (
        pl.BlockSpec((tile, S), lambda i: (i, 0)),
        pl.BlockSpec((tile, S), lambda i: (i, 0)),
        pl.BlockSpec((tile, 6), lambda i: (i, 0)),
    )

    vmem_limit = (32 if tile <= 1024 else 48) * 1024 * 1024

    weights, mask_weights, per_ray = pl.pallas_call(
        kern,
        out_shape=out_shapes,
        grid=grid,
        in_specs=in_specs,
        out_specs=out_specs,
        compiler_params=pltpu.CompilerParams(
            dimension_semantics=("parallel",),
            vmem_limit_bytes=vmem_limit),
    )(rf_cm, depth_values, dir_norm)

    return {
        "rgb_map": per_ray[:, 0:3],
        "depth_map": per_ray[:, 4],
        "weights": weights,
        "mask_weights": mask_weights,
        "acc_map": per_ray[:, 3],
        "disp_map": per_ray[:, 5],
    }


def volume_render_ref(radiance_field, depth_values, ray_directions, *,
                      attenuation_threshold=1e-3, white_background=False):
    """Pure-JAX reference mirroring the PyTorch forward (eval mode, noise=0)."""
    deltas = jnp.concatenate(
        [depth_values[..., 1:] - depth_values[..., :-1],
         jnp.full_like(depth_values[..., :1], EPSILON)], axis=-1)
    deltas = deltas * jnp.linalg.norm(ray_directions, axis=-1, keepdims=True)
    rgb = radiance_field[..., :3]
    sigmas = jax.nn.relu(radiance_field[..., 3])
    alpha = 1.0 - jnp.exp(-sigmas * deltas)
    x = 1.0 - alpha + 1e-10
    cp = jnp.cumprod(x, axis=-1)
    T_i = jnp.concatenate([jnp.ones_like(cp[..., :1]), cp[..., :-1]], axis=-1)
    weights = alpha * T_i
    mask_weights = (T_i > attenuation_threshold).astype(jnp.float32)
    rgb_map = jnp.sum(weights[..., None] * rgb, axis=-2)
    acc_map = jnp.sum(weights, axis=-1)
    depth_map = jnp.sum(weights * depth_values, axis=-1)
    disp = 1.0 / jnp.maximum(1e-10, depth_map / acc_map)
    disp = jnp.where(jnp.isnan(disp), 0.0, disp)
    if white_background:
        rgb_map = rgb_map + (1.0 - acc_map[..., None])
    return {"rgb_map": rgb_map, "depth_map": depth_map, "weights": weights,
            "mask_weights": mask_weights, "acc_map": acc_map, "disp_map": disp}


if __name__ == "__main__":
    key = jax.random.PRNGKey(0)
    R, S = 250, 64          # R intentionally not a tile multiple -> ragged last block
    k1, k2, k3 = jax.random.split(key, 3)

    radiance_field = jax.random.normal(k1, (R, S, 4), dtype=jnp.float32)
    near, far = 2.0, 6.0
    base = jnp.linspace(near, far, S, dtype=jnp.float32)
    jitter = jax.random.uniform(k2, (R, S), minval=0.0,
                                maxval=0.5 * (far - near) / S, dtype=jnp.float32)
    depth_values = base[None, :] + jitter            # strictly increasing per ray
    ray_directions = jax.random.normal(k3, (R, 3), dtype=jnp.float32)

    out = volume_render(radiance_field, depth_values, ray_directions)
    out = jax.block_until_ready(out)

    ref = volume_render_ref(radiance_field, depth_values, ray_directions)
    for name in ("rgb_map", "depth_map", "weights", "acc_map", "disp_map"):
        assert bool(jnp.allclose(out[name], ref[name], atol=2e-3, rtol=2e-3)), name
    # mask_weights is a hard threshold; allow a tiny fraction of boundary flips
    assert float(jnp.mean(jnp.abs(out["mask_weights"] - ref["mask_weights"]))) < 1e-3

    print("KERNEL_OK")
</pallas_src>

<mosaic_0001>
module attributes {stable_mosaic.version = 11 : i64} {
  func.func @_volume_render_kernel(%arg0: i32, %arg1: memref<4x128x64xf32, #tpu.memory_space<vmem>>, %arg2: memref<128x64xf32, #tpu.memory_space<vmem>>, %arg3: memref<128x1xf32, #tpu.memory_space<vmem>>, %arg4: memref<128x64xf32, #tpu.memory_space<vmem>>, %arg5: memref<128x64xf32, #tpu.memory_space<vmem>>, %arg6: memref<128x6xf32, #tpu.memory_space<vmem>>) attributes {dimension_semantics = [#tpu.dimension_semantics<parallel>], iteration_bounds = array<i64: 2>, scalar_prefetch = 0 : i64, scratch_operands = 0 : i64, tpu.core_type = #tpu.core_type<tc>, window_params = [{transform_indices = @transform_0, window_bounds = array<i64: 4, 128, 64>}, {transform_indices = @transform_1, window_bounds = array<i64: 128, 64>}, {transform_indices = @transform_2, window_bounds = array<i64: 128, 1>}, {transform_indices = @transform_3, window_bounds = array<i64: 128, 64>}, {transform_indices = @transform_4, window_bounds = array<i64: 128, 64>}, {transform_indices = @transform_5, window_bounds = array<i64: 128, 6>}]} {
    %c0 = arith.constant 0 : index
    %c0_0 = arith.constant 0 : index
    %0 = vector.load %arg2[%c0, %c0_0] : memref<128x64xf32, #tpu.memory_space<vmem>>, vector<128x64xf32>
    %c3 = arith.constant 3 : index
    %c0_1 = arith.constant 0 : index
    %c0_2 = arith.constant 0 : index
    %1 = vector.load %arg1[%c3, %c0_1, %c0_2] : memref<4x128x64xf32, #tpu.memory_space<vmem>>, vector<1x128x64xf32>
    %2 = vector.shape_cast %1 : vector<1x128x64xf32> to vector<128x64xf32>
    %c0_3 = arith.constant 0 : index
    %c0_4 = arith.constant 0 : index
    %3 = vector.load %arg3[%c0_3, %c0_4] : memref<128x1xf32, #tpu.memory_space<vmem>>, vector<128x1xf32>
    %4 = vector.extract_strided_slice %0 {offsets = [0, 1], sizes = [128, 63], strides = [1, 1]} : vector<128x64xf32> to vector<128x63xf32>
    %5 = vector.extract_strided_slice %0 {offsets = [0, 0], sizes = [128, 63], strides = [1, 1]} : vector<128x64xf32> to vector<128x63xf32>
    %6 = arith.subf %4, %5 : vector<128x63xf32>
    %cst = arith.constant 1.000000e+10 : f32
    %7 = vector.broadcast %cst : f32 to vector<128x1xf32>
    %8 = tpu.concatenate %6, %7 in 1 : vector<128x63xf32>, vector<128x1xf32> -> vector<128x64xf32>
    %9 = vector.broadcast %3 : vector<128x1xf32> to vector<128x64xf32>
    %10 = arith.mulf %8, %9 : vector<128x64xf32>
    %cst_5 = arith.constant 0.000000e+00 : f32
    %11 = vector.broadcast %cst_5 : f32 to vector<128x64xf32>
    %12 = arith.maximumf %2, %11 : vector<128x64xf32>
    %cst_6 = arith.constant 0.000000e+00 : f32
    %13 = vector.broadcast %cst_6 : f32 to vector<128x64xf32>
    %14 = arith.subf %13, %12 : vector<128x64xf32>
    %15 = arith.mulf %14, %10 : vector<128x64xf32>
    %16 = math.exp %15 : vector<128x64xf32>
    %cst_7 = arith.constant 1.000000e+00 : f32
    %17 = vector.broadcast %cst_7 : f32 to vector<128x64xf32>
    %18 = arith.subf %17, %16 : vector<128x64xf32>
    %cst_8 = arith.constant 1.000000e+00 : f32
    %19 = vector.broadcast %cst_8 : f32 to vector<128x64xf32>
    %20 = arith.subf %19, %18 : vector<128x64xf32>
    %cst_9 = arith.constant 1.000000e-10 : f32
    %21 = vector.broadcast %cst_9 : f32 to vector<128x64xf32>
    %22 = arith.addf %20, %21 : vector<128x64xf32>
    %cst_10 = arith.constant 1.000000e+00 : f32
    %23 = vector.broadcast %cst_10 : f32 to vector<128x1xf32>
    %24 = vector.extract_strided_slice %22 {offsets = [0, 0], sizes = [128, 63], strides = [1, 1]} : vector<128x64xf32> to vector<128x63xf32>
    %25 = tpu.concatenate %23, %24 in 1 : vector<128x1xf32>, vector<128x63xf32> -> vector<128x64xf32>
    %26 = arith.mulf %22, %25 : vector<128x64xf32>
    %cst_11 = arith.constant 1.000000e+00 : f32
    %27 = vector.broadcast %cst_11 : f32 to vector<128x2xf32>
    %28 = vector.extract_strided_slice %26 {offsets = [0, 0], sizes = [128, 62], strides = [1, 1]} : vector<128x64xf32> to vector<128x62xf32>
    %29 = tpu.concatenate %27, %28 in 1 : vector<128x2xf32>, vector<128x62xf32> -> vector<128x64xf32>
    %30 = arith.mulf %26, %29 : vector<128x64xf32>
    %cst_12 = arith.constant 1.000000e+00 : f32
    %31 = vector.broadcast %cst_12 : f32 to vector<128x4xf32>
    %32 = vector.extract_strided_slice %30 {offsets = [0, 0], sizes = [128, 60], strides = [1, 1]} : vector<128x64xf32> to vector<128x60xf32>
    %33 = tpu.concatenate %31, %32 in 1 : vector<128x4xf32>, vector<128x60xf32> -> vector<128x64xf32>
    %34 = arith.mulf %30, %33 : vector<128x64xf32>
    %cst_13 = arith.constant 1.000000e+00 : f32
    %35 = vector.broadcast %cst_13 : f32 to vector<128x8xf32>
    %36 = vector.extract_strided_slice %34 {offsets = [0, 0], sizes = [128, 56], strides = [1, 1]} : vector<128x64xf32> to vector<128x56xf32>
    %37 = tpu.concatenate %35, %36 in 1 : vector<128x8xf32>, vector<128x56xf32> -> vector<128x64xf32>
    %38 = arith.mulf %34, %37 : vector<128x64xf32>
    %cst_14 = arith.constant 1.000000e+00 : f32
    %39 = vector.broadcast %cst_14 : f32 to vector<128x16xf32>
    %40 = vector.extract_strided_slice %38 {offsets = [0, 0], sizes = [128, 48], strides = [1, 1]} : vector<128x64xf32> to vector<128x48xf32>
    %41 = tpu.concatenate %39, %40 in 1 : vector<128x16xf32>, vector<128x48xf32> -> vector<128x64xf32>
    %42 = arith.mulf %38, %41 : vector<128x64xf32>
    %cst_15 = arith.constant 1.000000e+00 : f32
    %43 = vector.broadcast %cst_15 : f32 to vector<128x32xf32>
    %44 = vector.extract_strided_slice %42 {offsets = [0, 0], sizes = [128, 32], strides = [1, 1]} : vector<128x64xf32> to vector<128x32xf32>
    %45 = tpu.concatenate %43, %44 in 1 : vector<128x32xf32>, vector<128x32xf32> -> vector<128x64xf32>
    %46 = arith.mulf %42, %45 : vector<128x64xf32>
    %cst_16 = arith.constant 1.000000e+00 : f32
    %47 = vector.broadcast %cst_16 : f32 to vector<128x1xf32>
    %48 = vector.extract_strided_slice %46 {offsets = [0, 0], sizes = [128, 63], strides = [1, 1]} : vector<128x64xf32> to vector<128x63xf32>
    %49 = tpu.concatenate %47, %48 in 1 : vector<128x1xf32>, vector<128x63xf32> -> vector<128x64xf32>
    %50 = arith.mulf %18, %49 : vector<128x64xf32>
    %cst_17 = arith.constant 1.000000e-03 : f32
    %51 = vector.broadcast %cst_17 : f32 to vector<128x64xf32>
    %52 = arith.cmpf ogt, %49, %51 : vector<128x64xf32>
    %53 = arith.extui %52 : vector<128x64xi1> to vector<128x64xi32>
    %54 = arith.sitofp %53 : vector<128x64xi32> to vector<128x64xf32>
    %cst_18 = arith.constant dense<0.000000e+00> : vector<128xf32>
    %55 = vector.multi_reduction <add>, %50, %cst_18 [1] : vector<128x64xf32> to vector<128xf32>
    %56 = vector.shape_cast %55 : vector<128xf32> to vector<128x1xf32>
    %57 = arith.mulf %50, %0 : vector<128x64xf32>
    %cst_19 = arith.constant dense<0.000000e+00> : vector<128xf32>
    %58 = vector.multi_reduction <add>, %57, %cst_19 [1] : vector<128x64xf32> to vector<128xf32>
    %59 = vector.shape_cast %58 : vector<128xf32> to vector<128x1xf32>
    %60 = arith.divf %59, %56 : vector<128x1xf32>
    %cst_20 = arith.constant 1.000000e-10 : f32
    %61 = vector.broadcast %cst_20 : f32 to vector<128x1xf32>
    %62 = arith.maximumf %61, %60 : vector<128x1xf32>
    %cst_21 = arith.constant 1.000000e+00 : f32
    %63 = vector.broadcast %cst_21 : f32 to vector<128x1xf32>
    %64 = arith.divf %63, %62 : vector<128x1xf32>
    %65 = arith.cmpf one, %64, %64 : vector<128x1xf32>
    %cst_22 = arith.constant 0.000000e+00 : f32
    %66 = vector.broadcast %cst_22 : f32 to vector<128x1xf32>
    %67 = arith.select %65, %66, %64 : vector<128x1xi1>, vector<128x1xf32>
    %c0_23 = arith.constant 0 : index
    %c0_24 = arith.constant 0 : index
    %c0_25 = arith.constant 0 : index
    %68 = vector.load %arg1[%c0_23, %c0_24, %c0_25] : memref<4x128x64xf32, #tpu.memory_space<vmem>>, vector<1x128x64xf32>
    %69 = vector.shape_cast %68 : vector<1x128x64xf32> to vector<128x64xf32>
    %70 = arith.mulf %50, %69 : vector<128x64xf32>
    %cst_26 = arith.constant dense<0.000000e+00> : vector<128xf32>
    %71 = vector.multi_reduction <add>, %70, %cst_26 [1] : vector<128x64xf32> to vector<128xf32>
    %72 = vector.shape_cast %71 : vector<128xf32> to vector<128x1xf32>
    %c1 = arith.constant 1 : index
    %c0_27 = arith.constant 0 : index
    %c0_28 = arith.constant 0 : index
    %73 = vector.load %arg1[%c1, %c0_27, %c0_28] : memref<4x128x64xf32, #tpu.memory_space<vmem>>, vector<1x128x64xf32>
    %74 = vector.shape_cast %73 : vector<1x128x64xf32> to vector<128x64xf32>
    %75 = arith.mulf %50, %74 : vector<128x64xf32>
    %cst_29 = arith.constant dense<0.000000e+00> : vector<128xf32>
    %76 = vector.multi_reduction <add>, %75, %cst_29 [1] : vector<128x64xf32> to vector<128xf32>
    %77 = vector.shape_cast %76 : vector<128xf32> to vector<128x1xf32>
    %c2 = arith.constant 2 : index
    %c0_30 = arith.constant 0 : index
    %c0_31 = arith.constant 0 : index
    %78 = vector.load %arg1[%c2, %c0_30, %c0_31] : memref<4x128x64xf32, #tpu.memory_space<vmem>>, vector<1x128x64xf32>
    %79 = vector.shape_cast %78 : vector<1x128x64xf32> to vector<128x64xf32>
    %80 = arith.mulf %50, %79 : vector<128x64xf32>
    %cst_32 = arith.constant dense<0.000000e+00> : vector<128xf32>
    %81 = vector.multi_reduction <add>, %80, %cst_32 [1] : vector<128x64xf32> to vector<128xf32>
    %82 = vector.shape_cast %81 : vector<128xf32> to vector<128x1xf32>
    %c0_33 = arith.constant 0 : index
    %c0_34 = arith.constant 0 : index
    %83 = vector.load %arg4[%c0_33, %c0_34] : memref<128x64xf32, #tpu.memory_space<vmem>>, vector<128x64xf32>
    tpu.vector_store %arg4[%c0_33, %c0_34], %50 {strides = array<i32>} : memref<128x64xf32, #tpu.memory_space<vmem>>, vector<128x64xf32>,
    %c0_35 = arith.constant 0 : index
    %c0_36 = arith.constant 0 : index
    %84 = vector.load %arg5[%c0_35, %c0_36] : memref<128x64xf32, #tpu.memory_space<vmem>>, vector<128x64xf32>
    tpu.vector_store %arg5[%c0_35, %c0_36], %54 {strides = array<i32>} : memref<128x64xf32, #tpu.memory_space<vmem>>, vector<128x64xf32>,
    %85 = tpu.concatenate %72, %77, %82, %56, %59, %67 in 1 : vector<128x1xf32>, vector<128x1xf32>, vector<128x1xf32>, vector<128x1xf32>, vector<128x1xf32>, vector<128x1xf32> -> vector<128x6xf32>
    %c0_37 = arith.constant 0 : index
    %c0_38 = arith.constant 0 : index
    %86 = vector.load %arg6[%c0_37, %c0_38] : memref<128x6xf32, #tpu.memory_space<vmem>>, vector<128x6xf32>
    tpu.vector_store %arg6[%c0_37, %c0_38], %85 {strides = array<i32>} : memref<128x6xf32, #tpu.memory_space<vmem>>, vector<128x6xf32>,
    return
  }
  func.func @transform_0(%arg0: i32) -> (i32, i32, i32) {
    %c0_i32 = arith.constant 0 : i32
    %c0_i32_0 = arith.constant 0 : i32
    %c0_i32_1 = arith.constant 0 : i32
    return %c0_i32, %arg0, %c0_i32_0 : i32, i32, i32
  }
  func.func @transform_1(%arg0: i32) -> (i32, i32) {
    %c0_i32 = arith.constant 0 : i32
    %c0_i32_0 = arith.constant 0 : i32
    return %arg0, %c0_i32 : i32, i32
  }
  func.func @transform_2(%arg0: i32) -> (i32, i32) {
    %c0_i32 = arith.constant 0 : i32
    %c0_i32_0 = arith.constant 0 : i32
    return %arg0, %c0_i32 : i32, i32
  }
  func.func @transform_3(%arg0: i32) -> (i32, i32) {
    %c0_i32 = arith.constant 0 : i32
    %c0_i32_0 = arith.constant 0 : i32
    return %arg0, %c0_i32 : i32, i32
  }
  func.func @transform_4(%arg0: i32) -> (i32, i32) {
    %c0_i32 = arith.constant 0 : i32
    %c0_i32_0 = arith.constant 0 : i32
    return %arg0, %c0_i32 : i32, i32
  }
  func.func @transform_5(%arg0: i32) -> (i32, i32) {
    %c0_i32 = arith.constant 0 : i32
    %c0_i32_0 = arith.constant 0 : i32
    return %arg0, %c0_i32 : i32, i32
  }
}

</mosaic_0001>

<bundles_post_ra>
// kernel: tpu_custom_call.1
= control target key start
LH: loop header
LB: loop body
LE: loop exit
PB: predicated region body
PF: predicated region fallthrough
CT: control target
= control target key end

     0   :  { %s3211_s18 = smov 0   ;;  %s3213_s19 = smov 0   ;;  %s5877_s0 = inlined_call_operand.vmem [shape: f32[4,250,64], index: 0, kind: input, shape index: {}]   ;;  %s5878_s1 = inlined_call_operand.vmem [shape: f32[250,64], index: 1, kind: input, shape index: {}]   ;;  %s5879_s2 = inlined_call_operand.vmem [shape: f32[250,1], index: 2, kind: input, shape index: {}]   ;;  %s5880_s3 = inlined_call_operand.vmem [shape: f32[250,64], index: 3, kind: output, shape index: {0}]   ;;  %s5881_s4 = inlined_call_operand.vmem [shape: f32[250,64], index: 4, kind: output, shape index: {1}]   ;;  %s5882_s5 = inlined_call_operand.vmem [shape: f32[250,6], index: 5, kind: output, shape index: {2}]  }
   0x1   :  { %s3215_s20 = smov 0  }
   0x2 LB: > { %s2914_s21 = sadd.s32 4294967295, %s3170_s20   ;;  %s3228_s22 = sadd.s32 1, %s3170_s20   ;;  %s3170_s20 = sphi %s3215_s20, %s6180_s20   ;;  %s3166_s19 = sphi %s3213_s19, %s6179_s19   ;;  %s3162_s18 = sphi %s3211_s18, %s6178_s18  }
   0x3   : > { %s20_s23 = ssub.s32 %s3170_s20, %s3228_s22  ;;  %s23_s24 = sadd.s32 1, %s3166_s19 }
   0x4   : > { %p21_p0 = scmp.eq.s32.totalorder %s20_s23, 0  ;;  %p30_p1 = scmp.ne.s32.totalorder %s3166_s19, %s3162_s18 }
   0x5   : > { %p31_p2 = scmp.eq.s32.totalorder %s3170_s20, 0  ;;  %p2917_p4 = scmp.ge.s32.totalorder %s3170_s20, 2 }
   0x6   : > { %s3237_s25 = scalar_select %p21_p0, %s3166_s19, %s23_s24  }
   0x7   : > { %p32_p3 = por %p31_p2, %p30_p1  ;;  %186 = sbr.rel (%p2917_p4) target bundleno = 80 (0x50), region = 16 }
   0xc   : > { %189 = sbr.rel (!%p32_p3) target bundleno = 80 (0x50), region = 20  ;;  %s191_s26 = sand.u32 (%p32_p3), 1, %s3166_s19  }
   0xd   : > { %s2999_s27 = sshll.u32 (%p32_p3), %s3170_s20, 7  ;;  %s2918_s28 = sshll.u32 (%p32_p3), %s191_s26, 9 }
   0xe   : > { %s3245_s6 = scalar_lea.vmem (%p32_p3), %s5877_s0, %s2999_s27  ;;  %s3250_s7 = scalar_lea.vmem (%p32_p3), [#allocation2], %s2918_s28 }
   0xf   : > { %v351_v0 = vld [vmem:[%s3245_s6] sm:$0xff] (%p32_p3)  ;;  %v353_v1 = vld [vmem:[%s3245_s6 + $0x8] sm:$0xff] (%p32_p3)  ;;  %v355_v2 = vld [vmem:[%s3245_s6 + $0x10] sm:$0xff] (%p32_p3) }
  0x10   : > { %352 = vst [vmem:[%s3250_s7] sm:$0xff] (%p32_p3), %v351_v0  ;;  %v357_v3 = vld [vmem:[%s3245_s6 + $0x18] sm:$0xff] (%p32_p3)  ;;  %v359_v4 = vld [vmem:[%s3245_s6 + $0x20] sm:$0xff] (%p32_p3)  ;;  %v361_v5 = vld [vmem:[%s3245_s6 + $0x28] sm:$0xff] (%p32_p3) }
  0x11   : > { %354 = vst [vmem:[%s3250_s7 + $0x8] sm:$0xff] %v353_v1  ;;  %v363_v6 = vld [vmem:[%s3245_s6 + $0x30] sm:$0xff]  ;;  %v365_v7 = vld [vmem:[%s3245_s6 + $0x38] sm:$0xff]  ;;  %v367_v8 = vld [vmem:[%s3245_s6 + $0x40] sm:$0xff] }
  0x12   : > { %356 = vst [vmem:[%s3250_s7 + $0x10] sm:$0xff] %v355_v2  ;;  %v369_v9 = vld [vmem:[%s3245_s6 + $0x48] sm:$0xff]  ;;  %v371_v10 = vld [vmem:[%s3245_s6 + $0x50] sm:$0xff]  ;;  %v373_v11 = vld [vmem:[%s3245_s6 + $0x58] sm:$0xff] }
  0x13   : > { %358 = vst [vmem:[%s3250_s7 + $0x18] sm:$0xff] %v357_v3  ;;  %v375_v12 = vld [vmem:[%s3245_s6 + $0x60] sm:$0xff]  ;;  %v377_v13 = vld [vmem:[%s3245_s6 + $0x68] sm:$0xff]  ;;  %v379_v14 = vld [vmem:[%s3245_s6 + $0x70] sm:$0xff] }
  0x14   : > { %360 = vst [vmem:[%s3250_s7 + $0x20] sm:$0xff] %v359_v4  ;;  %v381_v15 = vld [vmem:[%s3245_s6 + $0x78] sm:$0xff]  ;;  %v383_v16 = vld [vmem:[%s3245_s6 + $0x100] sm:$0xff]  ;;  %v385_v17 = vld [vmem:[%s3245_s6 + $0x108] sm:$0xff] }
  0x15   : > { %362 = vst [vmem:[%s3250_s7 + $0x28] sm:$0xff] %v361_v5  ;;  %v387_v18 = vld [vmem:[%s3245_s6 + $0x110] sm:$0xff]  ;;  %v389_v19 = vld [vmem:[%s3245_s6 + $0x118] sm:$0xff]  ;;  %v391_v20 = vld [vmem:[%s3245_s6 + $0x120] sm:$0xff] }
  0x16   : > { %364 = vst [vmem:[%s3250_s7 + $0x30] sm:$0xff] %v363_v6  ;;  %v393_v21 = vld [vmem:[%s3245_s6 + $0x128] sm:$0xff]  ;;  %v395_v22 = vld [vmem:[%s3245_s6 + $0x130] sm:$0xff]  ;;  %v397_v23 = vld [vmem:[%s3245_s6 + $0x138] sm:$0xff] }
  0x17   : > { %366 = vst [vmem:[%s3250_s7 + $0x38] sm:$0xff] %v365_v7  ;;  %v399_v24 = vld [vmem:[%s3245_s6 + $0x140] sm:$0xff]  ;;  %v401_v25 = vld [vmem:[%s3245_s6 + $0x148] sm:$0xff]  ;;  %v403_v26 = vld [vmem:[%s3245_s6 + $0x150] sm:$0xff] }
  0x18   : > { %368 = vst [vmem:[%s3250_s7 + $0x40] sm:$0xff] %v367_v8  ;;  %v405_v27 = vld [vmem:[%s3245_s6 + $0x158] sm:$0xff]  ;;  %v407_v28 = vld [vmem:[%s3245_s6 + $0x160] sm:$0xff]  ;;  %v409_v29 = vld [vmem:[%s3245_s6 + $0x168] sm:$0xff] }
  0x19   : > { %370 = vst [vmem:[%s3250_s7 + $0x48] sm:$0xff] %v369_v9  ;;  %v411_v30 = vld [vmem:[%s3245_s6 + $0x170] sm:$0xff]  ;;  %v413_v31 = vld [vmem:[%s3245_s6 + $0x178] sm:$0xff]  ;;  %v415_v32 = vld [vmem:[%s3245_s6 + $0x200] sm:$0xff] }
  0x1a   : > { %372 = vst [vmem:[%s3250_s7 + $0x50] sm:$0xff] %v371_v10  ;;  %v417_v33 = vld [vmem:[%s3245_s6 + $0x208] sm:$0xff]  ;;  %v419_v34 = vld [vmem:[%s3245_s6 + $0x210] sm:$0xff]  ;;  %v421_v35 = vld [vmem:[%s3245_s6 + $0x218] sm:$0xff] }
  0x1b   : > { %374 = vst [vmem:[%s3250_s7 + $0x58] sm:$0xff] %v373_v11  ;;  %v423_v36 = vld [vmem:[%s3245_s6 + $0x220] sm:$0xff]  ;;  %v425_v37 = vld [vmem:[%s3245_s6 + $0x228] sm:$0xff]  ;;  %v427_v38 = vld [vmem:[%s3245_s6 + $0x230] sm:$0xff] }
  0x1c   : > { %376 = vst [vmem:[%s3250_s7 + $0x60] sm:$0xff] %v375_v12  ;;  %v429_v39 = vld [vmem:[%s3245_s6 + $0x238] sm:$0xff]  ;;  %v431_v40 = vld [vmem:[%s3245_s6 + $0x240] sm:$0xff]  ;;  %v433_v41 = vld [vmem:[%s3245_s6 + $0x248] sm:$0xff] }
  0x1d   : > { %378 = vst [vmem:[%s3250_s7 + $0x68] sm:$0xff] %v377_v13  ;;  %v435_v42 = vld [vmem:[%s3245_s6 + $0x250] sm:$0xff]  ;;  %v437_v43 = vld [vmem:[%s3245_s6 + $0x258] sm:$0xff]  ;;  %v439_v44 = vld [vmem:[%s3245_s6 + $0x260] sm:$0xff] }
  0x1e   : > { %380 = vst [vmem:[%s3250_s7 + $0x70] sm:$0xff] %v379_v14  ;;  %v441_v45 = vld [vmem:[%s3245_s6 + $0x268] sm:$0xff]  ;;  %v443_v46 = vld [vmem:[%s3245_s6 + $0x270] sm:$0xff]  ;;  %v445_v47 = vld [vmem:[%s3245_s6 + $0x278] sm:$0xff] }
  0x1f   : > { %382 = vst [vmem:[%s3250_s7 + $0x78] sm:$0xff] %v381_v15  ;;  %v447_v48 = vld [vmem:[%s3245_s6 + $0x300] sm:$0xff]  ;;  %v449_v49 = vld [vmem:[%s3245_s6 + $0x308] sm:$0xff]  ;;  %v451_v50 = vld [vmem:[%s3245_s6 + $0x310] sm:$0xff] }
  0x20   : > { %384 = vst [vmem:[%s3250_s7 + $0x80] sm:$0xff] %v383_v16  ;;  %v453_v51 = vld [vmem:[%s3245_s6 + $0x318] sm:$0xff]  ;;  %v455_v52 = vld [vmem:[%s3245_s6 + $0x320] sm:$0xff]  ;;  %v457_v53 = vld [vmem:[%s3245_s6 + $0x328] sm:$0xff] }
  0x21   : > { %386 = vst [vmem:[%s3250_s7 + $0x88] sm:$0xff] %v385_v17  ;;  %v459_v54 = vld [vmem:[%s3245_s6 + $0x330] sm:$0xff]  ;;  %v461_v55 = vld [vmem:[%s3245_s6 + $0x338] sm:$0xff]  ;;  %v463_v56 = vld [vmem:[%s3245_s6 + $0x340] sm:$0xff] }
  0x22   : > { %388 = vst [vmem:[%s3250_s7 + $0x90] sm:$0xff] %v387_v18  ;;  %v465_v57 = vld [vmem:[%s3245_s6 + $0x348] sm:$0xff]  ;;  %v467_v58 = vld [vmem:[%s3245_s6 + $0x350] sm:$0xff]  ;;  %v469_v59 = vld [vmem:[%s3245_s6 + $0x358] sm:$0xff] }
  0x23   : > { %390 = vst [vmem:[%s3250_s7 + $0x98] sm:$0xff] %v389_v19  ;;  %v471_v60 = vld [vmem:[%s3245_s6 + $0x360] sm:$0xff]  ;;  %v473_v61 = vld [vmem:[%s3245_s6 + $0x368] sm:$0xff]  ;;  %v475_v62 = vld [vmem:[%s3245_s6 + $0x370] sm:$0xff] }
  0x24   : > { %392 = vst [vmem:[%s3250_s7 + $0xa0] sm:$0xff] %v391_v20  ;;  %v477_v63 = vld [vmem:[%s3245_s6 + $0x378] sm:$0xff] }
  0x25   : > { %394 = vst [vmem:[%s3250_s7 + $0xa8] sm:$0xff] %v393_v21 }
  0x26   : > { %396 = vst [vmem:[%s3250_s7 + $0xb0] sm:$0xff] %v395_v22 }
  0x27   : > { %398 = vst [vmem:[%s3250_s7 + $0xb8] sm:$0xff] %v397_v23 }
  0x28   : > { %400 = vst [vmem:[%s3250_s7 + $0xc0] sm:$0xff] %v399_v24 }
  0x29   : > { %402 = vst [vmem:[%s3250_s7 + $0xc8] sm:$0xff] %v401_v25 }
  0x2a   : > { %404 = vst [vmem:[%s3250_s7 + $0xd0] sm:$0xff] %v403_v26 }
  0x2b   : > { %406 = vst [vmem:[%s3250_s7 + $0xd8] sm:$0xff] %v405_v27 }
  0x2c   : > { %408 = vst [vmem:[%s3250_s7 + $0xe0] sm:$0xff] %v407_v28 }
  0x2d   : > { %410 = vst [vmem:[%s3250_s7 + $0xe8] sm:$0xff] %v409_v29 }
  0x2e   : > { %412 = vst [vmem:[%s3250_s7 + $0xf0] sm:$0xff] %v411_v30 }
  0x2f   : > { %414 = vst [vmem:[%s3250_s7 + $0xf8] sm:$0xff] %v413_v31 }
  0x30   : > { %416 = vst [vmem:[%s3250_s7 + $0x100] sm:$0xff] %v415_v32 }
  0x31   : > { %418 = vst [vmem:[%s3250_s7 + $0x108] sm:$0xff] %v417_v33 }
  0x32   : > { %420 = vst [vmem:[%s3250_s7 + $0x110] sm:$0xff] %v419_v34 }
  0x33   : > { %422 = vst [vmem:[%s3250_s7 + $0x118] sm:$0xff] %v421_v35 }
  0x34   : > { %424 = vst [vmem:[%s3250_s7 + $0x120] sm:$0xff] %v423_v36 }
  0x35   : > { %426 = vst [vmem:[%s3250_s7 + $0x128] sm:$0xff] %v425_v37 }
  0x36   : > { %428 = vst [vmem:[%s3250_s7 + $0x130] sm:$0xff] %v427_v38 }
  0x37   : > { %430 = vst [vmem:[%s3250_s7 + $0x138] sm:$0xff] %v429_v39 }
  0x38   : > { %432 = vst [vmem:[%s3250_s7 + $0x140] sm:$0xff] %v431_v40 }
  0x39   : > { %434 = vst [vmem:[%s3250_s7 + $0x148] sm:$0xff] %v433_v41 }
  0x3a   : > { %436 = vst [vmem:[%s3250_s7 + $0x150] sm:$0xff] %v435_v42 }
  0x3b   : > { %438 = vst [vmem:[%s3250_s7 + $0x158] sm:$0xff] %v437_v43 }
  0x3c   : > { %440 = vst [vmem:[%s3250_s7 + $0x160] sm:$0xff] %v439_v44 }
  0x3d   : > { %442 = vst [vmem:[%s3250_s7 + $0x168] sm:$0xff] %v441_v45 }
  0x3e   : > { %444 = vst [vmem:[%s3250_s7 + $0x170] sm:$0xff] %v443_v46 }
  0x3f   : > { %446 = vst [vmem:[%s3250_s7 + $0x178] sm:$0xff] %v445_v47 }
  0x40   : > { %448 = vst [vmem:[%s3250_s7 + $0x180] sm:$0xff] %v447_v48 }
  0x41   : > { %450 = vst [vmem:[%s3250_s7 + $0x188] sm:$0xff] %v449_v49 }
  0x42   : > { %452 = vst [vmem:[%s3250_s7 + $0x190] sm:$0xff] %v451_v50 }
  0x43   : > { %454 = vst [vmem:[%s3250_s7 + $0x198] sm:$0xff] %v453_v51 }
  0x44   : > { %456 = vst [vmem:[%s3250_s7 + $0x1a0] sm:$0xff] %v455_v52 }
  0x45   : > { %458 = vst [vmem:[%s3250_s7 + $0x1a8] sm:$0xff] %v457_v53 }
  0x46   : > { %460 = vst [vmem:[%s3250_s7 + $0x1b0] sm:$0xff] %v459_v54 }
  0x47   : > { %462 = vst [vmem:[%s3250_s7 + $0x1b8] sm:$0xff] %v461_v55 }
  0x48   : > { %464 = vst [vmem:[%s3250_s7 + $0x1c0] sm:$0xff] %v463_v56 }
  0x49   : > { %466 = vst [vmem:[%s3250_s7 + $0x1c8] sm:$0xff] %v465_v57 }
  0x4a   : > { %468 = vst [vmem:[%s3250_s7 + $0x1d0] sm:$0xff] %v467_v58 }
  0x4b   : > { %470 = vst [vmem:[%s3250_s7 + $0x1d8] sm:$0xff] %v469_v59 }
  0x4c   : > { %472 = vst [vmem:[%s3250_s7 + $0x1e0] sm:$0xff] %v471_v60 }
  0x4d   : > { %474 = vst [vmem:[%s3250_s7 + $0x1e8] sm:$0xff] %v473_v61 }
  0x4e   : > { %476 = vst [vmem:[%s3250_s7 + $0x1f0] sm:$0xff] %v475_v62 }
  0x4f   : > { %478 = vst [vmem:[%s3250_s7 + $0x1f8] sm:$0xff] %v477_v63 }
  0x50 PF: > { %p2921_p5 = scmp.ge.s32.totalorder %s3170_s20, 1  ;;  %p501_p6 = scmp.lt.s32.totalorder %s3170_s20, 3 }
  0x52   : > { %p502_p7 = pnand %p2921_p5, %p501_p6 }
  0x54   : > { %505 = sbr.rel (%p502_p7) target bundleno = 1469 (0x5bd), region = 66 }
  0x59   : > { %s2923_s8 = sshll.u32 %s2914_s21, 4  ;;  %s3172_s13 = smov 1   ;;  %v3173_v6 = vmov 0   ;;  %vm779_vm0 = vcmask 515072   ;;  %vm1084_vm1 = vcmask 7168   ;;  %vm5918_vm2 = vcmask 15360  }
  0x5a   : > { %p557_p8 = scmp.lt.s32.totalorder %s2923_s8, 31  ;;  %3035 = vset.pattern.permute.xlu1 %v3173_v6  ;;  %3034 = vset.pattern.permute.xlu0 %v3173_v6  ;;  %s3174_s17 = smov 127   ;;  %vm5916_vm3 = vcmask 31744   ;;  %vm1375_vm4 = vcmask 64512   ;;  %vm1472_vm5 = vcmask 130048   ;;  %vm1569_vm6 = vcmask 261120  }
  0x5b   : > { %3033 = vset.pattern.permute.xlu2 %v3173_v6  ;;  %s508_s20 = sand.u32 1, %s3162_s18   ;;  %s3175_s18 = smov 2   ;;  %vm1746_vm7 = vcmask 523264  }
  0x5c   : > { %s6182_s8 = smov (!%p557_p8, %s2923_s8), 31  ;;  %s2922_s21 = sshll.u32 %s508_s20, 9 }
  0x5d   : > { %s3381_s9 = sshll.u32 %s6182_s8, 3  ;;  %s3536_s23 = scalar_lea.vmem [#allocation2], %s2922_s21 }
  0x5e   : > { %s3387_s12 = scalar_lea.vmem %s5878_s1, %s3381_s9  ;;  %s3466_s16 = scalar_lea.vmem %s5879_s2, %s3381_s9 }
  0x5f   : > { %v3390_v0 = vld [vmem:[%s3387_s12 + $0x10] sm:$0xff]  ;;  %v3393_v1 = vld [vmem:[%s3387_s12] sm:$0xff]  ;;  %v3405_v3 = vld [vmem:[%s3387_s12 + $0x18] sm:$0xff]  ;;  %s3176_s24 = smov 4   ;;  %s3177_s26 = smov 8  }
  0x60   : > { %655 = vrot.lane.b32.xlu1 %v3390_v0, %s3172_s13  ;;  %651 = vrot.lane.b32.xlu0 %v3393_v1, %s3172_s13  ;;  %v3400_v2 = vld [vmem:[%s3387_s12 + $0x20] sm:$0xff]  ;;  %v3408_v4 = vld [vmem:[%s3387_s12 + $0x8] sm:$0xff]  ;;  %s3178_s27 = smov 16   ;;  %s3179_s28 = smov 32  }
  0x61   : > { %659 = vrot.lane.b32.xlu2 %v3400_v2, %s3172_s13  ;;  %v3411_v5 = vld [vmem:[%s3387_s12 + $0x28] sm:$0xff]  ;;  %v3420_v7 = vld [vmem:[%s3387_s12 + $0x30] sm:$0xff]  ;;  %v3423_v8 = vld [vmem:[%s3387_s12 + $0x38] sm:$0xff]  ;;  %s4164_s6 = scalar_lea.vmem %s5880_s3, %s3381_s9  ;;  %s4171_s10 = scalar_lea.vmem %s5881_s4, %s3381_s9 }
  0x62   : > { %v3426_v9 = vld [vmem:[%s3387_s12 + $0x40] sm:$0xff]  ;;  %v3435_v10 = vld [vmem:[%s3387_s12 + $0x48] sm:$0xff]  ;;  %v3438_v11 = vld [vmem:[%s3387_s12 + $0x50] sm:$0xff] }
  0x63   : > { %v3441_v12 = vld [vmem:[%s3387_s12 + $0x58] sm:$0xff]  ;;  %v3450_v13 = vld [vmem:[%s3387_s12 + $0x60] sm:$0xff]  ;;  %v3453_v14 = vld [vmem:[%s3387_s12 + $0x68] sm:$0xff] }
  0x64   : > { %v3456_v15 = vld [vmem:[%s3387_s12 + $0x70] sm:$0xff]  ;;  %v3471_v16 = vld [vmem:[%s3387_s12 + $0x78] sm:$0xff]  ;;  %v619_v18 = vld [vmem:[%s3466_s16] sm:$0xff] }
  0x65   : > { %v621_v17 = vld [vmem:[%s3466_s16 + $0x10] sm:$0xff]  ;;  %v623_v19 = vld [vmem:[%s3466_s16 + $0x20] sm:$0xff]  ;;  %v620_v20 = vld [vmem:[%s3466_s16 + $0x8] sm:$0xff] }
  0x66   : > { %v622_v21 = vld [vmem:[%s3466_s16 + $0x18] sm:$0xff]  ;;  %v625_v23 = vld [vmem:[%s3466_s16 + $0x30] sm:$0xff]  ;;  %v624_v24 = vld [vmem:[%s3466_s16 + $0x28] sm:$0xff] }
  0x67   : > { %v626_v22 = vld [vmem:[%s3466_s16 + $0x38] sm:$0xff]  ;;  %v629_v25 = vld [vmem:[%s3466_s16 + $0x50] sm:$0xff]  ;;  %v628_v26 = vld [vmem:[%s3466_s16 + $0x48] sm:$0xff] }
  0x68   : > { %657 = vrot.lane.b32.xlu1 %v3405_v3, %s3172_s13  ;;  %653 = vrot.lane.b32.xlu0 %v3408_v4, %s3172_s13  ;;  %v627_v27 = vld [vmem:[%s3466_s16 + $0x40] sm:$0xff]  ;;  %v632_v28 = vld [vmem:[%s3466_s16 + $0x68] sm:$0xff] }
  0x69   : > { %661 = vrot.lane.b32.xlu2 %v3411_v5, %s3172_s13  ;;  %v631_v29 = vld [vmem:[%s3466_s16 + $0x60] sm:$0xff]  ;;  %v630_v30 = vld [vmem:[%s3466_s16 + $0x58] sm:$0xff]  ;;  %v633_v31 = vld [vmem:[%s3466_s16 + $0x70] sm:$0xff] }
  0x6a   : > { %v634_v63 = vld [vmem:[%s3466_s16 + $0x78] sm:$0xff] }
  0x70   : > { %663 = vrot.lane.b32.xlu0 %v3420_v7, %s3172_s13  ;;  %665 = vrot.lane.b32.xlu1 %v3423_v8, %s3172_s13 }
  0x71   : > { %667 = vrot.lane.b32.xlu2 %v3426_v9, %s3172_s13 }
  0x78   : > { %669 = vrot.lane.b32.xlu0 %v3435_v10, %s3172_s13  ;;  %671 = vrot.lane.b32.xlu1 %v3438_v11, %s3172_s13 }
  0x79   : > { %673 = vrot.lane.b32.xlu2 %v3441_v12, %s3172_s13 }
  0x80   : > { %675 = vrot.lane.b32.xlu0 %v3450_v13, %s3172_s13  ;;  %677 = vrot.lane.b32.xlu1 %v3453_v14, %s3172_s13 }
  0x81   : > { %679 = vrot.lane.b32.xlu2 %v3456_v15, %s3172_s13 }
  0x88   : > { %681 = vrot.lane.b32.xlu0 %v3471_v16, %s3172_s13  ;;  %808 = vperm.xlu1 %3035, %v621_v17  }
  0x89   : > { %798 = vperm.xlu2 %3033, %v619_v18  }
  0x90   : > { %818 = vperm.xlu1 %3035, %v623_v19   ;;  %803 = vperm.xlu0 %3034, %v620_v20   ;;  %v2937_v19 = vld [vmem:[%s3536_s23 + $0x1a0] sm:$0xff] }
  0x91   : > { %813 = vperm.xlu2 %3033, %v622_v21  }
  0x98   : > { %833 = vperm.xlu1 %3035, %v626_v22   ;;  %828 = vperm.xlu0 %3034, %v625_v23   ;;  %v896_v22 = vmax.f32 %v2937_v19, 0.0 }
  0x99   : > { %823 = vperm.xlu2 %3033, %v624_v24  }
  0xa0   : > { %848 = vperm.xlu1 %3035, %v629_v25   ;;  %843 = vperm.xlu0 %3034, %v628_v26  }
  0xa1   : > { %838 = vperm.xlu2 %3033, %v627_v27   ;;  %v912_v27 = vsub.f32 0.0, %v896_v22  ;;  %v2941_v22 = vld [vmem:[%s3536_s23 + $0x1c0] sm:$0xff] }
  0xa8   : > { %863 = vperm.xlu1 %3035, %v632_v28   ;;  %858 = vperm.xlu0 %3034, %v631_v29   ;;  %v2933_v28 = vld [vmem:[%s3536_s23 + $0x180] sm:$0xff]  ;;  %v2935_v29 = vld [vmem:[%s3536_s23 + $0x190] sm:$0xff] }
  0xa9   : > { %853 = vperm.xlu2 %3033, %v630_v30  }
  0xb1   : > { %868 = vperm.xlu2 %3033, %v633_v31   ;;  %v2940_v31 = vld [vmem:[%s3536_s23 + $0x1b8] sm:$0xff] }
  0xbb   : > { %v660_v32 = vpop.permute.xlu2 %659 }
  0xbc   : > { %v703_v47 = vsub.f32 %v3400_v2, %v660_v32 }
  0xc3   : > { %v662_v33 = vpop.permute.xlu2 %661 }
  0xc4   : > { %v704_v38 = vsub.f32 %v3411_v5, %v662_v33  ;;  %v892_v33 = vmax.f32 %v2933_v28, 0.0 }
  0xcb   : > { %v668_v39 = vpop.permute.xlu2 %667 }
  0xcc   : > { %v707_v44 = vsub.f32 %v3426_v9, %v668_v39 }
  0xd2   : > { %v656_v34 = vpop.permute.xlu1 %655  ;;  %v652_v35 = vpop.permute.xlu0 %651 }
  0xd3   : > { %v701_v36 = vsub.f32 %v3390_v0, %v656_v34  ;;  %v699_v37 = vsub.f32 %v3393_v1, %v652_v35  ;;  %v674_v48 = vpop.permute.xlu2 %673  ;;  %v894_v34 = vmax.f32 %v2935_v29, 0.0 }
  0xd4   : > { %v710_v50 = vsub.f32 %v3441_v12, %v674_v48  ;;  %v2934_v12 = vld [vmem:[%s3536_s23 + $0x188] sm:$0xff] }
  0xd5   : > { %735 = vrot.lane.b32.xlu0 %v701_v36, %s3174_s17  ;;  %731 = vrot.lane.b32.xlu1 %v699_v37, %s3174_s17  ;;  %v899_v36 = vmax.f32 %v2940_v31, 0.0 }
  0xd7   : > { %v915_v48 = vsub.f32 0.0, %v899_v36 }
  0xda   : > { %v658_v40 = vpop.permute.xlu1 %657  ;;  %v654_v41 = vpop.permute.xlu0 %653 }
  0xdb   : > { %v702_v42 = vsub.f32 %v3405_v3, %v658_v40  ;;  %v700_v43 = vsub.f32 %v3408_v4, %v654_v41  ;;  %v680_v54 = vpop.permute.xlu2 %679  ;;  %v908_v40 = vsub.f32 0.0, %v892_v33 }
  0xdc   : > { %v713_v56 = vsub.f32 %v3456_v15, %v680_v54 }
  0xdd   : > { %741 = vrot.lane.b32.xlu0 %v704_v38, %s3174_s17  ;;  %737 = vrot.lane.b32.xlu1 %v702_v42, %s3174_s17  ;;  %v910_v42 = vsub.f32 0.0, %v894_v34  ;;  %v900_v34 = vmax.f32 %v2941_v22, 0.0 }
  0xde   : > { %733 = vrot.lane.b32.xlu2 %v700_v43, %s3174_s17 }
  0xe2   : > { %v664_v45 = vpop.permute.xlu0 %663  ;;  %v666_v49 = vpop.permute.xlu1 %665 }
  0xe3   : > { %v705_v46 = vsub.f32 %v3420_v7, %v664_v45  ;;  %v706_v51 = vsub.f32 %v3423_v8, %v666_v49  ;;  %v799_v1 = vpop.permute.xlu2 %798  ;;  %v2943_v45 = vld [vmem:[%s3536_s23 + $0x1d0] sm:$0xff] }
  0xe5   : > { %747 = vrot.lane.b32.xlu0 %v707_v44, %s3174_s17  ;;  %743 = vrot.lane.b32.xlu1 %v705_v46, %s3174_s17  ;;  %v2936_v44 = vld [vmem:[%s3536_s23 + $0x198] sm:$0xff] }
  0xe6   : > { %739 = vrot.lane.b32.xlu2 %v703_v47, %s3174_s17 }
  0xea   : > { %v670_v52 = vpop.permute.xlu0 %669  ;;  %v672_v55 = vpop.permute.xlu1 %671 }
  0xeb   : > { %v708_v53 = vsub.f32 %v3435_v10, %v670_v52  ;;  %v709_v57 = vsub.f32 %v3438_v11, %v672_v55  ;;  %v3523_v2 = vpop.permute.xlu2 %813 }
  0xed   : > { %753 = vrot.lane.b32.xlu0 %v710_v50, %s3174_s17  ;;  %749 = vrot.lane.b32.xlu1 %v708_v53, %s3174_s17  ;;  %v2938_v50 = vld [vmem:[%s3536_s23 + $0x1a8] sm:$0xff] }
  0xee   : > { %745 = vrot.lane.b32.xlu2 %v706_v51, %s3174_s17 }
  0xf2   : > { %v676_v58 = vpop.permute.xlu0 %675  ;;  %v678_v60 = vpop.permute.xlu1 %677 }
  0xf3   : > { %v711_v59 = vsub.f32 %v3450_v13, %v676_v58  ;;  %v712_v61 = vsub.f32 %v3453_v14, %v678_v60  ;;  %v3525_v3 = vpop.permute.xlu2 %823  ;;  %v893_v13 = vmax.f32 %v2934_v12, 0.0 }
  0xf5   : > { %759 = vrot.lane.b32.xlu0 %v713_v56, %s3174_s17  ;;  %755 = vrot.lane.b32.xlu1 %v711_v59, %s3174_s17  ;;  %v909_v17 = vsub.f32 0.0, %v893_v13  ;;  %v895_v56 = vmax.f32 %v2936_v44, 0.0 }
  0xf6   : > { %751 = vrot.lane.b32.xlu2 %v709_v57, %s3174_s17  ;;  %v902_v57 = vmax.f32 %v2943_v45, 0.0 }
  0xfa   : > { %v682_v62 = vpop.permute.xlu0 %681  ;;  %v809_v4 = vpop.permute.xlu1 %808 }
  0xfb   : > { %v714_v0 = vsub.f32 %v3471_v16, %v682_v62  ;;  %v3527_v5 = vpop.permute.xlu2 %838 }
  0xfd   : > { %873 = vperm.xlu0 %3034, %v634_v63   ;;  %761 = vrot.lane.b32.xlu1 %v714_v0, %s3174_s17 }
  0xfe   : > { %757 = vrot.lane.b32.xlu2 %v712_v61, %s3174_s17  ;;  %v897_v61 = vmax.f32 %v2938_v50, 0.0 }
 0x100   : > { %v913_v13 = vsub.f32 0.0, %v897_v61 }
 0x102   : > { %v819_v6 = vpop.permute.xlu1 %818  ;;  %v804_v7 = vpop.permute.xlu0 %803 }
 0x103   : > { %v3529_v8 = vpop.permute.xlu2 %853 }
 0x10a   : > { %v834_v9 = vpop.permute.xlu1 %833  ;;  %v3532_v10 = vpop.permute.xlu0 %828 }
 0x10b   : > { %v3534_v11 = vpop.permute.xlu2 %868 }
 0x112   : > { %v3539_v14 = vpop.permute.xlu1 %848  ;;  %v3541_v15 = vpop.permute.xlu0 %843 }
 0x11a   : > { %v3545_v24 = vpop.permute.xlu1 %863  ;;  %v3547_v25 = vpop.permute.xlu0 %858 }
 0x138   : > { %v734_v16 = vpop.permute.xlu2 %733 }
 0x139   : > { %v781_v18 = vsel %vm779_vm0, %v734_v16, 1e+10 }
 0x13a   : > { %v877_v20 = vmul.f32 %v804_v7, %v781_v18 }
 0x13c   : > { %v925_v21 = vmul.f32 %v909_v17, %v877_v20  ;;  %v2946_v17 = vld [vmem:[%s3536_s23 + $0x1e8] sm:$0xff] }
 0x13e   : > { %v942_v23 = vmul.f32 1.442695, %v925_v21  ;;  %v2939_v21 = vld [vmem:[%s3536_s23 + $0x1b0] sm:$0xff] }
 0x13f   : > { %v898_v33 = vmax.f32 %v2939_v21, 0.0 }
 0x140   : > { %3036 = vpow2.f32 %v942_v23  ;;  %v740_v26 = vpop.permute.xlu2 %739 }
 0x141   : > { %v784_v30 = vsel %vm779_vm0, %v740_v26, 1e+10  ;;  %v914_v45 = vsub.f32 0.0, %v898_v33 }
 0x142   : > { %v880_v32 = vmul.f32 %v819_v6, %v784_v30  ;;  %v911_v6 = vsub.f32 0.0, %v895_v56  ;;  %v905_v30 = vmax.f32 %v2946_v17, 0.0 }
 0x144   : > { %v928_v35 = vmul.f32 %v912_v27, %v880_v32 }
 0x146   : > { %v3553_v37 = vpop.eup %3036  ;;  %v948_v38 = vmul.f32 1.442695, %v928_v35 }
 0x147   : > { %v732_v39 = vpop.permute.xlu1 %731  ;;  %v736_v41 = vpop.permute.xlu0 %735  ;;  %v973_v43 = vsub.f32 1.0, %v3553_v37 }
 0x148   : > { %3038 = vpow2.f32 %v948_v38  ;;  %v780_v46 = vsel %vm779_vm0, %v732_v39, 1e+10  ;;  %v746_v47 = vpop.permute.xlu2 %745  ;;  %v782_v49 = vsel %vm779_vm0, %v736_v41, 1e+10 }
 0x149   : > { %v876_v51 = vmul.f32 %v799_v1, %v780_v46  ;;  %v787_v52 = vsel %vm779_vm0, %v746_v47, 1e+10  ;;  %v878_v53 = vmul.f32 %v809_v4, %v782_v49  ;;  %v989_v54 = vsub.f32 1.0, %v973_v43  ;;  %v2942_v49 = vld [vmem:[%s3536_s23 + $0x1c8] sm:$0xff] }
 0x14a   : > { %v883_v55 = vmul.f32 %v834_v9, %v787_v52  ;;  %v918_v9 = vsub.f32 0.0, %v902_v57  ;;  %v916_v47 = vsub.f32 0.0, %v900_v34 }
 0x14b   : > { %v924_v58 = vmul.f32 %v908_v40, %v876_v51  ;;  %v926_v59 = vmul.f32 %v910_v42, %v878_v53  ;;  %v3564_v60 = vadd.f32 1e-10, %v989_v54  ;;  %v2944_v54 = vld [vmem:[%s3536_s23 + $0x1d8] sm:$0xff] }
 0x14c   : > { %v931_v62 = vmul.f32 %v915_v48, %v883_v55 }
 0x14d   : > { %v940_v63 = vmul.f32 1.442695, %v924_v58  ;;  %v944_v0 = vmul.f32 1.442695, %v926_v59  ;;  %1038 = vrot.lane.b32.xlu2 %v3564_v60, %s3172_s13 }
 0x14e   : > { %v3568_v1 = vpop.eup %3038  ;;  %v954_v4 = vmul.f32 1.442695, %v931_v62 }
 0x14f   : > { %3040 = vpow2.f32 %v940_v63  ;;  %v738_v7 = vpop.permute.xlu1 %737  ;;  %v742_v12 = vpop.permute.xlu0 %741  ;;  %v976_v16 = vsub.f32 1.0, %v3568_v1 }
 0x150   : > { %3042 = vpow2.f32 %v954_v4  ;;  %v783_v18 = vsel %vm779_vm0, %v738_v7, 1e+10  ;;  %v752_v19 = vpop.permute.xlu2 %751  ;;  %v785_v20 = vsel %vm779_vm0, %v742_v12, 1e+10  ;;  %v901_v4 = vmax.f32 %v2942_v49, 0.0 }
 0x151   : > { %3044 = vpow2.f32 %v944_v0  ;;  %v879_v23 = vmul.f32 %v3523_v2, %v783_v18  ;;  %v790_v26 = vsel %vm779_vm0, %v752_v19, 1e+10  ;;  %v881_v27 = vmul.f32 %v3525_v3, %v785_v20 }
 0x152   : > { %v886_v28 = vmul.f32 %v3539_v14, %v790_v26  ;;  %v992_v29 = vsub.f32 1.0, %v976_v16  ;;  %v921_v14 = vsub.f32 0.0, %v905_v30  ;;  %v917_v22 = vsub.f32 0.0, %v901_v4 }
 0x153   : > { %v927_v31 = vmul.f32 %v911_v6, %v879_v23  ;;  %v929_v32 = vmul.f32 %v913_v13, %v881_v27  ;;  %v903_v6 = vmax.f32 %v2944_v54, 0.0 }
 0x154   : > { %v934_v35 = vmul.f32 %v918_v9, %v886_v28  ;;  %v3582_v36 = vadd.f32 1e-10, %v992_v29  ;;  %v2945_v28 = vld [vmem:[%s3536_s23 + $0x1e0] sm:$0xff] }
 0x155   : > { %v3584_v38 = vpop.eup %3040  ;;  %v946_v2 = vmul.f32 1.442695, %v927_v31  ;;  %v950_v39 = vmul.f32 1.442695, %v929_v32  ;;  %v919_v26 = vsub.f32 0.0, %v903_v6  ;;  %v2947_v32 = vld [vmem:[%s3536_s23 + $0x1f0] sm:$0xff] }
 0x156   : > { %v3586_v40 = vpop.eup %3042  ;;  %v960_v3 = vmul.f32 1.442695, %v934_v35  ;;  %1044 = vrot.lane.b32.xlu2 %v3582_v36, %s3172_s13  ;;  %v972_v41 = vsub.f32 1.0, %v3584_v38 }
 0x157   : > { %v3591_v42 = vpop.eup %3044  ;;  %3046 = vpow2.f32 %v946_v2  ;;  %v744_v44 = vpop.permute.xlu1 %743  ;;  %v979_v48 = vsub.f32 1.0, %v3586_v40 }
 0x158   : > { %v748_v46 = vpop.permute.xlu0 %747  ;;  %3048 = vpow2.f32 %v960_v3  ;;  %v758_v50 = vpop.permute.xlu2 %757  ;;  %v786_v51 = vsel %vm779_vm0, %v744_v44, 1e+10  ;;  %v974_v53 = vsub.f32 1.0, %v3591_v42  ;;  %v988_v62 = vsub.f32 1.0, %v972_v41 }
 0x159   : > { %v788_v52 = vsel %vm779_vm0, %v748_v46, 1e+10  ;;  %3050 = vpow2.f32 %v950_v39  ;;  %v793_v55 = vsel %vm779_vm0, %v758_v50, 1e+10  ;;  %v882_v56 = vmul.f32 %v3532_v10, %v786_v51 }
 0x15a   : > { %v884_v57 = vmul.f32 %v3527_v5, %v788_v52  ;;  %v889_v58 = vmul.f32 %v3545_v24, %v793_v55  ;;  %v990_v59 = vsub.f32 1.0, %v974_v53  ;;  %v995_v61 = vsub.f32 1.0, %v979_v48 }
 0x15b   : > { %v930_v63 = vmul.f32 %v914_v45, %v882_v56  ;;  %v3613_v5 = vadd.f32 1e-10, %v988_v62  ;;  %v904_v3 = vmax.f32 %v2945_v28, 0.0  ;;  %v906_v46 = vmax.f32 %v2947_v32, 0.0 }
 0x15c   : > { %v932_v0 = vmul.f32 %v916_v47, %v884_v57  ;;  %v937_v7 = vmul.f32 %v921_v14, %v889_v58  ;;  %v3609_v9 = vadd.f32 1e-10, %v990_v59  ;;  %v3611_v10 = vadd.f32 1e-10, %v995_v61  ;;  %v2948_v61 = vld [vmem:[%s3536_s23 + $0x1f8] sm:$0xff] }
 0x15d   : > { %v3615_v24 = vpop.eup %3046  ;;  %v952_v12 = vmul.f32 1.442695, %v930_v63  ;;  %1036 = vrot.lane.b32.xlu1 %v3613_v5, %s3172_s13  ;;  %v920_v56 = vsub.f32 0.0, %v904_v3  ;;  %v922_v58 = vsub.f32 0.0, %v906_v46 }
 0x15e   : > { %v956_v13 = vmul.f32 1.442695, %v932_v0  ;;  %v3617_v17 = vpop.eup %3048  ;;  %v966_v18 = vmul.f32 1.442695, %v937_v7  ;;  %1040 = vrot.lane.b32.xlu0 %v3609_v9, %s3172_s13  ;;  %1050 = vrot.lane.b32.xlu2 %v3611_v10, %s3172_s13  ;;  %v975_v19 = vsub.f32 1.0, %v3615_v24 }
 0x15f   : > { %v3624_v20 = vpop.eup %3050  ;;  %3052 = vpow2.f32 %v952_v12  ;;  %v750_v21 = vpop.permute.xlu1 %749  ;;  %v982_v27 = vsub.f32 1.0, %v3617_v17 }
 0x160   : > { %v754_v23 = vpop.permute.xlu0 %753  ;;  %3054 = vpow2.f32 %v966_v18  ;;  %v789_v29 = vsel %vm779_vm0, %v750_v21, 1e+10  ;;  %v977_v31 = vsub.f32 1.0, %v3624_v20  ;;  %v991_v39 = vsub.f32 1.0, %v975_v19 }
 0x161   : > { %v791_v30 = vsel %vm779_vm0, %v754_v23, 1e+10  ;;  %3056 = vpow2.f32 %v956_v13  ;;  %v885_v33 = vmul.f32 %v3541_v15, %v789_v29  ;;  %v998_v35 = vsub.f32 1.0, %v982_v27 }
 0x162   : > { %v887_v34 = vmul.f32 %v3529_v8, %v791_v30  ;;  %v993_v2 = vsub.f32 1.0, %v977_v31  ;;  %v3646_v15 = vadd.f32 1e-10, %v991_v39  ;;  %v907_v18 = vmax.f32 %v2948_v61, 0.0 }
 0x163   : > { %v933_v14 = vmul.f32 %v917_v22, %v885_v33  ;;  %v3642_v45 = vadd.f32 1e-10, %v998_v35 }
 0x164   : > { %v935_v44 = vmul.f32 %v919_v26, %v887_v34  ;;  %v3644_v47 = vadd.f32 1e-10, %v993_v2  ;;  %v923_v35 = vsub.f32 0.0, %v907_v18 }
 0x165   : > { %v3648_v8 = vpop.eup %3052  ;;  %v958_v49 = vmul.f32 1.442695, %v933_v14  ;;  %1042 = vrot.lane.b32.xlu1 %v3646_v15, %s3172_s13 }
 0x166   : > { %v962_v50 = vmul.f32 1.442695, %v935_v44  ;;  %v3650_v51 = vpop.eup %3054  ;;  %1046 = vrot.lane.b32.xlu0 %v3644_v47, %s3172_s13  ;;  %1056 = vrot.lane.b32.xlu2 %v3642_v45, %s3172_s13  ;;  %v978_v52 = vsub.f32 1.0, %v3648_v8 }
 0x167   : > { %v3657_v54 = vpop.eup %3056  ;;  %3058 = vpow2.f32 %v958_v49  ;;  %v756_v55 = vpop.permute.xlu1 %755  ;;  %v985_v59 = vsub.f32 1.0, %v3650_v51 }
 0x168   : > { %v760_v57 = vpop.permute.xlu0 %759  ;;  %3060 = vpow2.f32 %v962_v50  ;;  %v792_v62 = vsel %vm779_vm0, %v756_v55, 1e+10  ;;  %v980_v0 = vsub.f32 1.0, %v3657_v54  ;;  %v994_v12 = vsub.f32 1.0, %v978_v52 }
 0x169   : > { %v794_v63 = vsel %vm779_vm0, %v760_v57, 1e+10  ;;  %v888_v4 = vmul.f32 %v3547_v25, %v792_v62  ;;  %v1001_v7 = vsub.f32 1.0, %v985_v59 }
 0x16a   : > { %v890_v6 = vmul.f32 %v3534_v11, %v794_v63  ;;  %v996_v13 = vsub.f32 1.0, %v980_v0  ;;  %v3676_v26 = vadd.f32 1e-10, %v994_v12 }
 0x16b   : > { %v936_v21 = vmul.f32 %v920_v56, %v888_v4  ;;  %v3674_v23 = vadd.f32 1e-10, %v1001_v7 }
 0x16c   : > { %v938_v22 = vmul.f32 %v922_v58, %v890_v6  ;;  %v3678_v28 = vadd.f32 1e-10, %v996_v13 }
 0x16d   : > { %v3680_v25 = vpop.eup %3058  ;;  %v964_v11 = vmul.f32 1.442695, %v936_v21  ;;  %1048 = vrot.lane.b32.xlu1 %v3676_v26, %s3172_s13 }
 0x16e   : > { %v968_v29 = vmul.f32 1.442695, %v938_v22  ;;  %v3682_v30 = vpop.eup %3060  ;;  %1052 = vrot.lane.b32.xlu0 %v3678_v28, %s3172_s13  ;;  %1062 = vrot.lane.b32.xlu2 %v3674_v23, %s3172_s13  ;;  %v981_v32 = vsub.f32 1.0, %v3680_v25 }
 0x16f   : > { %3062 = vpow2.f32 %v964_v11  ;;  %v762_v33 = vpop.permute.xlu1 %761  ;;  %v983_v2 = vsub.f32 1.0, %v3682_v30 }
 0x170   : > { %v874_v34 = vpop.permute.xlu0 %873  ;;  %3064 = vpow2.f32 %v968_v29  ;;  %v795_v39 = vsel %vm779_vm0, %v762_v33, 1e+10  ;;  %v997_v3 = vsub.f32 1.0, %v981_v32 }
 0x171   : > { %v891_v14 = vmul.f32 %v874_v34, %v795_v39  ;;  %v999_v44 = vsub.f32 1.0, %v983_v2 }
 0x172   : > { %v3699_v50 = vadd.f32 1e-10, %v997_v3 }
 0x173   : > { %v939_v46 = vmul.f32 %v923_v35, %v891_v14  ;;  %v3697_v49 = vadd.f32 1e-10, %v999_v44 }
 0x175   : > { %v3701_v55 = vpop.eup %3062  ;;  %v970_v56 = vmul.f32 1.442695, %v939_v46  ;;  %1054 = vrot.lane.b32.xlu1 %v3699_v50, %s3172_s13 }
 0x176   : > { %v3703_v57 = vpop.eup %3064  ;;  %1058 = vrot.lane.b32.xlu0 %v3697_v49, %s3172_s13  ;;  %v984_v58 = vsub.f32 1.0, %v3701_v55 }
 0x177   : > { %3066 = vpow2.f32 %v970_v56  ;;  %v986_v61 = vsub.f32 1.0, %v3703_v57 }
 0x178   : > { %v1000_v62 = vsub.f32 1.0, %v984_v58 }
 0x179   : > { %v1002_v63 = vsub.f32 1.0, %v986_v61 }
 0x17a   : > { %v3717_v6 = vadd.f32 1e-10, %v1000_v62 }
 0x17b   : > { %v3715_v4 = vadd.f32 1e-10, %v1002_v63 }
 0x17d   : > { %v3719_v7 = vpop.eup %3066  ;;  %1060 = vrot.lane.b32.xlu1 %v3717_v6, %s3172_s13 }
 0x17e   : > { %1064 = vrot.lane.b32.xlu0 %v3715_v4, %s3172_s13  ;;  %v987_v12 = vsub.f32 1.0, %v3719_v7  ;;  %v3133_v7 = vld [vmem:[%s3387_s12 + $0x20] sm:$0xff] }
 0x180   : > { %v1003_v13 = vsub.f32 1.0, %v987_v12 }
 0x182   : > { %v3728_v18 = vadd.f32 1e-10, %v1003_v13 }
 0x185   : > { %1066 = vrot.lane.b32.xlu1 %v3728_v18, %s3172_s13 }
 0x1a7   : > { %v1039_v21 = vpop.permute.xlu2 %1038 }
 0x1a8   : > { %v1086_v22 = vsel %vm1084_vm1, 1.0, %v1039_v21 }
 0x1a9   : > { %v3734_v11 = vmul.f32 %v1086_v22, %v3564_v60 }
 0x1ab   : > { %1135 = vrot.lane.b32.xlu0 %v3734_v11, %s3175_s18 }
 0x1b0   : > { %v1045_v29 = vpop.permute.xlu2 %1044 }
 0x1b1   : > { %v1089_v33 = vsel %vm1084_vm1, 1.0, %v1045_v29 }
 0x1b2   : > { %v3740_v34 = vmul.f32 %v1089_v33, %v3582_v36 }
 0x1b4   : > { %1141 = vrot.lane.b32.xlu0 %v3740_v34, %s3175_s18 }
 0x1b8   : > { %v1051_v35 = vpop.permute.xlu2 %1050 }
 0x1b9   : > { %v1092_v39 = vsel %vm1084_vm1, 1.0, %v1051_v35 }
 0x1ba   : > { %v3746_v3 = vmul.f32 %v1092_v39, %v3611_v10 }
 0x1bc   : > { %1147 = vrot.lane.b32.xlu0 %v3746_v3, %s3175_s18 }
 0x1c0   : > { %v1057_v60 = vpop.permute.xlu2 %1056 }
 0x1c1   : > { %v1095_v14 = vsel %vm1084_vm1, 1.0, %v1057_v60 }
 0x1c2   : > { %v3752_v44 = vmul.f32 %v1095_v14, %v3642_v45 }
 0x1c4   : > { %1153 = vrot.lane.b32.xlu0 %v3752_v44, %s3175_s18 }
 0x1c8   : > { %v1063_v36 = vpop.permute.xlu2 %1062 }
 0x1c9   : > { %v1098_v46 = vsel %vm1084_vm1, 1.0, %v1063_v36 }
 0x1ca   : > { %v3758_v56 = vmul.f32 %v1098_v46, %v3674_v23 }
 0x1cc   : > { %1159 = vrot.lane.b32.xlu0 %v3758_v56, %s3175_s18 }
 0x1cf   : > { %v1037_v63 = vpop.permute.xlu1 %1036 }
 0x1d0   : > { %v1041_v10 = vpop.permute.xlu0 %1040  ;;  %v1085_v45 = vsel %vm1084_vm1, 1.0, %v1037_v63 }
 0x1d1   : > { %v1087_v62 = vsel %vm1084_vm1, 1.0, %v1041_v10  ;;  %v1101_v21 = vmul.f32 %v1085_v45, %v3613_v5 }
 0x1d2   : > { %v3764_v13 = vmul.f32 %v1087_v62, %v3609_v9 }
 0x1d3   : > { %1133 = vrot.lane.b32.xlu2 %v1101_v21, %s3175_s18 }
 0x1d4   : > { %1137 = vrot.lane.b32.xlu1 %v3764_v13, %s3175_s18 }
 0x1d7   : > { %v1043_v29 = vpop.permute.xlu1 %1042 }
 0x1d8   : > { %v1047_v23 = vpop.permute.xlu0 %1046  ;;  %v1088_v35 = vsel %vm1084_vm1, 1.0, %v1043_v29 }
 0x1d9   : > { %v1090_v22 = vsel %vm1084_vm1, 1.0, %v1047_v23  ;;  %v1104_v9 = vmul.f32 %v1088_v35, %v3646_v15 }
 0x1da   : > { %v3773_v33 = vmul.f32 %v1090_v22, %v3644_v47 }
 0x1db   : > { %1139 = vrot.lane.b32.xlu2 %v1104_v9, %s3175_s18 }
 0x1dc   : > { %1143 = vrot.lane.b32.xlu1 %v3773_v33, %s3175_s18 }
 0x1df   : > { %v1049_v60 = vpop.permute.xlu1 %1048 }
 0x1e0   : > { %v1053_v5 = vpop.permute.xlu0 %1052  ;;  %v1091_v36 = vsel %vm1084_vm1, 1.0, %v1049_v60 }
 0x1e1   : > { %v1093_v39 = vsel %vm1084_vm1, 1.0, %v1053_v5  ;;  %v1107_v47 = vmul.f32 %v1091_v36, %v3676_v26 }
 0x1e2   : > { %v3782_v14 = vmul.f32 %v1093_v39, %v3678_v28 }
 0x1e3   : > { %1145 = vrot.lane.b32.xlu2 %v1107_v47, %s3175_s18 }
 0x1e4   : > { %1149 = vrot.lane.b32.xlu1 %v3782_v14, %s3175_s18 }
 0x1e7   : > { %v1055_v10 = vpop.permute.xlu1 %1054 }
 0x1e8   : > { %v1059_v15 = vpop.permute.xlu0 %1058  ;;  %v1094_v63 = vsel %vm1084_vm1, 1.0, %v1055_v10 }
 0x1e9   : > { %v1096_v46 = vsel %vm1084_vm1, 1.0, %v1059_v15  ;;  %v1110_v28 = vmul.f32 %v1094_v63, %v3699_v50 }
 0x1ea   : > { %v3791_v62 = vmul.f32 %v1096_v46, %v3697_v49 }
 0x1eb   : > { %1151 = vrot.lane.b32.xlu2 %v1110_v28, %s3175_s18 }
 0x1ec   : > { %1155 = vrot.lane.b32.xlu1 %v3791_v62, %s3175_s18 }
 0x1ef   : > { %v1061_v23 = vpop.permute.xlu1 %1060 }
 0x1f0   : > { %v1065_v26 = vpop.permute.xlu0 %1064  ;;  %v1097_v29 = vsel %vm1084_vm1, 1.0, %v1061_v23 }
 0x1f1   : > { %v1099_v45 = vsel %vm1084_vm1, 1.0, %v1065_v26  ;;  %v1113_v49 = vmul.f32 %v1097_v29, %v3717_v6 }
 0x1f2   : > { %v3800_v22 = vmul.f32 %v1099_v45, %v3715_v4 }
 0x1f3   : > { %1157 = vrot.lane.b32.xlu2 %v1113_v49, %s3175_s18 }
 0x1f4   : > { %1161 = vrot.lane.b32.xlu1 %v3800_v22, %s3175_s18 }
 0x1f7   : > { %v1067_v50 = vpop.permute.xlu1 %1066 }
 0x1f8   : > { %v1100_v35 = vsel %vm1084_vm1, 1.0, %v1067_v50 }
 0x1f9   : > { %v1116_v5 = vmul.f32 %v1100_v35, %v3728_v18 }
 0x1fb   : > { %1163 = vrot.lane.b32.xlu2 %v1116_v5, %s3175_s18 }
 0x21d   : > { %v1136_v39 = vpop.permute.xlu0 %1135 }
 0x21e   : > { %v1183_v4 = vsel %vm5918_vm2, 1.0, %v1136_v39 }
 0x21f   : > { %v3812_v60 = vmul.f32 %v1183_v4, %v3734_v11 }
 0x221   : > { %1232 = vrot.lane.b32.xlu1 %v3812_v60, %s3176_s24 }
 0x226   : > { %v1142_v6 = vpop.permute.xlu0 %1141 }
 0x227   : > { %v1186_v36 = vsel %vm5918_vm2, 1.0, %v1142_v6 }
 0x228   : > { %v3818_v15 = vmul.f32 %v1186_v36, %v3740_v34 }
 0x22a   : > { %1238 = vrot.lane.b32.xlu1 %v3818_v15, %s3176_s24 }
 0x22d   : > { %v1134_v10 = vpop.permute.xlu2 %1133 }
 0x22e   : > { %v1148_v18 = vpop.permute.xlu0 %1147  ;;  %v1182_v63 = vsel %vm5918_vm2, 1.0, %v1134_v10 }
 0x22f   : > { %v1189_v46 = vsel %vm5918_vm2, 1.0, %v1148_v18  ;;  %v3827_v26 = vmul.f32 %v1182_v63, %v1101_v21 }
 0x230   : > { %v3824_v11 = vmul.f32 %v1189_v46, %v3746_v3 }
 0x231   : > { %1230 = vrot.lane.b32.xlu0 %v3827_v26, %s3176_s24 }
 0x232   : > { %1244 = vrot.lane.b32.xlu1 %v3824_v11, %s3176_s24 }
 0x235   : > { %v1140_v23 = vpop.permute.xlu2 %1139 }
 0x236   : > { %v1154_v34 = vpop.permute.xlu0 %1153  ;;  %v1185_v3 = vsel %vm5918_vm2, 1.0, %v1140_v23 }
 0x237   : > { %v1192_v45 = vsel %vm5918_vm2, 1.0, %v1154_v34  ;;  %v3838_v50 = vmul.f32 %v1185_v3, %v1104_v9 }
 0x238   : > { %v3835_v29 = vmul.f32 %v1192_v45, %v3752_v44 }
 0x239   : > { %1236 = vrot.lane.b32.xlu0 %v3838_v50, %s3176_s24 }
 0x23a   : > { %1250 = vrot.lane.b32.xlu1 %v3835_v29, %s3176_s24 }
 0x23d   : > { %v1146_v39 = vpop.permute.xlu2 %1145 }
 0x23e   : > { %v1160_v21 = vpop.permute.xlu0 %1159  ;;  %v1188_v44 = vsel %vm5918_vm2, 1.0, %v1146_v39 }
 0x23f   : > { %v1195_v35 = vsel %vm5918_vm2, 1.0, %v1160_v21  ;;  %v3849_v6 = vmul.f32 %v1188_v44, %v1107_v47 }
 0x240   : > { %v3846_v4 = vmul.f32 %v1195_v35, %v3758_v56 }
 0x241   : > { %1242 = vrot.lane.b32.xlu0 %v3849_v6, %s3176_s24 }
 0x242   : > { %1256 = vrot.lane.b32.xlu1 %v3846_v4, %s3176_s24 }
 0x245   : > { %v1152_v36 = vpop.permute.xlu2 %1151 }
 0x246   : > { %v1138_v9 = vpop.permute.xlu1 %1137  ;;  %v1191_v46 = vsel %vm5918_vm2, 1.0, %v1152_v36 }
 0x247   : > { %v1184_v18 = vsel %vm5918_vm2, 1.0, %v1138_v9  ;;  %v3858_v56 = vmul.f32 %v1191_v46, %v1110_v28 }
 0x248   : > { %v1200_v10 = vmul.f32 %v1184_v18, %v3764_v13 }
 0x249   : > { %1248 = vrot.lane.b32.xlu0 %v3858_v56, %s3176_s24 }
 0x24a   : > { %1234 = vrot.lane.b32.xlu2 %v1200_v10, %s3176_s24 }
 0x24d   : > { %v1158_v63 = vpop.permute.xlu2 %1157 }
 0x24e   : > { %v1144_v47 = vpop.permute.xlu1 %1143  ;;  %v1194_v45 = vsel %vm5918_vm2, 1.0, %v1158_v63 }
 0x24f   : > { %v1187_v34 = vsel %vm5918_vm2, 1.0, %v1144_v47  ;;  %v3866_v3 = vmul.f32 %v1194_v45, %v1113_v49 }
 0x250   : > { %v1203_v23 = vmul.f32 %v1187_v34, %v3773_v33 }
 0x251   : > { %1254 = vrot.lane.b32.xlu0 %v3866_v3, %s3176_s24 }
 0x252   : > { %1240 = vrot.lane.b32.xlu2 %v1203_v23, %s3176_s24 }
 0x255   : > { %v1164_v28 = vpop.permute.xlu2 %1163 }
 0x256   : > { %v1150_v13 = vpop.permute.xlu1 %1149  ;;  %v1197_v35 = vsel %vm5918_vm2, 1.0, %v1164_v28 }
 0x257   : > { %v1190_v21 = vsel %vm5918_vm2, 1.0, %v1150_v13  ;;  %v3874_v44 = vmul.f32 %v1197_v35, %v1116_v5 }
 0x258   : > { %v1206_v39 = vmul.f32 %v1190_v21, %v3782_v14 }
 0x259   : > { %1260 = vrot.lane.b32.xlu0 %v3874_v44, %s3176_s24 }
 0x25a   : > { %1246 = vrot.lane.b32.xlu2 %v1206_v39, %s3176_s24 }
 0x25e   : > { %v1156_v33 = vpop.permute.xlu1 %1155 }
 0x25f   : > { %v1193_v49 = vsel %vm5918_vm2, 1.0, %v1156_v33 }
 0x260   : > { %v1209_v9 = vmul.f32 %v1193_v49, %v3791_v62 }
 0x262   : > { %1252 = vrot.lane.b32.xlu2 %v1209_v9, %s3176_s24 }
 0x266   : > { %v1162_v36 = vpop.permute.xlu1 %1161 }
 0x267   : > { %v1196_v18 = vsel %vm5918_vm2, 1.0, %v1162_v36 }
 0x268   : > { %v1212_v46 = vmul.f32 %v1196_v18, %v3800_v22 }
 0x26a   : > { %1258 = vrot.lane.b32.xlu2 %v1212_v46, %s3176_s24 }
 0x293   : > { %v1233_v14 = vpop.permute.xlu1 %1232 }
 0x294   : > { %v1280_v5 = vsel %vm5916_vm3, 1.0, %v1233_v14 }
 0x295   : > { %v3887_v47 = vmul.f32 %v1280_v5, %v3812_v60 }
 0x297   : > { %1329 = vrot.lane.b32.xlu2 %v3887_v47, %s3177_s26 }
 0x29c   : > { %v1239_v62 = vpop.permute.xlu1 %1238 }
 0x29d   : > { %v1283_v63 = vsel %vm5916_vm3, 1.0, %v1239_v62 }
 0x29e   : > { %v3893_v34 = vmul.f32 %v1283_v63, %v3818_v15 }
 0x2a0   : > { %1335 = vrot.lane.b32.xlu2 %v3893_v34, %s3177_s26 }
 0x2a3   : > { %v1231_v13 = vpop.permute.xlu0 %1230 }
 0x2a4   : > { %v1235_v22 = vpop.permute.xlu2 %1234  ;;  %v1245_v45 = vpop.permute.xlu1 %1244  ;;  %v1279_v21 = vsel %vm5916_vm3, 1.0, %v1231_v13 }
 0x2a5   : > { %v1281_v28 = vsel %vm5916_vm3, 1.0, %v1235_v22  ;;  %v1286_v60 = vsel %vm5916_vm3, 1.0, %v1245_v45  ;;  %v3904_v49 = vmul.f32 %v1279_v21, %v3827_v26 }
 0x2a6   : > { %v3900_v35 = vmul.f32 %v1281_v28, %v1200_v10  ;;  %v1302_v33 = vmul.f32 %v1286_v60, %v3824_v11 }
 0x2a7   : > { %1327 = vrot.lane.b32.xlu1 %v3904_v49, %s3177_s26 }
 0x2a8   : > { %1331 = vrot.lane.b32.xlu0 %v3900_v35, %s3177_s26  ;;  %1341 = vrot.lane.b32.xlu2 %v1302_v33, %s3177_s26 }
 0x2ab   : > { %v1237_v18 = vpop.permute.xlu0 %1236 }
 0x2ac   : > { %v1241_v15 = vpop.permute.xlu2 %1240  ;;  %v1251_v36 = vpop.permute.xlu1 %1250  ;;  %v1282_v11 = vsel %vm5916_vm3, 1.0, %v1237_v18 }
 0x2ad   : > { %v1284_v14 = vsel %vm5916_vm3, 1.0, %v1241_v15  ;;  %v1289_v10 = vsel %vm5916_vm3, 1.0, %v1251_v36  ;;  %v3918_v62 = vmul.f32 %v1282_v11, %v3838_v50 }
 0x2ae   : > { %v3914_v5 = vmul.f32 %v1284_v14, %v1203_v23  ;;  %v1305_v26 = vmul.f32 %v1289_v10, %v3835_v29 }
 0x2af   : > { %1333 = vrot.lane.b32.xlu1 %v3918_v62, %s3177_s26 }
 0x2b0   : > { %1337 = vrot.lane.b32.xlu0 %v3914_v5, %s3177_s26  ;;  %1347 = vrot.lane.b32.xlu2 %v1305_v26, %s3177_s26 }
 0x2b3   : > { %v1243_v45 = vpop.permute.xlu0 %1242 }
 0x2b4   : > { %v1247_v63 = vpop.permute.xlu2 %1246  ;;  %v1257_v22 = vpop.permute.xlu1 %1256  ;;  %v1285_v29 = vsel %vm5916_vm3, 1.0, %v1243_v45 }
 0x2b5   : > { %v1287_v13 = vsel %vm5916_vm3, 1.0, %v1247_v63  ;;  %v1292_v23 = vsel %vm5916_vm3, 1.0, %v1257_v22  ;;  %v3932_v60 = vmul.f32 %v1285_v29, %v3849_v6 }
 0x2b6   : > { %v3928_v28 = vmul.f32 %v1287_v13, %v1206_v39  ;;  %v1308_v50 = vmul.f32 %v1292_v23, %v3846_v4 }
 0x2b7   : > { %1339 = vrot.lane.b32.xlu1 %v3932_v60, %s3177_s26 }
 0x2b8   : > { %1343 = vrot.lane.b32.xlu0 %v3928_v28, %s3177_s26  ;;  %1353 = vrot.lane.b32.xlu2 %v1308_v50, %s3177_s26 }
 0x2bb   : > { %v1249_v15 = vpop.permute.xlu0 %1248 }
 0x2bc   : > { %v1253_v21 = vpop.permute.xlu2 %1252  ;;  %v1288_v39 = vsel %vm5916_vm3, 1.0, %v1249_v15 }
 0x2bd   : > { %v1290_v36 = vsel %vm5916_vm3, 1.0, %v1253_v21  ;;  %v3944_v4 = vmul.f32 %v1288_v39, %v3858_v56 }
 0x2be   : > { %v3941_v18 = vmul.f32 %v1290_v36, %v1209_v9 }
 0x2bf   : > { %1345 = vrot.lane.b32.xlu1 %v3944_v4, %s3177_s26 }
 0x2c0   : > { %1349 = vrot.lane.b32.xlu0 %v3941_v18, %s3177_s26 }
 0x2c3   : > { %v1255_v14 = vpop.permute.xlu0 %1254 }
 0x2c4   : > { %v1259_v6 = vpop.permute.xlu2 %1258  ;;  %v1291_v11 = vsel %vm5916_vm3, 1.0, %v1255_v14 }
 0x2c5   : > { %v1293_v10 = vsel %vm5916_vm3, 1.0, %v1259_v6  ;;  %v3955_v9 = vmul.f32 %v1291_v11, %v3866_v3 }
 0x2c6   : > { %v3952_v63 = vmul.f32 %v1293_v10, %v1212_v46 }
 0x2c7   : > { %1351 = vrot.lane.b32.xlu1 %v3955_v9, %s3177_s26 }
 0x2c8   : > { %1355 = vrot.lane.b32.xlu0 %v3952_v63, %s3177_s26 }
 0x2cb   : > { %v1261_v56 = vpop.permute.xlu0 %1260 }
 0x2cc   : > { %v1294_v22 = vsel %vm5916_vm3, 1.0, %v1261_v56 }
 0x2cd   : > { %v3963_v45 = vmul.f32 %v1294_v22, %v3874_v44 }
 0x2cf   : > { %1357 = vrot.lane.b32.xlu1 %v3963_v45, %s3177_s26 }
 0x2f1   : > { %v1330_v46 = vpop.permute.xlu2 %1329 }
 0x2f2   : > { %v1377_v3 = vsel %vm1375_vm4, 1.0, %v1330_v46 }
 0x2f3   : > { %v3969_v13 = vmul.f32 %v1377_v3, %v3887_v47 }
 0x2f5   : > { %1426 = vrot.lane.b32.xlu0 %v3969_v13, %s3178_s27 }
 0x2fa   : > { %v1336_v23 = vpop.permute.xlu2 %1335 }
 0x2fb   : > { %v1380_v29 = vsel %vm1375_vm4, 1.0, %v1336_v23 }
 0x2fc   : > { %v3975_v44 = vmul.f32 %v1380_v29, %v3893_v34 }
 0x2fe   : > { %1432 = vrot.lane.b32.xlu0 %v3975_v44, %s3178_s27 }
 0x302   : > { %v1342_v21 = vpop.permute.xlu2 %1341 }
 0x303   : > { %v1383_v15 = vsel %vm1375_vm4, 1.0, %v1342_v21 }
 0x304   : > { %v3980_v36 = vmul.f32 %v1383_v15, %v1302_v33 }
 0x306   : > { %1438 = vrot.lane.b32.xlu0 %v3980_v36, %s3178_s27 }
 0x30a   : > { %v1348_v47 = vpop.permute.xlu2 %1347 }
 0x30b   : > { %v1386_v39 = vsel %vm1375_vm4, 1.0, %v1348_v47 }
 0x30c   : > { %v3985_v6 = vmul.f32 %v1386_v39, %v1305_v26 }
 0x30e   : > { %1444 = vrot.lane.b32.xlu0 %v3985_v6, %s3178_s27 }
 0x312   : > { %v1354_v34 = vpop.permute.xlu2 %1353 }
 0x313   : > { %v1389_v14 = vsel %vm1375_vm4, 1.0, %v1354_v34 }
 0x314   : > { %v3990_v10 = vmul.f32 %v1389_v14, %v1308_v50 }
 0x316   : > { %1450 = vrot.lane.b32.xlu0 %v3990_v10, %s3178_s27 }
 0x319   : > { %v1328_v56 = vpop.permute.xlu1 %1327 }
 0x31a   : > { %v1332_v33 = vpop.permute.xlu0 %1331  ;;  %v1376_v26 = vsel %vm1375_vm4, 1.0, %v1328_v56 }
 0x31b   : > { %v1378_v11 = vsel %vm1375_vm4, 1.0, %v1332_v33  ;;  %v1392_v46 = vmul.f32 %v1376_v26, %v3904_v49 }
 0x31c   : > { %v3996_v22 = vmul.f32 %v1378_v11, %v3900_v35 }
 0x31d   : > { %1424 = vrot.lane.b32.xlu2 %v1392_v46, %s3178_s27 }
 0x31e   : > { %1428 = vrot.lane.b32.xlu1 %v3996_v22, %s3178_s27 }
 0x321   : > { %v1334_v23 = vpop.permute.xlu1 %1333 }
 0x322   : > { %v1338_v50 = vpop.permute.xlu0 %1337  ;;  %v1379_v21 = vsel %vm1375_vm4, 1.0, %v1334_v23 }
 0x323   : > { %v1381_v3 = vsel %vm1375_vm4, 1.0, %v1338_v50  ;;  %v1395_v35 = vmul.f32 %v1379_v21, %v3918_v62 }
 0x324   : > { %v4005_v29 = vmul.f32 %v1381_v3, %v3914_v5 }
 0x325   : > { %1430 = vrot.lane.b32.xlu2 %v1395_v35, %s3178_s27 }
 0x326   : > { %1434 = vrot.lane.b32.xlu1 %v4005_v29, %s3178_s27 }
 0x329   : > { %v1340_v47 = vpop.permute.xlu1 %1339 }
 0x32a   : > { %v1344_v49 = vpop.permute.xlu0 %1343  ;;  %v1382_v34 = vsel %vm1375_vm4, 1.0, %v1340_v47 }
 0x32b   : > { %v1384_v15 = vsel %vm1375_vm4, 1.0, %v1344_v49  ;;  %v1398_v5 = vmul.f32 %v1382_v34, %v3932_v60 }
 0x32c   : > { %v4014_v39 = vmul.f32 %v1384_v15, %v3928_v28 }
 0x32d   : > { %1436 = vrot.lane.b32.xlu2 %v1398_v5, %s3178_s27 }
 0x32e   : > { %1440 = vrot.lane.b32.xlu1 %v4014_v39, %s3178_s27 }
 0x331   : > { %v1346_v33 = vpop.permute.xlu1 %1345 }
 0x332   : > { %v1350_v62 = vpop.permute.xlu0 %1349  ;;  %v1385_v56 = vsel %vm1375_vm4, 1.0, %v1346_v33 }
 0x333   : > { %v1387_v14 = vsel %vm1375_vm4, 1.0, %v1350_v62  ;;  %v1401_v28 = vmul.f32 %v1385_v56, %v3944_v4 }
 0x334   : > { %v4023_v11 = vmul.f32 %v1387_v14, %v3941_v18 }
 0x335   : > { %1442 = vrot.lane.b32.xlu2 %v1401_v28, %s3178_s27 }
 0x336   : > { %1446 = vrot.lane.b32.xlu1 %v4023_v11, %s3178_s27 }
 0x339   : > { %v1352_v50 = vpop.permute.xlu1 %1351 }
 0x33a   : > { %v1356_v60 = vpop.permute.xlu0 %1355  ;;  %v1388_v23 = vsel %vm1375_vm4, 1.0, %v1352_v50 }
 0x33b   : > { %v1390_v26 = vsel %vm1375_vm4, 1.0, %v1356_v60  ;;  %v1404_v18 = vmul.f32 %v1388_v23, %v3955_v9 }
 0x33c   : > { %v4032_v3 = vmul.f32 %v1390_v26, %v3952_v63 }
 0x33d   : > { %1448 = vrot.lane.b32.xlu2 %v1404_v18, %s3178_s27 }
 0x33e   : > { %1452 = vrot.lane.b32.xlu1 %v4032_v3, %s3178_s27 }
 0x341   : > { %v1358_v4 = vpop.permute.xlu1 %1357 }
 0x342   : > { %v1391_v21 = vsel %vm1375_vm4, 1.0, %v1358_v4 }
 0x343   : > { %v1407_v49 = vmul.f32 %v1391_v21, %v3963_v45 }
 0x345   : > { %1454 = vrot.lane.b32.xlu2 %v1407_v49, %s3178_s27 }
 0x367   : > { %v1427_v15 = vpop.permute.xlu0 %1426 }
 0x368   : > { %v1474_v63 = vsel %vm1472_vm5, 1.0, %v1427_v15 }
 0x369   : > { %v4044_v47 = vmul.f32 %v1474_v63, %v3969_v13 }
 0x36b   : > { %1523 = vrot.lane.b32.xlu1 %v4044_v47, %s3179_s28 }
 0x370   : > { %v1433_v9 = vpop.permute.xlu0 %1432 }
 0x371   : > { %v1477_v34 = vsel %vm1472_vm5, 1.0, %v1433_v9 }
 0x372   : > { %v4050_v62 = vmul.f32 %v1477_v34, %v3975_v44 }
 0x374   : > { %1529 = vrot.lane.b32.xlu1 %v4050_v62, %s3179_s28 }
 0x377   : > { %v1425_v33 = vpop.permute.xlu2 %1424 }
 0x378   : > { %v1439_v45 = vpop.permute.xlu0 %1438  ;;  %v1473_v56 = vsel %vm1472_vm5, 1.0, %v1425_v33 }
 0x379   : > { %v1480_v14 = vsel %vm1472_vm5, 1.0, %v1439_v45  ;;  %v4059_v60 = vmul.f32 %v1473_v56, %v1392_v46 }
 0x37a   : > { %v4056_v13 = vmul.f32 %v1480_v14, %v3980_v36 }
 0x37b   : > { %1521 = vrot.lane.b32.xlu0 %v4059_v60, %s3179_s28 }
 0x37c   : > { %1535 = vrot.lane.b32.xlu1 %v4056_v13, %s3179_s28 }
 0x37f   : > { %v1431_v50 = vpop.permute.xlu2 %1430 }
 0x380   : > { %v1445_v44 = vpop.permute.xlu0 %1444  ;;  %v1476_v36 = vsel %vm1472_vm5, 1.0, %v1431_v50 }
 0x381   : > { %v1483_v26 = vsel %vm1472_vm5, 1.0, %v1445_v44  ;;  %v4070_v4 = vmul.f32 %v1476_v36, %v1395_v35 }
 0x382   : > { %v4067_v23 = vmul.f32 %v1483_v26, %v3985_v6 }
 0x383   : > { %1527 = vrot.lane.b32.xlu0 %v4070_v4, %s3179_s28 }
 0x384   : > { %1541 = vrot.lane.b32.xlu1 %v4067_v23, %s3179_s28 }
 0x387   : > { %v1437_v15 = vpop.permute.xlu2 %1436 }
 0x388   : > { %v1451_v46 = vpop.permute.xlu0 %1450  ;;  %v1479_v6 = vsel %vm1472_vm5, 1.0, %v1437_v15 }
 0x389   : > { %v1486_v21 = vsel %vm1472_vm5, 1.0, %v1451_v46  ;;  %v4081_v9 = vmul.f32 %v1479_v6, %v1398_v5 }
 0x38a   : > { %v4078_v63 = vmul.f32 %v1486_v21, %v3990_v10 }
 0x38b   : > { %1533 = vrot.lane.b32.xlu0 %v4081_v9, %s3179_s28 }
 0x38c   : > { %1547 = vrot.lane.b32.xlu1 %v4078_v63, %s3179_s28 }
 0x38f   : > { %v1443_v34 = vpop.permute.xlu2 %1442 }
 0x390   : > { %v1429_v35 = vpop.permute.xlu1 %1428  ;;  %v1482_v14 = vsel %vm1472_vm5, 1.0, %v1443_v34 }
 0x391   : > { %v1475_v45 = vsel %vm1472_vm5, 1.0, %v1429_v35  ;;  %v4090_v10 = vmul.f32 %v1482_v14, %v1401_v28 }
 0x392   : > { %v1491_v33 = vmul.f32 %v1475_v45, %v3996_v22 }
 0x393   : > { %1539 = vrot.lane.b32.xlu0 %v4090_v10, %s3179_s28 }
 0x394   : > { %1525 = vrot.lane.b32.xlu2 %v1491_v33, %s3179_s28 }
 0x397   : > { %v1449_v56 = vpop.permute.xlu2 %1448 }
 0x398   : > { %v1435_v5 = vpop.permute.xlu1 %1434  ;;  %v1485_v26 = vsel %vm1472_vm5, 1.0, %v1449_v56 }
 0x399   : > { %v1478_v44 = vsel %vm1472_vm5, 1.0, %v1435_v5  ;;  %v4098_v36 = vmul.f32 %v1485_v26, %v1404_v18 }
 0x39a   : > { %v1494_v50 = vmul.f32 %v1478_v44, %v4005_v29 }
 0x39b   : > { %1545 = vrot.lane.b32.xlu0 %v4098_v36, %s3179_s28 }
 0x39c   : > { %1531 = vrot.lane.b32.xlu2 %v1494_v50, %s3179_s28 }
 0x39f   : > { %v1455_v28 = vpop.permute.xlu2 %1454 }
 0x3a0   : > { %v1441_v22 = vpop.permute.xlu1 %1440  ;;  %v1488_v21 = vsel %vm1472_vm5, 1.0, %v1455_v28 }
 0x3a1   : > { %v1481_v46 = vsel %vm1472_vm5, 1.0, %v1441_v22  ;;  %v4106_v6 = vmul.f32 %v1488_v21, %v1407_v49 }
 0x3a2   : > { %v1497_v15 = vmul.f32 %v1481_v46, %v4014_v39 }
 0x3a3   : > { %1551 = vrot.lane.b32.xlu0 %v4106_v6, %s3179_s28 }
 0x3a4   : > { %1537 = vrot.lane.b32.xlu2 %v1497_v15, %s3179_s28 }
 0x3a8   : > { %v1447_v29 = vpop.permute.xlu1 %1446 }
 0x3a9   : > { %v1484_v18 = vsel %vm1472_vm5, 1.0, %v1447_v29 }
 0x3aa   : > { %v1500_v35 = vmul.f32 %v1484_v18, %v4023_v11 }
 0x3ac   : > { %1543 = vrot.lane.b32.xlu2 %v1500_v35, %s3179_s28 }
 0x3b0   : > { %v1453_v34 = vpop.permute.xlu1 %1452 }
 0x3b1   : > { %v1487_v45 = vsel %vm1472_vm5, 1.0, %v1453_v34 }
 0x3b2   : > { %v1503_v14 = vmul.f32 %v1487_v45, %v4032_v3 }
 0x3b4   : > { %1549 = vrot.lane.b32.xlu2 %v1503_v14, %s3179_s28 }
 0x3dd   : > { %v1524_v39 = vpop.permute.xlu1 %1523 }
 0x3de   : > { %v1571_v49 = vsel %vm1569_vm6, 1.0, %v1524_v39 }
 0x3df   : > { %v1587_v5 = vmul.f32 %v1571_v49, %v4044_v47 }
 0x3e1   : > { %1620 = vrot.lane.b32.xlu2 %v1587_v5, %s3172_s13 }
 0x3e6   : > { %v1530_v56 = vpop.permute.xlu1 %1529 }
 0x3e7   : > { %v1574_v11 = vsel %vm1569_vm6, 1.0, %v1530_v56 }
 0x3e8   : > { %v1590_v44 = vmul.f32 %v1574_v11, %v4050_v62 }
 0x3ea   : > { %1626 = vrot.lane.b32.xlu2 %v1590_v44, %s3172_s13 }
 0x3ed   : > { %v1522_v3 = vpop.permute.xlu0 %1521 }
 0x3ee   : > { %v1526_v26 = vpop.permute.xlu2 %1525  ;;  %v1536_v22 = vpop.permute.xlu1 %1535  ;;  %v1570_v21 = vsel %vm1569_vm6, 1.0, %v1522_v3 }
 0x3ef   : > { %v1572_v28 = vsel %vm1569_vm6, 1.0, %v1526_v26  ;;  %v1577_v46 = vsel %vm1569_vm6, 1.0, %v1536_v22  ;;  %v1586_v18 = vmul.f32 %v1570_v21, %v4059_v60 }
 0x3f0   : > { %v1588_v29 = vmul.f32 %v1572_v28, %v1491_v33  ;;  %v1593_v47 = vmul.f32 %v1577_v46, %v4056_v13 }
 0x3f1   : > { %1618 = vrot.lane.b32.xlu1 %v1586_v18, %s3172_s13 }
 0x3f2   : > { %1622 = vrot.lane.b32.xlu0 %v1588_v29, %s3172_s13  ;;  %1632 = vrot.lane.b32.xlu2 %v1593_v47, %s3172_s13 }
 0x3f5   : > { %v1528_v45 = vpop.permute.xlu0 %1527 }
 0x3f6   : > { %v1532_v62 = vpop.permute.xlu2 %1531  ;;  %v1542_v34 = vpop.permute.xlu1 %1541  ;;  %v1573_v5 = vsel %vm1569_vm6, 1.0, %v1528_v45 }
 0x3f7   : > { %v1575_v39 = vsel %vm1569_vm6, 1.0, %v1532_v62  ;;  %v1580_v49 = vsel %vm1569_vm6, 1.0, %v1542_v34  ;;  %v1589_v60 = vmul.f32 %v1573_v5, %v4070_v4 }
 0x3f8   : > { %v1591_v33 = vmul.f32 %v1575_v39, %v1494_v50  ;;  %v1596_v13 = vmul.f32 %v1580_v49, %v4067_v23 }
 0x3f9   : > { %1624 = vrot.lane.b32.xlu1 %v1589_v60, %s3172_s13 }
 0x3fa   : > { %1628 = vrot.lane.b32.xlu0 %v1591_v33, %s3172_s13  ;;  %1638 = vrot.lane.b32.xlu2 %v1596_v13, %s3172_s13 }
 0x3fd   : > { %v1534_v44 = vpop.permute.xlu0 %1533 }
 0x3fe   : > { %v1538_v56 = vpop.permute.xlu2 %1537  ;;  %v1548_v11 = vpop.permute.xlu1 %1547  ;;  %v1576_v3 = vsel %vm1569_vm6, 1.0, %v1534_v44 }
 0x3ff   : > { %v1578_v26 = vsel %vm1569_vm6, 1.0, %v1538_v56  ;;  %v1583_v22 = vsel %vm1569_vm6, 1.0, %v1548_v11  ;;  %v1592_v4 = vmul.f32 %v1576_v3, %v4081_v9 }
 0x400   : > { %v1594_v50 = vmul.f32 %v1578_v26, %v1497_v15  ;;  %v1599_v23 = vmul.f32 %v1583_v22, %v4078_v63 }
 0x401   : > { %1630 = vrot.lane.b32.xlu1 %v1592_v4, %s3172_s13 }
 0x402   : > { %1634 = vrot.lane.b32.xlu0 %v1594_v50, %s3172_s13  ;;  %1644 = vrot.lane.b32.xlu2 %v1599_v23, %s3172_s13 }
 0x405   : > { %v1540_v46 = vpop.permute.xlu0 %1539 }
 0x406   : > { %v1544_v28 = vpop.permute.xlu2 %1543  ;;  %v1579_v29 = vsel %vm1569_vm6, 1.0, %v1540_v46 }
 0x407   : > { %v1581_v21 = vsel %vm1569_vm6, 1.0, %v1544_v28  ;;  %v1595_v18 = vmul.f32 %v1579_v29, %v4090_v10 }
 0x408   : > { %v1597_v47 = vmul.f32 %v1581_v21, %v1500_v35 }
 0x409   : > { %1636 = vrot.lane.b32.xlu1 %v1595_v18, %s3172_s13 }
 0x40a   : > { %1640 = vrot.lane.b32.xlu0 %v1597_v47, %s3172_s13 }
 0x40d   : > { %v1546_v9 = vpop.permute.xlu0 %1545 }
 0x40e   : > { %v1550_v63 = vpop.permute.xlu2 %1549  ;;  %v1582_v62 = vsel %vm1569_vm6, 1.0, %v1546_v9 }
 0x40f   : > { %v1584_v15 = vsel %vm1569_vm6, 1.0, %v1550_v63  ;;  %v1598_v45 = vmul.f32 %v1582_v62, %v4098_v36 }
 0x410   : > { %v1600_v34 = vmul.f32 %v1584_v15, %v1503_v14  ;;  %v3180_v14 = vmov 0.0  }
 0x411   : > { %1642 = vrot.lane.b32.xlu1 %v1598_v45, %s3172_s13 }
 0x412   : > { %1646 = vrot.lane.b32.xlu0 %v1600_v34, %s3172_s13 }
 0x415   : > { %v1552_v10 = vpop.permute.xlu0 %1551 }
 0x416   : > { %v1585_v35 = vsel %vm1569_vm6, 1.0, %v1552_v10 }
 0x417   : > { %v1601_v39 = vmul.f32 %v1585_v35, %v4106_v6 }
 0x419   : > { %1648 = vrot.lane.b32.xlu1 %v1601_v39, %s3172_s13  ;;  %s5493_s13 = scalar_lea.vmem %s5882_s5, %s3381_s9 }
 0x43b   : > { %v1621_v49 = vpop.permute.xlu2 %1620 }
 0x43c   : > { %v1667_v36 = vsel %vm1084_vm1, 1.0, %v1621_v49 }
 0x43d   : > { %v4175_v6 = vmul.f32 %v1667_v36, %v973_v43  ;;  %vm1699_vm8 = vcmp.gt.f32.partialorder %v1667_v36, 0.001 }
 0x43e   : > { %v2950_v5 = vsel %vm1699_vm8, 1.0, %v3180_v14 }
 0x43f   : > { %2630 = vst.msk [vmem:[%s4164_s6 + $0x8] sm:$0xff] %vm1746_vm7, %v4175_v6  ;;  %v1750_v33 = vsel %vm1746_vm7, %v4175_v6, 0.0 }
 0x440   : > { %2646 = vst.msk [vmem:[%s4171_s10 + $0x8] sm:$0xff] %vm1746_vm7, %v2950_v5  ;;  %1751 = vadd.xlane.f32.xlu0 %v1750_v33 }
 0x444   : > { %v1627_v37 = vpop.permute.xlu2 %1626 }
 0x445   : > { %v1670_v13 = vsel %vm1084_vm1, 1.0, %v1627_v37 }
 0x446   : > { %v4188_v43 = vmul.f32 %v1670_v13, %v976_v16  ;;  %vm1702_vm9 = vcmp.gt.f32.partialorder %v1670_v13, 0.001 }
 0x447   : > { %v2953_v60 = vsel %vm1702_vm9, 1.0, %v3180_v14 }
 0x448   : > { %2633 = vst.msk [vmem:[%s4164_s6 + $0x20] sm:$0xff] %vm1746_vm7, %v4188_v43 }
 0x449   : > { %2649 = vst.msk [vmem:[%s4171_s10 + $0x20] sm:$0xff] %vm1746_vm7, %v2953_v60 }
 0x44c   : > { %v1633_v56 = vpop.permute.xlu2 %1632 }
 0x44d   : > { %v1673_v11 = vsel %vm1084_vm1, 1.0, %v1633_v56 }
 0x44e   : > { %v4199_v44 = vmul.f32 %v1673_v11, %v979_v48  ;;  %vm1705_vm10 = vcmp.gt.f32.partialorder %v1673_v11, 0.001 }
 0x44f   : > { %v2956_v1 = vsel %vm1705_vm10, 1.0, %v3180_v14 }
 0x450   : > { %2636 = vst.msk [vmem:[%s4164_s6 + $0x38] sm:$0xff] %vm1746_vm7, %v4199_v44 }
 0x451   : > { %2652 = vst.msk [vmem:[%s4171_s10 + $0x38] sm:$0xff] %vm1746_vm7, %v2956_v1 }
 0x454   : > { %v1639_v16 = vpop.permute.xlu2 %1638 }
 0x455   : > { %v1676_v26 = vsel %vm1084_vm1, 1.0, %v1639_v16 }
 0x456   : > { %v4210_v22 = vmul.f32 %v1676_v26, %v982_v27  ;;  %vm1708_vm11 = vcmp.gt.f32.partialorder %v1676_v26, 0.001 }
 0x457   : > { %v2959_v40 = vsel %vm1708_vm11, 1.0, %v3180_v14 }
 0x458   : > { %2639 = vst.msk [vmem:[%s4164_s6 + $0x50] sm:$0xff] %vm1746_vm7, %v4210_v22 }
 0x459   : > { %2655 = vst.msk [vmem:[%s4171_s10 + $0x50] sm:$0xff] %vm1746_vm7, %v2959_v40 }
 0x45c   : > { %v1645_v48 = vpop.permute.xlu2 %1644 }
 0x45d   : > { %v1679_v3 = vsel %vm1084_vm1, 1.0, %v1645_v48 }
 0x45e   : > { %v4221_v50 = vmul.f32 %v1679_v3, %v985_v59  ;;  %vm1711_vm12 = vcmp.gt.f32.partialorder %v1679_v3, 0.001 }
 0x45f   : > { %v2962_v17 = vsel %vm1711_vm12, 1.0, %v3180_v14 }
 0x460   : > { %2642 = vst.msk [vmem:[%s4164_s6 + $0x68] sm:$0xff] %vm1746_vm7, %v4221_v50 }
 0x461   : > { %2658 = vst.msk [vmem:[%s4171_s10 + $0x68] sm:$0xff] %vm1746_vm7, %v2962_v17 }
 0x463   : > { %v1619_v4 = vpop.permute.xlu1 %1618 }
 0x464   : > { %v1623_v27 = vpop.permute.xlu0 %1622  ;;  %v1666_v59 = vsel %vm1084_vm1, 1.0, %v1619_v4 }
 0x465   : > { %v1668_v23 = vsel %vm1084_vm1, 1.0, %v1623_v27  ;;  %v4238_v46 = vmul.f32 %v1666_v59, %v972_v41  ;;  %vm1698_vm14 = vcmp.gt.f32.partialorder %v1666_v59, 0.001 }
 0x466   : > { %v4232_v51 = vmul.f32 %v1668_v23, %v974_v53  ;;  %vm1700_vm13 = vcmp.gt.f32.partialorder %v1668_v23, 0.001  ;;  %v2949_v21 = vsel %vm1698_vm14, 1.0, %v3180_v14 }
 0x467   : > { %v2951_v28 = vsel %vm1700_vm13, 1.0, %v3180_v14  ;;  %v1747_v53 = vsel %vm1746_vm7, %v4238_v46, 0.0  ;;  %2629 = vst.msk [vmem:[%s4164_s6] sm:$0xff] %vm1746_vm7, %v4238_v46 }
 0x468   : > { %2631 = vst.msk [vmem:[%s4164_s6 + $0x10] sm:$0xff] %vm1746_vm7, %v4232_v51  ;;  %v1753_v42 = vsel %vm1746_vm7, %v4232_v51, 0.0  ;;  %1748 = vadd.xlane.f32.xlu2 %v1747_v53  ;;  %v3135_v53 = vld [vmem:[%s3387_s12 + $0x10] sm:$0xff] }
 0x469   : > { %2647 = vst.msk [vmem:[%s4171_s10 + $0x10] sm:$0xff] %vm1746_vm7, %v2951_v28  ;;  %1754 = vadd.xlane.f32.xlu1 %v1753_v42  ;;  %v1786_v28 = vsel %vm1746_vm7, %v4221_v50, 0.0 }
 0x46a   : > { %2645 = vst.msk [vmem:[%s4171_s10] sm:$0xff] %vm1746_vm7, %v2949_v21 }
 0x46b   : > { %v1625_v29 = vpop.permute.xlu1 %1624 }
 0x46c   : > { %v1629_v38 = vpop.permute.xlu0 %1628  ;;  %v1669_v18 = vsel %vm1084_vm1, 1.0, %v1625_v29 }
 0x46d   : > { %v1671_v41 = vsel %vm1084_vm1, 1.0, %v1629_v38  ;;  %v4264_v9 = vmul.f32 %v1669_v18, %v975_v19  ;;  %vm1701_vm0 = vcmp.gt.f32.partialorder %v1669_v18, 0.001  ;;  %v1797_v38 = vmul.f32 %v3135_v53, %v4232_v51 }
 0x46e   : > { %v4258_v47 = vmul.f32 %v1671_v41, %v977_v31  ;;  %vm1703_vm15 = vcmp.gt.f32.partialorder %v1671_v41, 0.001  ;;  %v2952_v15 = vsel %vm1701_vm0, 1.0, %v3180_v14 }
 0x46f   : > { %v2954_v63 = vsel %vm1703_vm15, 1.0, %v3180_v14  ;;  %v1756_v31 = vsel %vm1746_vm7, %v4264_v9, 0.0  ;;  %2632 = vst.msk [vmem:[%s4164_s6 + $0x18] sm:$0xff] %vm1746_vm7, %v4264_v9  ;;  %v1817_v18 = vsel %vm1746_vm7, %v1797_v38, 0.0 }
 0x470   : > { %2634 = vst.msk [vmem:[%s4164_s6 + $0x28] sm:$0xff] %vm1746_vm7, %v4258_v47  ;;  %v1762_v20 = vsel %vm1746_vm7, %v4258_v47, 0.0  ;;  %1757 = vadd.xlane.f32.xlu2 %v1756_v31 }
 0x471   : > { %2650 = vst.msk [vmem:[%s4171_s10 + $0x28] sm:$0xff] %vm1746_vm7, %v2954_v63  ;;  %1763 = vadd.xlane.f32.xlu0 %v1762_v20  ;;  %v3136_v63 = vld [vmem:[%s3387_s12 + $0x38] sm:$0xff] }
 0x472   : > { %2648 = vst.msk [vmem:[%s4171_s10 + $0x18] sm:$0xff] %vm1746_vm7, %v2952_v15  ;;  %v1802_v15 = vmul.f32 %v3136_v63, %v4199_v44  ;;  %v3137_v20 = vld [vmem:[%s3387_s12 + $0x18] sm:$0xff] }
 0x473   : > { %v1631_v62 = vpop.permute.xlu1 %1630  ;;  %v1798_v31 = vmul.f32 %v3137_v20, %v4264_v9 }
 0x474   : > { %v1635_v24 = vpop.permute.xlu0 %1634  ;;  %v1672_v45 = vsel %vm1084_vm1, 1.0, %v1631_v62  ;;  %v1832_v62 = vsel %vm1746_vm7, %v1802_v15, 0.0 }
 0x475   : > { %v1674_v19 = vsel %vm1084_vm1, 1.0, %v1635_v24  ;;  %v4290_v35 = vmul.f32 %v1672_v45, %v978_v52  ;;  %vm1704_vm5 = vcmp.gt.f32.partialorder %v1672_v45, 0.001  ;;  %v3138_v24 = vld [vmem:[%s3387_s12 + $0x28] sm:$0xff]  ;;  %v1820_v45 = vsel %vm1746_vm7, %v1798_v31, 0.0 }
 0x476   : > { %v4284_v34 = vmul.f32 %v1674_v19, %v980_v0  ;;  %vm1706_vm4 = vcmp.gt.f32.partialorder %v1674_v19, 0.001  ;;  %v2955_v39 = vsel %vm1704_vm5, 1.0, %v3180_v14  ;;  %v1759_v0 = vsel %vm1746_vm7, %v4188_v43, 0.0 }
 0x477   : > { %v2957_v10 = vsel %vm1706_vm4, 1.0, %v3180_v14  ;;  %v1765_v8 = vsel %vm1746_vm7, %v4290_v35, 0.0  ;;  %2635 = vst.msk [vmem:[%s4164_s6 + $0x30] sm:$0xff] %vm1746_vm7, %v4290_v35  ;;  %v1800_v19 = vmul.f32 %v3138_v24, %v4258_v47 }
 0x478   : > { %2637 = vst.msk [vmem:[%s4164_s6 + $0x40] sm:$0xff] %vm1746_vm7, %v4284_v34  ;;  %v1771_v54 = vsel %vm1746_vm7, %v4284_v34, 0.0  ;;  %1760 = vadd.xlane.f32.xlu2 %v1759_v0  ;;  %1766 = vadd.xlane.f32.xlu1 %v1765_v8  ;;  %v3140_v0 = vld [vmem:[%s3387_s12 + $0x30] sm:$0xff] }
 0x479   : > { %2653 = vst.msk [vmem:[%s4171_s10 + $0x40] sm:$0xff] %vm1746_vm7, %v2957_v10  ;;  %1772 = vadd.xlane.f32.xlu0 %v1771_v54  ;;  %v1826_v10 = vsel %vm1746_vm7, %v1800_v19, 0.0  ;;  %v1801_v8 = vmul.f32 %v3140_v0, %v4290_v35 }
 0x47a   : > { %2651 = vst.msk [vmem:[%s4171_s10 + $0x30] sm:$0xff] %vm1746_vm7, %v2955_v39  ;;  %v3139_v39 = vld [vmem:[%s3387_s12 + $0x50] sm:$0xff] }
 0x47b   : > { %v1637_v36 = vpop.permute.xlu1 %1636  ;;  %v1805_v54 = vmul.f32 %v3139_v39, %v4210_v22 }
 0x47c   : > { %v1641_v52 = vpop.permute.xlu0 %1640  ;;  %v1675_v33 = vsel %vm1084_vm1, 1.0, %v1637_v36 }
 0x47d   : > { %v1677_v49 = vsel %vm1084_vm1, 1.0, %v1641_v52  ;;  %v4318_v13 = vmul.f32 %v1675_v33, %v981_v32  ;;  %vm1707_vm8 = vcmp.gt.f32.partialorder %v1675_v33, 0.001  ;;  %v3141_v52 = vld [vmem:[%s3387_s12 + $0x40] sm:$0xff]  ;;  %v1841_v36 = vsel %vm1746_vm7, %v1805_v54, 0.0 }
 0x47e   : > { %v4312_v5 = vmul.f32 %v1677_v49, %v983_v2  ;;  %vm1709_vm6 = vcmp.gt.f32.partialorder %v1677_v49, 0.001  ;;  %v2958_v60 = vsel %vm1707_vm8, 1.0, %v3180_v14  ;;  %v1768_v2 = vsel %vm1746_vm7, %v4199_v44, 0.0 }
 0x47f   : > { %v2960_v37 = vsel %vm1709_vm6, 1.0, %v3180_v14  ;;  %v1774_v25 = vsel %vm1746_vm7, %v4318_v13, 0.0  ;;  %2638 = vst.msk [vmem:[%s4164_s6 + $0x48] sm:$0xff] %vm1746_vm7, %v4318_v13  ;;  %v1803_v49 = vmul.f32 %v3141_v52, %v4284_v34  ;;  %v1829_v33 = vsel %vm1746_vm7, %v1801_v8, 0.0 }
 0x480   : > { %2640 = vst.msk [vmem:[%s4164_s6 + $0x58] sm:$0xff] %vm1746_vm7, %v4312_v5  ;;  %v1780_v30 = vsel %vm1746_vm7, %v4312_v5, 0.0  ;;  %1769 = vadd.xlane.f32.xlu2 %v1768_v2  ;;  %1775 = vadd.xlane.f32.xlu1 %v1774_v25  ;;  %v3143_v2 = vld [vmem:[%s3387_s12 + $0x48] sm:$0xff] }
 0x481   : > { %2656 = vst.msk [vmem:[%s4171_s10 + $0x58] sm:$0xff] %vm1746_vm7, %v2960_v37  ;;  %1781 = vadd.xlane.f32.xlu0 %v1780_v30  ;;  %v1835_v37 = vsel %vm1746_vm7, %v1803_v49, 0.0  ;;  %v1804_v25 = vmul.f32 %v3143_v2, %v4318_v13 }
 0x482   : > { %2654 = vst.msk [vmem:[%s4171_s10 + $0x48] sm:$0xff] %vm1746_vm7, %v2958_v60  ;;  %v3142_v60 = vld [vmem:[%s3387_s12 + $0x68] sm:$0xff] }
 0x483   : > { %v1643_v11 = vpop.permute.xlu1 %1642  ;;  %v1808_v30 = vmul.f32 %v3142_v60, %v4221_v50 }
 0x484   : > { %v1647_v32 = vpop.permute.xlu0 %1646  ;;  %v1678_v16 = vsel %vm1084_vm1, 1.0, %v1643_v11 }
 0x485   : > { %v1680_v56 = vsel %vm1084_vm1, 1.0, %v1647_v32  ;;  %v4346_v40 = vmul.f32 %v1678_v16, %v984_v58  ;;  %vm1710_vm10 = vcmp.gt.f32.partialorder %v1678_v16, 0.001  ;;  %v3132_v58 = vld [vmem:[%s3387_s12 + $0x8] sm:$0xff]  ;;  %v3144_v32 = vld [vmem:[%s3387_s12 + $0x58] sm:$0xff]  ;;  %v1850_v11 = vsel %vm1746_vm7, %v1808_v30, 0.0 }
 0x486   : > { %v4340_v1 = vmul.f32 %v1680_v56, %v986_v61  ;;  %vm1712_vm9 = vcmp.gt.f32.partialorder %v1680_v56, 0.001  ;;  %v2961_v48 = vsel %vm1710_vm10, 1.0, %v3180_v14  ;;  %v1777_v61 = vsel %vm1746_vm7, %v4210_v22, 0.0 }
 0x487   : > { %v2963_v26 = vsel %vm1712_vm9, 1.0, %v3180_v14  ;;  %v1783_v55 = vsel %vm1746_vm7, %v4346_v40, 0.0  ;;  %2641 = vst.msk [vmem:[%s4164_s6 + $0x60] sm:$0xff] %vm1746_vm7, %v4346_v40  ;;  %v1796_v3 = vmul.f32 %v3132_v58, %v4175_v6  ;;  %v1806_v56 = vmul.f32 %v3144_v32, %v4312_v5  ;;  %v3146_v58 = vld [vmem:[%s3387_s12 + $0x70] sm:$0xff] }
 0x488   : > { %2643 = vst.msk [vmem:[%s4164_s6 + $0x70] sm:$0xff] %vm1746_vm7, %v4340_v1  ;;  %v1789_v57 = vsel %vm1746_vm7, %v4340_v1, 0.0  ;;  %1778 = vadd.xlane.f32.xlu2 %v1777_v61  ;;  %1784 = vadd.xlane.f32.xlu1 %v1783_v55  ;;  %v1838_v16 = vsel %vm1746_vm7, %v1804_v25, 0.0  ;;  %v3145_v61 = vld [vmem:[%s3387_s12 + $0x60] sm:$0xff] }
 0x489   : > { %2659 = vst.msk [vmem:[%s4171_s10 + $0x70] sm:$0xff] %vm1746_vm7, %v2963_v26  ;;  %1790 = vadd.xlane.f32.xlu0 %v1789_v57  ;;  %v1814_v59 = vsel %vm1746_vm7, %v1796_v3, 0.0  ;;  %v1844_v26 = vsel %vm1746_vm7, %v1806_v56, 0.0  ;;  %v1807_v55 = vmul.f32 %v3145_v61, %v4346_v40  ;;  %v1809_v3 = vmul.f32 %v3146_v58, %v4340_v1 }
 0x48a   : > { %2657 = vst.msk [vmem:[%s4171_s10 + $0x60] sm:$0xff] %vm1746_vm7, %v2961_v48  ;;  %v2387_v48 = vld [vmem:[%s3536_s23] sm:$0xff] }
 0x48b   : > { %v1649_v17 = vpop.permute.xlu1 %1648  ;;  %v2403_v57 = vmul.f32 %v2387_v48, %v4238_v46 }
 0x48c   : > { %v1681_v27 = vsel %vm1084_vm1, 1.0, %v1649_v17 }
 0x48d   : > { %v4370_v23 = vmul.f32 %v1681_v27, %v987_v12  ;;  %vm1713_vm11 = vcmp.gt.f32.partialorder %v1681_v27, 0.001  ;;  %v1799_v12 = vmul.f32 %v3133_v7, %v4188_v43  ;;  %v2419_v17 = vsel %vm1746_vm7, %v2403_v57, 0.0  ;;  %v3147_v7 = vld [vmem:[%s3387_s12 + $0x78] sm:$0xff] }
 0x48e   : > { %v2964_v4 = vsel %vm1713_vm11, 1.0, %v3180_v14  ;;  %v3134_v14 = vld [vmem:[%s3387_s12] sm:$0xff]  ;;  %v1847_v27 = vsel %vm1746_vm7, %v1807_v55, 0.0 }
 0x48f   : > { %2644 = vst.msk [vmem:[%s4164_s6 + $0x78] sm:$0xff] %vm1746_vm7, %v4370_v23  ;;  %v1792_v21 = vsel %vm1746_vm7, %v4370_v23, 0.0  ;;  %v1795_v42 = vmul.f32 %v3134_v14, %v4238_v46  ;;  %v1823_v41 = vsel %vm1746_vm7, %v1799_v12, 0.0  ;;  %v1810_v12 = vmul.f32 %v3147_v7, %v4370_v23 }
 0x490   : > { %2660 = vst.msk [vmem:[%s4171_s10 + $0x78] sm:$0xff] %vm1746_vm7, %v2964_v4  ;;  %1787 = vadd.xlane.f32.xlu2 %v1786_v28  ;;  %1793 = vadd.xlane.f32.xlu1 %v1792_v21  ;;  %v1853_v4 = vsel %vm1746_vm7, %v1809_v3, 0.0  ;;  %v2388_v28 = vld [vmem:[%s3536_s23 + $0x8] sm:$0xff] }
 0x491   : > { %1815 = vadd.xlane.f32.xlu0 %v1814_v59  ;;  %v1811_v29 = vsel %vm1746_vm7, %v1795_v42, 0.0  ;;  %v2390_v59 = vld [vmem:[%s3536_s23 + $0x18] sm:$0xff]  ;;  %v2404_v14 = vmul.f32 %v2388_v28, %v4175_v6  ;;  %v1856_v53 = vsel %vm1746_vm7, %v1810_v12, 0.0  ;;  %v2965_v28 = vld [vmem:[%s3536_s23 + $0x80] sm:$0xff] }
 0x492   : > { %v2406_v21 = vmul.f32 %v2390_v59, %v4264_v9  ;;  %v2401_v59 = vld [vmem:[%s3536_s23 + $0x70] sm:$0xff] }
 0x493   : > { %v2422_v38 = vsel %vm1746_vm7, %v2404_v14, 0.0 }
 0x494   : > { %v2428_v42 = vsel %vm1746_vm7, %v2406_v21, 0.0 }
 0x498   : > { %1812 = vadd.xlane.f32.xlu2 %v1811_v29  ;;  %1818 = vadd.xlane.f32.xlu1 %v1817_v18  ;;  %v2389_v29 = vld [vmem:[%s3536_s23 + $0x10] sm:$0xff]  ;;  %v2391_v18 = vld [vmem:[%s3536_s23 + $0x20] sm:$0xff] }
 0x499   : > { %1824 = vadd.xlane.f32.xlu0 %v1823_v41  ;;  %v2393_v41 = vld [vmem:[%s3536_s23 + $0x30] sm:$0xff]  ;;  %v2405_v15 = vmul.f32 %v2389_v29, %v4232_v51  ;;  %v2407_v20 = vmul.f32 %v2391_v18, %v4188_v43  ;;  %v2970_v18 = vld [vmem:[%s3536_s23 + $0xa8] sm:$0xff] }
 0x49a   : > { %v2409_v63 = vmul.f32 %v2393_v41, %v4290_v35 }
 0x49b   : > { %v2425_v24 = vsel %vm1746_vm7, %v2405_v15, 0.0  ;;  %v2431_v19 = vsel %vm1746_vm7, %v2407_v20, 0.0  ;;  %v2968_v15 = vld [vmem:[%s3536_s23 + $0x98] sm:$0xff] }
 0x49c   : > { %v2437_v31 = vsel %vm1746_vm7, %v2409_v63, 0.0  ;;  %v2966_v63 = vld [vmem:[%s3536_s23 + $0x88] sm:$0xff] }
 0x4a0   : > { %1821 = vadd.xlane.f32.xlu2 %v1820_v45  ;;  %1827 = vadd.xlane.f32.xlu1 %v1826_v10  ;;  %v2392_v45 = vld [vmem:[%s3536_s23 + $0x28] sm:$0xff]  ;;  %v2394_v10 = vld [vmem:[%s3536_s23 + $0x38] sm:$0xff] }
 0x4a1   : > { %1833 = vadd.xlane.f32.xlu0 %v1832_v62  ;;  %v2396_v62 = vld [vmem:[%s3536_s23 + $0x48] sm:$0xff]  ;;  %v2408_v54 = vmul.f32 %v2392_v45, %v4258_v47  ;;  %v2410_v0 = vmul.f32 %v2394_v10, %v4199_v44  ;;  %v2487_v45 = vmul.f32 %v2968_v15, %v4264_v9 }
 0x4a2   : > { %v2412_v39 = vmul.f32 %v2396_v62, %v4318_v13  ;;  %v2485_v62 = vmul.f32 %v2966_v63, %v4175_v6 }
 0x4a3   : > { %v2434_v52 = vsel %vm1746_vm7, %v2408_v54, 0.0  ;;  %v2440_v49 = vsel %vm1746_vm7, %v2410_v0, 0.0  ;;  %v2509_v54 = vsel %vm1746_vm7, %v2487_v45, 0.0  ;;  %v2973_v0 = vld [vmem:[%s3536_s23 + $0xc0] sm:$0xff]  ;;  %v2982_v45 = vld [vmem:[%s3536_s23 + $0x108] sm:$0xff] }
 0x4a4   : > { %v2446_v8 = vsel %vm1746_vm7, %v2412_v39, 0.0  ;;  %v2503_v39 = vsel %vm1746_vm7, %v2485_v62, 0.0 }
 0x4a8   : > { %1830 = vadd.xlane.f32.xlu2 %v1829_v33  ;;  %1836 = vadd.xlane.f32.xlu1 %v1835_v37  ;;  %v2395_v33 = vld [vmem:[%s3536_s23 + $0x40] sm:$0xff]  ;;  %v2397_v37 = vld [vmem:[%s3536_s23 + $0x50] sm:$0xff] }
 0x4a9   : > { %1842 = vadd.xlane.f32.xlu0 %v1841_v36  ;;  %v2399_v36 = vld [vmem:[%s3536_s23 + $0x60] sm:$0xff]  ;;  %v2411_v30 = vmul.f32 %v2395_v33, %v4284_v34  ;;  %v2413_v2 = vmul.f32 %v2397_v37, %v4210_v22 }
 0x4aa   : > { %v2415_v60 = vmul.f32 %v2399_v36, %v4346_v40  ;;  %v2492_v36 = vmul.f32 %v2973_v0, %v4284_v34  ;;  %v2566_v0 = vmul.f32 %v2982_v45, %v4175_v6  ;;  %v2981_v6 = vld [vmem:[%s3536_s23 + $0x100] sm:$0xff] }
 0x4ab   : > { %v2443_v32 = vsel %vm1746_vm7, %v2411_v30, 0.0  ;;  %v2449_v56 = vsel %vm1746_vm7, %v2413_v2, 0.0 }
 0x4ac   : > { %v2455_v25 = vsel %vm1746_vm7, %v2415_v60, 0.0  ;;  %v2524_v2 = vsel %vm1746_vm7, %v2492_v36, 0.0 }
 0x4b0   : > { %1839 = vadd.xlane.f32.xlu2 %v1838_v16  ;;  %1845 = vadd.xlane.f32.xlu1 %v1844_v26  ;;  %v2398_v16 = vld [vmem:[%s3536_s23 + $0x58] sm:$0xff]  ;;  %v2400_v26 = vld [vmem:[%s3536_s23 + $0x68] sm:$0xff] }
 0x4b1   : > { %1851 = vadd.xlane.f32.xlu0 %v1850_v11  ;;  %v2402_v11 = vld [vmem:[%s3536_s23 + $0x78] sm:$0xff]  ;;  %v2414_v55 = vmul.f32 %v2398_v16, %v4312_v5  ;;  %v2416_v58 = vmul.f32 %v2400_v26, %v4221_v50  ;;  %v2974_v16 = vld [vmem:[%s3536_s23 + $0xc8] sm:$0xff] }
 0x4b2   : > { %v2418_v57 = vmul.f32 %v2402_v11, %v4370_v23  ;;  %v2972_v11 = vld [vmem:[%s3536_s23 + $0xb8] sm:$0xff] }
 0x4b3   : > { %v4467_v48 = vpop.xlane.xlu0 %1751 }
 0x4b4   : > { %5919 = vst [vmem:[#allocation3_spill] sm:$0xff] %v4467_v48  ;;  %v2464_v3 = vsel %vm1746_vm7, %v2418_v57, 0.0  ;;  %3068 = vrcp.f32 %v4467_v48  ;;  %vm1879_vm13 = vweird.f32 %v4467_v48 }
 0x4b8   : > { %1848 = vadd.xlane.f32.xlu2 %v1847_v27  ;;  %1854 = vadd.xlane.f32.xlu1 %v1853_v4  ;;  %v2458_v27 = vsel %vm1746_vm7, %v2416_v58, 0.0  ;;  %v2967_v4 = vld [vmem:[%s3536_s23 + $0x90] sm:$0xff] }
 0x4b9   : > { %2420 = vadd.xlane.f32.xlu0 %v2419_v17  ;;  %v2452_v17 = vsel %vm1746_vm7, %v2414_v55, 0.0  ;;  %v2486_v7 = vmul.f32 %v2967_v4, %v4232_v51 }
 0x4c0   : > { %1857 = vadd.xlane.f32.xlu2 %v1856_v53  ;;  %2423 = vadd.xlane.f32.xlu1 %v2422_v38  ;;  %v2484_v53 = vmul.f32 %v2965_v28, %v4238_v46  ;;  %v2506_v38 = vsel %vm1746_vm7, %v2486_v7, 0.0  ;;  %v2979_v28 = vld [vmem:[%s3536_s23 + $0xf0] sm:$0xff] }
 0x4c1   : > { %2429 = vadd.xlane.f32.xlu0 %v2428_v42  ;;  %v2417_v42 = vmul.f32 %v2401_v59, %v4340_v1  ;;  %v2975_v7 = vld [vmem:[%s3536_s23 + $0xd0] sm:$0xff] }
 0x4c2   : > { %v2500_v29 = vsel %vm1746_vm7, %v2484_v53, 0.0 }
 0x4c3   : > { %v2461_v41 = vsel %vm1746_vm7, %v2417_v42, 0.0  ;;  %v2977_v42 = vld [vmem:[%s3536_s23 + $0xe0] sm:$0xff] }
 0x4c4   : > { %v2496_v63 = vmul.f32 %v2977_v42, %v4346_v40  ;;  %v2986_v42 = vld [vmem:[%s3536_s23 + $0x128] sm:$0xff] }
 0x4c6   : > { %v2536_v62 = vsel %vm1746_vm7, %v2496_v63, 0.0 }
 0x4c8   : > { %2426 = vadd.xlane.f32.xlu2 %v2425_v24  ;;  %2432 = vadd.xlane.f32.xlu1 %v2431_v19 }
 0x4c9   : > { %2438 = vadd.xlane.f32.xlu0 %v2437_v31  ;;  %v2489_v31 = vmul.f32 %v2970_v18, %v4258_v47  ;;  %v2494_v18 = vmul.f32 %v2975_v7, %v4210_v22  ;;  %v2988_v7 = vld [vmem:[%s3536_s23 + $0x138] sm:$0xff] }
 0x4cb   : > { %v2515_v10 = vsel %vm1746_vm7, %v2489_v31, 0.0  ;;  %v2530_v31 = vsel %vm1746_vm7, %v2494_v18, 0.0 }
 0x4d0   : > { %2435 = vadd.xlane.f32.xlu2 %v2434_v52  ;;  %2441 = vadd.xlane.f32.xlu1 %v2440_v49  ;;  %v2971_v52 = vld [vmem:[%s3536_s23 + $0xb0] sm:$0xff] }
 0x4d1   : > { %2447 = vadd.xlane.f32.xlu0 %v2446_v8  ;;  %v2969_v8 = vld [vmem:[%s3536_s23 + $0xa0] sm:$0xff]  ;;  %v2490_v30 = vmul.f32 %v2971_v52, %v4290_v35 }
 0x4d2   : > { %v2488_v60 = vmul.f32 %v2969_v8, %v4188_v43 }
 0x4d8   : > { %2444 = vadd.xlane.f32.xlu2 %v2443_v32  ;;  %2450 = vadd.xlane.f32.xlu1 %v2449_v56  ;;  %v2518_v32 = vsel %vm1746_vm7, %v2490_v30, 0.0  ;;  %v2976_v56 = vld [vmem:[%s3536_s23 + $0xd8] sm:$0xff]  ;;  %v2584_v30 = vsel %vm1746_vm7, %v2566_v0, 0.0  ;;  %v2989_v0 = vld [vmem:[%s3536_s23 + $0x140] sm:$0xff] }
 0x4d9   : > { %2456 = vadd.xlane.f32.xlu0 %v2455_v25  ;;  %v2512_v25 = vsel %vm1746_vm7, %v2488_v60, 0.0  ;;  %v2495_v57 = vmul.f32 %v2976_v56, %v4312_v5  ;;  %v2983_v56 = vld [vmem:[%s3536_s23 + $0x110] sm:$0xff] }
 0x4db   : > { %v4470_v61 = vpop.xlane.xlu2 %1748 }
 0x4dc   : > { %5920 = vst [vmem:[#allocation4_spill] sm:$0xff] %v4470_v61  ;;  %v4483_v12 = vpop.xlane.xlu1 %1754  ;;  %vm1864_vm0 = vweird.f32 %v4470_v61 }
 0x4dd   : > { %5922 = vst [vmem:[#allocation6_spill] sm:$0xff] %v4483_v12  ;;  %3070 = vrcp.f32 %v4483_v12  ;;  %vm1894_vm4 = vweird.f32 %v4483_v12 }
 0x4de   : > { %3072 = vrcp.f32 %v4470_v61 }
 0x4e0   : > { %2453 = vadd.xlane.f32.xlu2 %v2452_v17  ;;  %2459 = vadd.xlane.f32.xlu1 %v2458_v27  ;;  %v2493_v17 = vmul.f32 %v2974_v16, %v4318_v13  ;;  %v2533_v27 = vsel %vm1746_vm7, %v2495_v57, 0.0 }
 0x4e1   : > { %2465 = vadd.xlane.f32.xlu0 %v2464_v3  ;;  %v2491_v3 = vmul.f32 %v2972_v11, %v4199_v44 }
 0x4e2   : > { %v2527_v59 = vsel %vm1746_vm7, %v2493_v17, 0.0  ;;  %v2565_v17 = vmul.f32 %v2981_v6, %v4238_v46 }
 0x4e3   : > { %v4485_v14 = vpop.xlane.xlu2 %1757  ;;  %v2521_v4 = vsel %vm1746_vm7, %v2491_v3, 0.0 }
 0x4e4   : > { %v4480_v21 = vpop.xlane.xlu0 %1763  ;;  %5923 = vst [vmem:[#allocation7_spill] sm:$0xff] %v4485_v14  ;;  %3074 = vrcp.f32 %v4485_v14  ;;  %vm1909_vm9 = vweird.f32 %v4485_v14 }
 0x4e5   : > { %5921 = vst [vmem:[#allocation5_spill] sm:$0xff] %v4480_v21  ;;  %3076 = vrcp.f32 %v4480_v21  ;;  %vm1939_vm10 = vweird.f32 %v4480_v21 }
 0x4e8   : > { %2462 = vadd.xlane.f32.xlu2 %v2461_v41  ;;  %2501 = vadd.xlane.f32.xlu1 %v2500_v29 }
 0x4e9   : > { %2507 = vadd.xlane.f32.xlu0 %v2506_v38  ;;  %v2498_v38 = vmul.f32 %v2979_v28, %v4340_v1 }
 0x4eb   : > { %v4498_v24 = vpop.xlane.xlu2 %1760  ;;  %v4500_v19 = vpop.xlane.xlu1 %1766  ;;  %v2542_v15 = vsel %vm1746_vm7, %v2498_v38, 0.0 }
 0x4ec   : > { %v4495_v20 = vpop.xlane.xlu0 %1772  ;;  %5925 = vst [vmem:[#allocation9_spill] sm:$0xff] %v4498_v24  ;;  %3078 = vrcp.f32 %v4498_v24 }
 0x4ed   : > { %5924 = vst [vmem:[#allocation8_spill] sm:$0xff] %v4495_v20  ;;  %3080 = vrcp.f32 %v4495_v20 }
 0x4ee   : > { %5926 = vst [vmem:[#allocation10_spill] sm:$0xff] %v4500_v19  ;;  %3082 = vrcp.f32 %v4500_v19 }
 0x4f0   : > { %2504 = vadd.xlane.f32.xlu2 %v2503_v39  ;;  %2510 = vadd.xlane.f32.xlu1 %v2509_v54  ;;  %v2980_v39 = vld [vmem:[%s3536_s23 + $0xf8] sm:$0xff] }
 0x4f1   : > { %2516 = vadd.xlane.f32.xlu0 %v2515_v10  ;;  %v2978_v10 = vld [vmem:[%s3536_s23 + $0xe8] sm:$0xff]  ;;  %v2499_v60 = vmul.f32 %v2980_v39, %v4370_v23  ;;  %v2991_v39 = vld [vmem:[%s3536_s23 + $0x150] sm:$0xff] }
 0x4f2   : > { %v2497_v36 = vmul.f32 %v2978_v10, %v4221_v50 }
 0x4f3   : > { %v4513_v33 = vpop.xlane.xlu2 %1769  ;;  %v4515_v37 = vpop.xlane.xlu1 %1775 }
 0x4f4   : > { %v4510_v49 = vpop.xlane.xlu0 %1781  ;;  %5928 = vst [vmem:[#allocation12_spill] sm:$0xff] %v4513_v33  ;;  %3084 = vrcp.f32 %v4513_v33 }
 0x4f5   : > { %5927 = vst [vmem:[#allocation11_spill] sm:$0xff] %v4510_v49  ;;  %3086 = vrcp.f32 %v4515_v37 }
 0x4f6   : > { %5929 = vst [vmem:[#allocation13_spill] sm:$0xff] %v4515_v37 }
 0x4f8   : > { %2513 = vadd.xlane.f32.xlu2 %v2512_v25  ;;  %2519 = vadd.xlane.f32.xlu1 %v2518_v32  ;;  %v2545_v25 = vsel %vm1746_vm7, %v2499_v60, 0.0  ;;  %v2985_v32 = vld [vmem:[%s3536_s23 + $0x120] sm:$0xff] }
 0x4f9   : > { %2525 = vadd.xlane.f32.xlu0 %v2524_v2  ;;  %v2539_v2 = vsel %vm1746_vm7, %v2497_v36, 0.0  ;;  %v2569_v16 = vmul.f32 %v2985_v32, %v4188_v43  ;;  %v2984_v43 = vld [vmem:[%s3536_s23 + $0x118] sm:$0xff]  ;;  %v2575_v36 = vmul.f32 %v2991_v39, %v4210_v22 }
 0x4fa   : > { %v2568_v63 = vmul.f32 %v2984_v43, %v4264_v9 }
 0x4fb   : > { %v4528_v55 = vpop.xlane.xlu2 %1778  ;;  %v4530_v58 = vpop.xlane.xlu1 %1784  ;;  %v2611_v6 = vsel %vm1746_vm7, %v2575_v36, 0.0 }
 0x4fc   : > { %v4525_v26 = vpop.xlane.xlu0 %1790  ;;  %5931 = vst [vmem:[#allocation15_spill] sm:$0xff] %v4528_v55  ;;  %v2590_v45 = vsel %vm1746_vm7, %v2568_v63, 0.0  ;;  %v2993_v63 = vld [vmem:[%s3536_s23 + $0x160] sm:$0xff]  ;;  %3088 = vrcp.f32 %v4528_v55 }
 0x4fd   : > { %5930 = vst [vmem:[#allocation14_spill] sm:$0xff] %v4525_v26  ;;  %3090 = vrcp.f32 %v4510_v49 }
 0x4fe   : > { %5932 = vst [vmem:[#allocation16_spill] sm:$0xff] %v4530_v58 }
 0x500   : > { %2522 = vadd.xlane.f32.xlu2 %v2521_v4  ;;  %2528 = vadd.xlane.f32.xlu1 %v2527_v59  ;;  %v2593_v4 = vsel %vm1746_vm7, %v2569_v16, 0.0  ;;  %v2581_v59 = vsel %vm1746_vm7, %v2565_v17, 0.0  ;;  %v2994_v16 = vld [vmem:[%s3536_s23 + $0x168] sm:$0xff] }
 0x501   : > { %2534 = vadd.xlane.f32.xlu0 %v2533_v27  ;;  %v2567_v27 = vmul.f32 %v2983_v56, %v4232_v51  ;;  %v2572_v51 = vmul.f32 %v2988_v7, %v4199_v44  ;;  %v2987_v44 = vld [vmem:[%s3536_s23 + $0x130] sm:$0xff]  ;;  %v2990_v17 = vld [vmem:[%s3536_s23 + $0x148] sm:$0xff] }
 0x502   : > { %v2574_v7 = vmul.f32 %v2990_v17, %v4318_v13  ;;  %v1898_v17 = vand.u32 2147483647, %v4483_v12 }
 0x503   : > { %v4543_v41 = vpop.xlane.xlu2 %1787  ;;  %v4545_v29 = vpop.xlane.xlu1 %1793  ;;  %v2587_v28 = vsel %vm1746_vm7, %v2567_v27, 0.0  ;;  %v2992_v27 = vld [vmem:[%s3536_s23 + $0x158] sm:$0xff] }
 0x504   : > { %v4540_v53 = vpop.xlane.xlu0 %1815  ;;  %5933 = vst [vmem:[#allocation17_spill] sm:$0xff] %v4543_v41  ;;  %v2576_v43 = vmul.f32 %v2992_v27, %v4312_v5  ;;  %v2608_v5 = vsel %vm1746_vm7, %v2574_v7, 0.0  ;;  %v1900_v27 = vand.u32 2147483648, %v4483_v12  ;;  %vm4699_vm5 = vcmp.eq.f32.partialorder %v1898_v17, 8.507059e+37 }
 0x505   : > { %3092 = vrcp.f32 %v4543_v41 }
 0x506   : > { %v2614_v39 = vsel %vm1746_vm7, %v2576_v43, 0.0  ;;  %3094 = vrcp.f32 %v4525_v26 }
 0x507   : > { %3096 = vrcp.f32 %v4530_v58 }
 0x508   : > { %2531 = vadd.xlane.f32.xlu2 %v2530_v31  ;;  %2537 = vadd.xlane.f32.xlu1 %v2536_v62  ;;  %v4595_v31 = vpop.eup %3068  ;;  %v2602_v62 = vsel %vm1746_vm7, %v2572_v51, 0.0 }
 0x509   : > { %2543 = vadd.xlane.f32.xlu0 %v2542_v15  ;;  %v2570_v15 = vmul.f32 %v2986_v42, %v4258_v47  ;;  %v1875_v9 = vmul.f32 %v4595_v31, %v4467_v48  ;;  %vm1880_vm12 = vweird.f32 %v4595_v31 }
 0x50a   : > { %vm4662_vm14 = vmor %vm1879_vm13, %vm1880_vm12 }
 0x50b   : > { %v4558_v8 = vpop.xlane.xlu2 %1812  ;;  %v4560_v52 = vpop.xlane.xlu1 %1818  ;;  %v2596_v10 = vsel %vm1746_vm7, %v2570_v15, 0.0  ;;  %v1876_v32 = vsub.f32 1.0, %v1875_v9  ;;  %v1885_v9 = vand.u32 2147483648, %v4467_v48 }
 0x50c   : > { %v4555_v54 = vpop.xlane.xlu0 %1824  ;;  %5935 = vst [vmem:[#allocation19_spill] sm:$0xff] %v4558_v8 }
 0x50d   : > { %5934 = vst [vmem:[#allocation18_spill] sm:$0xff] %v4555_v54 }
 0x50e   : > { %5936 = vst [vmem:[#allocation20_spill] sm:$0xff] %v4560_v52 }
 0x510   : > { %2540 = vadd.xlane.f32.xlu2 %v2539_v2  ;;  %2546 = vadd.xlane.f32.xlu1 %v2545_v25  ;;  %v2571_v2 = vmul.f32 %v2987_v44, %v4290_v35  ;;  %v2573_v25 = vmul.f32 %v2989_v0, %v4284_v34  ;;  %v4622_v35 = vpop.eup %3070  ;;  %v1877_v34 = vmul.f32 %v4595_v31, %v1876_v32  ;;  %v1883_v32 = vand.u32 2147483647, %v4467_v48 }
 0x511   : > { %2585 = vadd.xlane.f32.xlu0 %v2584_v30  ;;  %v1890_v15 = vmul.f32 %v4622_v35, %v4483_v12  ;;  %v2577_v44 = vmul.f32 %v2993_v63, %v4346_v40  ;;  %vm1895_vm6 = vweird.f32 %v4622_v35  ;;  %v1930_v12 = vand.u32 2147483648, %v4498_v24 }
 0x512   : > { %v2599_v56 = vsel %vm1746_vm7, %v2571_v2, 0.0  ;;  %v2605_v22 = vsel %vm1746_vm7, %v2573_v25, 0.0  ;;  %vm1884_vm15 = vcmp.eq.f32.partialorder %v1883_v32, 8.507059e+37  ;;  %v1915_v32 = vand.u32 2147483648, %v4485_v14  ;;  %vm4732_vm11 = vmor %vm1894_vm4, %vm1895_vm6 }
 0x513   : > { %v4573_v57 = vpop.xlane.xlu2 %1821  ;;  %v4575_v3 = vpop.xlane.xlu1 %1827  ;;  %v1891_v25 = vsub.f32 1.0, %v1890_v15  ;;  %v1868_v15 = vand.u32 2147483647, %v4470_v61  ;;  %vm1924_vm4 = vweird.f32 %v4498_v24  ;;  %vm1954_vm6 = vweird.f32 %v4500_v19 }
 0x514   : > { %v4570_v11 = vpop.xlane.xlu0 %1833  ;;  %5938 = vst [vmem:[#allocation22_spill] sm:$0xff] %v4573_v57 }
 0x515   : > { %5937 = vst [vmem:[#allocation21_spill] sm:$0xff] %v4570_v11 }
 0x516   : > { %5939 = vst [vmem:[#allocation23_spill] sm:$0xff] %v4575_v3 }
 0x518   : > { %2582 = vadd.xlane.f32.xlu2 %v2581_v59  ;;  %2588 = vadd.xlane.f32.xlu1 %v2587_v28  ;;  %v2578_v28 = vmul.f32 %v2994_v16, %v4221_v50  ;;  %v2996_v50 = vld [vmem:[%s3536_s23 + $0x178] sm:$0xff]  ;;  %v1870_v16 = vand.u32 2147483648, %v4470_v61 }
 0x519   : > { %2594 = vadd.xlane.f32.xlu0 %v2593_v4  ;;  %v4626_v4 = vpop.eup %3072 }
 0x51a   : > { %v2620_v13 = vsel %vm1746_vm7, %v2578_v28, 0.0  ;;  %v4651_v0 = vpop.eup %3074  ;;  %v1886_v28 = vor.u32 1.1754944e-38, %v1885_v9  ;;  %vm1865_vm8 = vweird.f32 %v4626_v4 }
 0x51b   : > { %v4589_v38 = vpop.xlane.xlu2 %1830  ;;  %v4591_v18 = vpop.xlane.xlu1 %1836  ;;  %vm4748_vm12 = vmor %vm1864_vm0, %vm1865_vm8  ;;  %vm1984_vm8 = vweird.f32 %v4495_v20 }
 0x51c   : > { %v4586_v46 = vpop.xlane.xlu0 %1842  ;;  %5941 = vst [vmem:[#allocation25_spill] sm:$0xff] %v4589_v38  ;;  %v4657_v2 = vpop.eup %3076 }
 0x51d   : > { %5940 = vst [vmem:[#allocation24_spill] sm:$0xff] %v4586_v46 }
 0x51e   : > { %5942 = vst [vmem:[#allocation26_spill] sm:$0xff] %v4591_v18 }
 0x520   : > { %2591 = vadd.xlane.f32.xlu2 %v2590_v45  ;;  %2597 = vadd.xlane.f32.xlu1 %v2596_v10  ;;  %v1860_v45 = vmul.f32 %v4626_v4, %v4470_v61  ;;  %v1878_v10 = vadd.f32 %v4595_v31, %v1877_v34 }
 0x521   : > { %2603 = vadd.xlane.f32.xlu0 %v2602_v62  ;;  %v2995_v62 = vld [vmem:[%s3536_s23 + $0x170] sm:$0xff] }
 0x522   : > { %v2579_v36 = vmul.f32 %v2995_v62, %v4340_v1  ;;  %v1882_v1 = vsel %vm4662_vm14, %v4595_v31, %v1878_v10  ;;  %v2617_v31 = vsel %vm1746_vm7, %v2577_v44, 0.0  ;;  %v1892_v62 = vmul.f32 %v4622_v35, %v1891_v25  ;;  %v4690_v10 = vpop.eup %3078 }
 0x523   : > { %v4609_v60 = vpop.xlane.xlu2 %1839  ;;  %v4611_v30 = vpop.xlane.xlu1 %1845  ;;  %v1871_v44 = vor.u32 1.1754944e-38, %v1870_v16  ;;  %v1913_v16 = vand.u32 2147483647, %v4485_v14  ;;  %vm1940_vm14 = vweird.f32 %v4657_v2 }
 0x524   : > { %v4605_v47 = vpop.xlane.xlu0 %1851  ;;  %5944 = vst [vmem:[#allocation28_spill] sm:$0xff] %v4609_v60  ;;  %v2623_v63 = vsel %vm1746_vm7, %v2579_v36, 0.0  ;;  %v1901_v36 = vor.u32 1.1754944e-38, %v1900_v27 }
 0x525   : > { %5943 = vst [vmem:[#allocation27_spill] sm:$0xff] %v4605_v47  ;;  %vm4755_vm13 = vcmp.eq.f32.partialorder %v1913_v16, 8.507059e+37 }
 0x526   : > { %5945 = vst [vmem:[#allocation29_spill] sm:$0xff] %v4611_v30 }
 0x528   : > { %2600 = vadd.xlane.f32.xlu2 %v2599_v56  ;;  %2606 = vadd.xlane.f32.xlu1 %v2605_v22  ;;  %v1861_v56 = vsub.f32 1.0, %v1860_v45  ;;  %v1905_v22 = vmul.f32 %v4651_v0, %v4485_v14 }
 0x529   : > { %2612 = vadd.xlane.f32.xlu0 %v2611_v6  ;;  %v2580_v6 = vmul.f32 %v2996_v50, %v4370_v23  ;;  %v1935_v23 = vmul.f32 %v4657_v2, %v4480_v21  ;;  %v4692_v50 = vsel %vm1884_vm15, %v1886_v28, %v1882_v1  ;;  %vm1910_vm15 = vweird.f32 %v4651_v0 }
 0x52b   : > { %v4634_v42 = vpop.xlane.xlu2 %1848  ;;  %v4636_v51 = vpop.xlane.xlu1 %1854  ;;  %v2626_v45 = vsel %vm1746_vm7, %v2580_v6, 0.0  ;;  %v1936_v40 = vsub.f32 1.0, %v1935_v23  ;;  %v1945_v6 = vand.u32 2147483648, %v4480_v21  ;;  %vm4710_vm7 = vcmp.eq.f32.partialorder %v1868_v15, 8.507059e+37 }
 0x52c   : > { %v4629_v59 = vpop.xlane.xlu0 %2420  ;;  %5947 = vst [vmem:[#allocation31_spill] sm:$0xff] %v4634_v42  ;;  %v1943_v15 = vand.u32 2147483647, %v4480_v21 }
 0x52d   : > { %5946 = vst [vmem:[#allocation30_spill] sm:$0xff] %v4629_v59 }
 0x52e   : > { %5948 = vst [vmem:[#allocation32_spill] sm:$0xff] %v4636_v51  ;;  %vm4770_vm0 = vcmp.eq.f32.partialorder %v1943_v15, 8.507059e+37  ;;  %v1988_v15 = vand.u32 2147483647, %v4495_v20 }
 0x530   : > { %2609 = vadd.xlane.f32.xlu2 %v2608_v5  ;;  %2615 = vadd.xlane.f32.xlu1 %v2614_v39  ;;  %v4697_v5 = vpop.eup %3080  ;;  %v1906_v39 = vsub.f32 1.0, %v1905_v22  ;;  %v1893_v22 = vadd.f32 %v4622_v35, %v1892_v62  ;;  %v1916_v62 = vor.u32 1.1754944e-38, %v1915_v32 }
 0x531   : > { %2621 = vadd.xlane.f32.xlu0 %v2620_v13  ;;  %v1862_v13 = vmul.f32 %v4626_v4, %v1861_v56  ;;  %v4703_v25 = vpop.eup %3082  ;;  %v1920_v56 = vmul.f32 %v4690_v10, %v4498_v24  ;;  %v1980_v27 = vmul.f32 %v4697_v5, %v4495_v20 }
 0x532   : > { %v1950_v23 = vmul.f32 %v4703_v25, %v4500_v19  ;;  %v1907_v28 = vmul.f32 %v4651_v0, %v1906_v39 }
 0x533   : > { %v4681_v7 = vpop.xlane.xlu2 %1857  ;;  %v4683_v43 = vpop.xlane.xlu1 %2423  ;;  %v1863_v17 = vadd.f32 %v4626_v4, %v1862_v13  ;;  %v1937_v13 = vmul.f32 %v4657_v2, %v1936_v40  ;;  %v1921_v48 = vsub.f32 1.0, %v1920_v56  ;;  %v1897_v40 = vsel %vm4732_vm11, %v4622_v35, %v1893_v22 }
 0x534   : > { %v4677_v34 = vpop.xlane.xlu0 %2429  ;;  %v1928_v56 = vand.u32 2147483647, %v4498_v24  ;;  %v1951_v35 = vsub.f32 1.0, %v1950_v23  ;;  %v1908_v22 = vadd.f32 %v4651_v0, %v1907_v28  ;;  %v1958_v28 = vand.u32 2147483647, %v4500_v19 }
 0x535   : > { %5951 = vst [vmem:[#allocation33_spill] sm:$0xff] %v4677_v34  ;;  %v4737_v34 = vor.u32 1.1754944e-38, %v1945_v6  ;;  %v4760_v6 = vpop.eup %3084  ;;  %v1867_v61 = vsel %vm4748_vm12, %v4626_v4, %v1863_v17  ;;  %v1938_v4 = vadd.f32 %v4657_v2, %v1937_v13  ;;  %v1960_v17 = vand.u32 2147483648, %v4500_v19 }
 0x536   : > { %v1922_v23 = vmul.f32 %v4690_v10, %v1921_v48  ;;  %v4790_v9 = vsel %vm4710_vm7, %v1871_v44, %v1867_v61  ;;  %vm4804_vm11 = vcmp.eq.f32.partialorder %v1928_v56, 8.507059e+37  ;;  %vm4815_vm7 = vmor %vm1939_vm10, %vm1940_vm14  ;;  %v1952_v44 = vmul.f32 %v4703_v25, %v1951_v35 }
 0x537   : > { %v1990_v13 = vand.u32 2147483648, %v4495_v20  ;;  %v1975_v56 = vand.u32 2147483648, %v4513_v33  ;;  %vm1925_vm10 = vweird.f32 %v4690_v10  ;;  %vm4839_vm12 = vcmp.eq.f32.partialorder %v1958_v28, 8.507059e+37 }
 0x538   : > { %2618 = vadd.xlane.f32.xlu2 %v2617_v31  ;;  %2624 = vadd.xlane.f32.xlu1 %v2623_v63  ;;  %v1981_v63 = vsub.f32 1.0, %v1980_v27  ;;  %v1965_v27 = vmul.f32 %v4760_v6, %v4513_v33  ;;  %vm4843_vm14 = vcmp.eq.f32.partialorder %v1988_v15, 8.507059e+37 }
 0x539   : > { %v4870_v32 = vor.u32 1.1754944e-38, %v1975_v56 }
 0x53a   : > { %v1982_v1 = vmul.f32 %v4697_v5, %v1981_v63  ;;  %v1966_v63 = vsub.f32 1.0, %v1965_v27 }
 0x53b   : > { %v4739_v59 = vpop.xlane.xlu2 %2426  ;;  %v4741_v39 = vpop.xlane.xlu1 %2432 }
 0x53c   : > { %v4727_v31 = vpop.xlane.xlu0 %2438  ;;  %5959 = vst [vmem:[#allocation35_spill] sm:$0xff] %v4739_v59  ;;  %v4777_v59 = vsel %vm4699_vm5, %v1901_v36, %v1897_v40  ;;  %vm4796_vm5 = vmor %vm1909_vm9, %vm1910_vm15  ;;  %vm1985_vm9 = vweird.f32 %v4697_v5  ;;  %vm1969_vm15 = vweird.f32 %v4513_v33  ;;  %v1983_v28 = vadd.f32 %v4697_v5, %v1982_v1 }
 0x53d   : > { %5956 = vst [vmem:[#allocation34_spill] sm:$0xff] %v4727_v31  ;;  %v4786_v31 = vpop.eup %3086  ;;  %v1912_v61 = vsel %vm4796_vm5, %v4651_v0, %v1908_v22  ;;  %v1942_v0 = vsel %vm4815_vm7, %v4657_v2, %v1938_v4  ;;  %v1961_v22 = vor.u32 1.1754944e-38, %v1960_v17  ;;  %v1973_v17 = vand.u32 2147483647, %v4513_v33 }
 0x53e   : > { %5960 = vst [vmem:[#allocation36_spill] sm:$0xff] %v4741_v39  ;;  %v1931_v39 = vor.u32 1.1754944e-38, %v1930_v12  ;;  %v4802_v48 = vpop.eup %3088  ;;  %v1995_v14 = vmul.f32 %v4786_v31, %v4515_v37  ;;  %v4853_v27 = vsel %vm4755_vm13, %v1916_v62, %v1912_v61  ;;  %vm1955_vm5 = vweird.f32 %v4703_v25  ;;  %vm4866_vm13 = vmor %vm1924_vm4, %vm1925_vm10 }
 0x53f   : > { %v4833_v35 = vpop.eup %3090  ;;  %v2010_v4 = vmul.f32 %v4802_v48, %v4528_v55  ;;  %v4875_v61 = vsel %vm4770_vm0, %v4737_v34, %v1942_v0  ;;  %v1967_v1 = vmul.f32 %v4760_v6, %v1966_v63  ;;  %vm4886_vm4 = vmor %vm1984_vm8, %vm1985_vm9  ;;  %v2020_v34 = vand.u32 2147483648, %v4528_v55 }
 0x540   : > { %2627 = vadd.xlane.f32.xlu2 %v2626_v45  ;;  %v2025_v15 = vmul.f32 %v4833_v35, %v4510_v49  ;;  %vm4893_vm0 = vmor %vm1954_vm6, %vm1955_vm5  ;;  %vm1970_vm7 = vweird.f32 %v4760_v6  ;;  %vm4899_vm10 = vcmp.eq.f32.partialorder %v1973_v17, 8.507059e+37  ;;  %vm1999_vm6 = vweird.f32 %v4515_v37  ;;  %v4913_v20 = vpop.eup %3092 }
 0x541   : > { %v2011_v16 = vsub.f32 1.0, %v2010_v4  ;;  %v1987_v4 = vsel %vm4886_vm4, %v4697_v5, %v1983_v28  ;;  %v4924_v5 = vpop.eup %3094  ;;  %vm2014_vm8 = vweird.f32 %v4528_v55  ;;  %vm2030_vm9 = vweird.f32 %v4833_v35 }
 0x542   : > { %v2026_v17 = vsub.f32 1.0, %v2025_v15  ;;  %v2021_v12 = vor.u32 1.1754944e-38, %v2020_v34  ;;  %v4954_v45 = vmul.f32 %v4924_v5, %v4525_v26  ;;  %v2063_v0 = vand.u32 2147483647, %v4543_v41 }
 0x543   : > { %v4829_v36 = vpop.xlane.xlu2 %2435  ;;  %v4831_v21 = vpop.xlane.xlu1 %2441 }
 0x544   : > { %v4822_v40 = vpop.xlane.xlu0 %2447  ;;  %5974 = vst [vmem:[#allocation38_spill] sm:$0xff] %v4829_v36  ;;  %v1888_v36 = vmul.f32 %v4692_v50, %v4540_v53  ;;  %v2027_v34 = vmul.f32 %v4833_v35, %v2026_v17 }
 0x545   : > { %5973 = vst [vmem:[#allocation37_spill] sm:$0xff] %v4822_v40  ;;  %v1923_v40 = vadd.f32 %v4690_v10, %v1922_v23  ;;  %v1953_v23 = vadd.f32 %v4703_v25, %v1952_v44  ;;  %v1996_v44 = vsub.f32 1.0, %v1995_v14  ;;  %v1968_v14 = vadd.f32 %v4760_v6, %v1967_v1 }
 0x546   : > { %5975 = vst [vmem:[#allocation39_spill] sm:$0xff] %v4831_v21  ;;  %v4915_v19 = vmax.f32 %v1888_v36, 1e-10  ;;  %v2055_v1 = vmul.f32 %v4913_v20, %v4543_v41 }
 0x547   : > { %v1927_v50 = vsel %vm4866_vm13, %v4690_v10, %v1923_v40  ;;  %v1991_v10 = vor.u32 1.1754944e-38, %v1990_v13  ;;  %v2003_v40 = vand.u32 2147483647, %v4515_v37  ;;  %v1957_v63 = vsel %vm4893_vm0, %v4703_v25, %v1953_v23 }
 0x548   : > { %v2005_v13 = vand.u32 2147483648, %v4515_v37  ;;  %v1932_v21 = vsel %vm4804_vm11, %v1931_v39, %v1927_v50  ;;  %v2018_v25 = vand.u32 2147483647, %v4528_v55  ;;  %v1997_v36 = vmul.f32 %v4786_v31, %v1996_v44 }
 0x549   : > { %v1933_v28 = vmul.f32 %v1932_v21, %v4555_v54  ;;  %v2012_v39 = vmul.f32 %v4802_v48, %v2011_v16  ;;  %v4934_v15 = vsel %vm4839_vm12, %v1961_v22, %v1957_v63  ;;  %v4938_v50 = vsel %vm4843_vm14, %v1991_v10, %v1987_v4  ;;  %v4940_v21 = vpop.eup %3096  ;;  %vm4961_vm14 = vmor %vm1969_vm15, %vm1970_vm7 }
 0x54a   : > { %v1873_v44 = vmul.f32 %v4790_v9, %v4558_v8  ;;  %vm2000_vm11 = vweird.f32 %v4786_v31  ;;  %vm4947_vm5 = vcmp.eq.f32.partialorder %v2003_v40, 8.507059e+37  ;;  %v2006_v22 = vor.u32 1.1754944e-38, %v2005_v13 }
 0x54b   : > { %v4920_v23 = vpop.xlane.xlu2 %2444  ;;  %v4922_v56 = vpop.xlane.xlu1 %2450  ;;  %vm2029_vm12 = vweird.f32 %v4510_v49  ;;  %3098 = vrcp.f32 %v4915_v19  ;;  %vm4965_vm13 = vcmp.eq.f32.partialorder %v2018_v25, 8.507059e+37  ;;  %v2033_v10 = vand.u32 2147483647, %v4510_v49  ;;  %vm5000_vm4 = vmor %vm1999_vm6, %vm2000_vm11 }
 0x54c   : > { %v4911_v62 = vpop.xlane.xlu0 %2456  ;;  %5989 = vst [vmem:[#allocation41_spill] sm:$0xff] %v4920_v23  ;;  %v4971_v40 = vmax.f32 %v1933_v28, 1e-10  ;;  %v1972_v63 = vsel %vm4961_vm14, %v4760_v6, %v1968_v14  ;;  %v1998_v4 = vadd.f32 %v4786_v31, %v1997_v36  ;;  %v2035_v13 = vand.u32 2147483648, %v4510_v49 }
 0x54d   : > { %5988 = vst [vmem:[#allocation40_spill] sm:$0xff] %v4911_v62  ;;  %v2040_v25 = vmul.f32 %v4940_v21, %v4530_v58  ;;  %v1903_v62 = vmul.f32 %v4777_v59, %v4560_v52  ;;  %v2013_v17 = vadd.f32 %v4802_v48, %v2012_v39  ;;  %vm2015_vm15 = vweird.f32 %v4802_v48 }
 0x54e   : > { %5990 = vst [vmem:[#allocation42_spill] sm:$0xff] %v4922_v56  ;;  %v2056_v28 = vsub.f32 1.0, %v2055_v1  ;;  %3100 = vrcp.f32 %v4545_v29  ;;  %v4985_v23 = vmax.f32 %v1873_v44, 1e-10  ;;  %v2141_v9 = vand.u32 2147483648, %v4915_v19  ;;  %vm5011_vm0 = vmor %vm2014_vm8, %vm2015_vm15 }
 0x54f   : > { %v1977_v59 = vsel %vm4899_vm10, %v4870_v32, %v1972_v63  ;;  %v2065_v39 = vand.u32 2147483648, %v4543_v41  ;;  %3102 = vrcp.f32 %v4971_v40  ;;  %v2002_v63 = vsel %vm5000_vm4, %v4786_v31, %v1998_v4  ;;  %vm5043_vm10 = vmor %vm2029_vm12, %vm2030_vm9 }
 0x550   : > { %v2028_v36 = vadd.f32 %v4833_v35, %v2027_v34  ;;  %v2041_v37 = vsub.f32 1.0, %v2040_v25  ;;  %v2017_v55 = vsel %vm5011_vm0, %v4802_v48, %v2013_v17  ;;  %3104 = vrcp.f32 %v4985_v23 }
 0x551   : > { %v1918_v56 = vmul.f32 %v4853_v27, %v4573_v57  ;;  %v2057_v31 = vmul.f32 %v4913_v20, %v2056_v28  ;;  %vm2059_vm7 = vweird.f32 %v4543_v41  ;;  %v5033_v34 = vor.u32 1.1754944e-38, %v2141_v9 }
 0x552   : > { %v2066_v4 = vor.u32 1.1754944e-38, %v2065_v39  ;;  %v2007_v25 = vsel %vm4947_vm5, %v2006_v22, %v2002_v63  ;;  %vm5053_vm6 = vcmp.eq.f32.partialorder %v2063_v0, 8.507059e+37  ;;  %v2032_v16 = vsel %vm5043_vm10, %v4833_v35, %v2028_v36 }
 0x553   : > { %v5004_v44 = vpop.xlane.xlu2 %2453  ;;  %v5006_v6 = vpop.xlane.xlu1 %2459  ;;  %v2036_v22 = vor.u32 1.1754944e-38, %v2035_v13  ;;  %v2042_v39 = vmul.f32 %v4940_v21, %v2041_v37  ;;  %vm2044_vm8 = vweird.f32 %v4530_v58  ;;  %v1963_v2 = vmul.f32 %v4934_v15, %v4589_v38 }
 0x554   : > { %v4988_v14 = vpop.xlane.xlu0 %2465  ;;  %6000 = vst [vmem:[#allocation44_spill] sm:$0xff] %v5004_v44  ;;  %v5022_v44 = vmax.f32 %v1903_v62, 1e-10  ;;  %v1948_v62 = vmul.f32 %v4875_v61, %v4575_v3  ;;  %v2022_v61 = vsel %vm4965_vm13, %v2021_v12, %v2017_v55  ;;  %v5068_v12 = vmax.f32 %v1918_v56, 1e-10 }
 0x555   : > { %5997 = vst [vmem:[#allocation43_spill] sm:$0xff] %v4988_v14  ;;  %v5020_v14 = vpop.eup %3098  ;;  %v2058_v35 = vadd.f32 %v4913_v20, %v2057_v31  ;;  %vm2060_vm9 = vweird.f32 %v4913_v20  ;;  %v2186_v37 = vand.u32 2147483648, %v4971_v40  ;;  %vm2034_vm11 = vcmp.eq.f32.partialorder %v2033_v10, 8.507059e+37 }
 0x556   : > { %6001 = vst [vmem:[#allocation45_spill] sm:$0xff] %v5006_v6  ;;  %v1978_v6 = vmul.f32 %v1977_v59, %v4570_v11  ;;  %v5047_v27 = vpop.eup %3100  ;;  %v2131_v17 = vmul.f32 %v5020_v14, %v4915_v19  ;;  %3106 = vrcp.f32 %v5022_v44  ;;  %v2023_v59 = vmul.f32 %v2022_v61, %v4586_v46  ;;  %vm5100_vm12 = vmor %vm2059_vm7, %vm2060_vm9 }
 0x557   : > { %v5066_v55 = vpop.eup %3102  ;;  %v5081_v36 = vmax.f32 %v1948_v62, 1e-10  ;;  %v2126_v0 = vand.u32 2147483648, %v4985_v23  ;;  %v2037_v63 = vsel %vm2034_vm11, %v2036_v22, %v2032_v16  ;;  %vm2045_vm5 = vweird.f32 %v4940_v21 }
 0x558   : > { %v5061_v9 = vmax.f32 %v1978_v6, 1e-10  ;;  %v5078_v6 = vmul.f32 %v5047_v27, %v4545_v29  ;;  %v5087_v15 = vpop.eup %3104  ;;  %v2132_v32 = vsub.f32 1.0, %v2131_v17  ;;  %v2176_v31 = vmul.f32 %v5066_v55, %v4971_v40  ;;  %vm5152_vm13 = vmor %vm2044_vm8, %vm2045_vm5 }
 0x559   : > { %v5094_v62 = vmax.f32 %v2023_v59, 1e-10  ;;  %v2043_v48 = vadd.f32 %v4940_v21, %v2042_v39  ;;  %v5106_v17 = vmax.f32 %v1963_v2, 1e-10  ;;  %v1993_v61 = vmul.f32 %v4938_v50, %v4591_v18 }
 0x55a   : > { %3108 = vrcp.f32 %v5061_v9  ;;  %v2062_v16 = vsel %vm5100_vm12, %v4913_v20, %v2058_v35  ;;  %v2116_v39 = vmul.f32 %v5087_v15, %v4985_v23  ;;  %v5122_v2 = vmul.f32 %v5020_v14, %v2132_v32 }
 0x55b   : > { %v5083_v56 = vpop.xlane.xlu2 %2462  ;;  %v5085_v1 = vpop.xlane.xlu1 %2501  ;;  %3110 = vrcp.f32 %v5068_v12  ;;  %v5124_v49 = vor.u32 1.1754944e-38, %v2126_v0  ;;  %v2156_v50 = vand.u32 2147483648, %v5022_v44  ;;  %v6013_v20 = vand.u32 2147483647, %v4530_v58 }
 0x55c   : > { %v5074_v13 = vpop.xlane.xlu0 %2507  ;;  %6009 = vst [vmem:[#allocation47_spill] sm:$0xff] %v5083_v56  ;;  %v5113_v22 = vpop.eup %3106  ;;  %v5116_v56 = vor.u32 1.1754944e-38, %v2186_v37  ;;  %3112 = vrcp.f32 %v5081_v36  ;;  %v2050_v37 = vand.u32 2147483648, %v4530_v58  ;;  %v2177_v10 = vsub.f32 1.0, %v2176_v31 }
 0x55d   : > { %6008 = vst [vmem:[#allocation46_spill] sm:$0xff] %v5074_v13  ;;  %vm5129_vm14 = vcmp.eq.f32.partialorder %v6013_v20, 8.507059e+37  ;;  %3114 = vrcp.f32 %v5094_v62  ;;  %v2067_v59 = vsel %vm5053_vm6, %v2066_v4, %v2062_v16  ;;  %v6016_v32 = vsub.f32 1.0, %v4954_v45 }
 0x55e   : > { %6010 = vst [vmem:[#allocation48_spill] sm:$0xff] %v5085_v1  ;;  %v5142_v41 = vmul.f32 %v5113_v22, %v5022_v44  ;;  %3116 = vrcp.f32 %v5106_v17  ;;  %v5145_v20 = vmax.f32 %v1993_v61, 1e-10  ;;  %v2068_v18 = vmul.f32 %v2067_v59, %v4605_v47 }
 0x55f   : > { %v2072_v0 = vmul.f32 %v4924_v5, %v6016_v32  ;;  %v2117_v31 = vsub.f32 1.0, %v2116_v39  ;;  %v2231_v16 = vand.u32 2147483648, %v5061_v9  ;;  %v2008_v61 = vmul.f32 %v2007_v25, %v4609_v60 }
 0x560   : > { %v5158_v28 = vpop.eup %3108  ;;  %v2047_v59 = vsel %vm5152_vm13, %v4940_v21, %v2043_v48  ;;  %v5171_v38 = vor.u32 1.1754944e-38, %v2156_v50  ;;  %v2038_v46 = vmul.f32 %v2037_v63, %v4611_v30  ;;  %v2051_v3 = vor.u32 1.1754944e-38, %v2050_v37 }
 0x561   : > { %v5169_v47 = vpop.eup %3110  ;;  %vm2074_vm15 = vweird.f32 %v4525_v26  ;;  %v5178_v25 = vmul.f32 %v5066_v55, %v2177_v10  ;;  %v2171_v21 = vand.u32 2147483648, %v5068_v12  ;;  %v2073_v48 = vadd.f32 %v4924_v5, %v2072_v0 }
 0x562   : > { %v5175_v39 = vpop.eup %3112  ;;  %vm2075_vm4 = vweird.f32 %v4924_v5  ;;  %v2147_v4 = vsub.f32 1.0, %v5142_v41  ;;  %v2221_v50 = vmul.f32 %v5158_v28, %v5061_v9  ;;  %3118 = vrcp.f32 %v5145_v20 }
 0x563   : > { %v5165_v32 = vpop.xlane.xlu2 %2504  ;;  %v5167_v58 = vpop.xlane.xlu1 %2510  ;;  %v5187_v63 = vmax.f32 %v2068_v18, 1e-10  ;;  %v5192_v10 = vmul.f32 %v5087_v15, %v2117_v31  ;;  %v5194_v30 = vor.u32 1.1754944e-38, %v2231_v16  ;;  %v5196_v60 = vmax.f32 %v2008_v61, 1e-10  ;;  %vm5209_vm0 = vmor %vm2074_vm15, %vm2075_vm4 }
 0x564   : > { %v5156_v45 = vpop.xlane.xlu0 %2516  ;;  %6020 = vst [vmem:[#allocation50_spill] sm:$0xff] %v5167_v58  ;;  %v5189_v37 = vpop.eup %3114  ;;  %v2080_v0 = vand.u32 2147483648, %v4525_v26  ;;  %v2161_v41 = vmul.f32 %v5169_v47, %v5068_v12  ;;  %v2191_v18 = vmul.f32 %v5175_v39, %v5081_v36  ;;  %v5205_v11 = vmax.f32 %v2038_v46, 1e-10 }
 0x565   : > { %6019 = vst [vmem:[#allocation49_spill] sm:$0xff] %v5156_v45  ;;  %v5199_v57 = vpop.eup %3116  ;;  %v2078_v16 = vand.u32 2147483647, %v4525_v26  ;;  %v5214_v61 = vor.u32 1.1754944e-38, %v2171_v21  ;;  %v2201_v33 = vand.u32 2147483648, %v5081_v36  ;;  %v2052_v58 = vsel %vm5129_vm14, %v2051_v3, %v2047_v59 }
 0x566   : > { %6021 = vst [vmem:[#allocation51_spill] sm:$0xff] %v5196_v60  ;;  %v2077_v46 = vsel %vm5209_vm0, %v4924_v5, %v2073_v48  ;;  %vm2136_vm7 = vweird.f32 %v5020_v14  ;;  %v2222_v45 = vsub.f32 1.0, %v2221_v50  ;;  %v2266_v52 = vmul.f32 %v5189_v37, %v5094_v62 }
 0x567   : > { %6022 = vst [vmem:[#allocation52_spill] sm:$0xff] %v5205_v11  ;;  %3120 = vrcp.f32 %v5187_v63  ;;  %v2053_v21 = vmul.f32 %v2052_v58, %v4634_v42  ;;  %v2276_v8 = vand.u32 2147483648, %v5094_v62  ;;  %v2206_v3 = vmul.f32 %v5199_v57, %v5106_v17 }
 0x568   : > { %3122 = vrcp.f32 %v5196_v60  ;;  %v2081_v5 = vor.u32 1.1754944e-38, %v2080_v0  ;;  %v5237_v48 = vpop.eup %3118  ;;  %vm2135_vm10 = vweird.f32 %v4915_v19  ;;  %v2162_v50 = vsub.f32 1.0, %v2161_v41 }
 0x569   : > { %v2192_v58 = vsub.f32 1.0, %v2191_v18  ;;  %3124 = vrcp.f32 %v5205_v11  ;;  %vm2079_vm6 = vcmp.eq.f32.partialorder %v2078_v16, 8.507059e+37  ;;  %v2216_v31 = vand.u32 2147483648, %v5106_v17  ;;  %vm5316_vm15 = vmor %vm2135_vm10, %vm2136_vm7 }
 0x56a   : > { %v2246_v42 = vand.u32 2147483648, %v5145_v20  ;;  %v2082_v0 = vsel %vm2079_vm6, %v2081_v5, %v2077_v46  ;;  %vm2181_vm8 = vweird.f32 %v5066_v55  ;;  %v2267_v54 = vsub.f32 1.0, %v2266_v52 }
 0x56b   : > { %v5233_v35 = vpop.xlane.xlu2 %2513  ;;  %v5235_v59 = vpop.xlane.xlu1 %2519  ;;  %v5248_v24 = vmax.f32 %v2053_v21, 1e-10  ;;  %v2083_v41 = vmul.f32 %v2082_v0, %v4636_v51  ;;  %vm2121_vm9 = vweird.f32 %v5087_v15  ;;  %v5253_v18 = vmul.f32 %v5158_v28, %v2222_v45 }
 0x56c   : > { %v5227_v26 = vpop.xlane.xlu0 %2525  ;;  %6026 = vst [vmem:[#allocation54_spill] sm:$0xff] %v5235_v59  ;;  %v5246_v59 = vmul.f32 %v5113_v22, %v2147_v4  ;;  %v5255_v16 = vor.u32 1.1754944e-38, %v2201_v33  ;;  %v2207_v1 = vsub.f32 1.0, %v2206_v3  ;;  %v2236_v46 = vmul.f32 %v5237_v48, %v5145_v20 }
 0x56d   : > { %6025 = vst [vmem:[#allocation53_spill] sm:$0xff] %v5227_v26  ;;  %v2321_v26 = vand.u32 2147483648, %v5187_v63  ;;  %v5259_v5 = vpop.eup %3120  ;;  %vm2180_vm11 = vweird.f32 %v4971_v40  ;;  %v5263_v52 = vmul.f32 %v5169_v47, %v2162_v50  ;;  %v5266_v4 = vmul.f32 %v5175_v39, %v2192_v58 }
 0x56e   : > { %v5268_v21 = vor.u32 1.1754944e-38, %v2276_v8  ;;  %v6028_v45 = vsub.f32 1.0, %v5078_v6  ;;  %v5273_v3 = vpop.eup %3122  ;;  %vm2120_vm5 = vweird.f32 %v4985_v23  ;;  %v5276_v0 = vor.u32 1.1754944e-38, %v2216_v31 }
 0x56f   : > { %v5278_v51 = vor.u32 1.1754944e-38, %v2246_v42  ;;  %v5280_v13 = vor.u32 1.1754944e-38, %v2321_v26  ;;  %v2261_v50 = vand.u32 2147483648, %v5196_v60  ;;  %v5283_v58 = vpop.eup %3124  ;;  %vm2151_vm12 = vweird.f32 %v5113_v22 }
 0x570   : > { %6027 = vst [vmem:[#allocation55_spill] sm:$0xff] %v5268_v21  ;;  %v2087_v33 = vmul.f32 %v5047_v27, %v6028_v45  ;;  %v5287_v8 = vmul.f32 %v5189_v37, %v2267_v54  ;;  %3126 = vrcp.f32 %v5248_v24  ;;  %v5290_v6 = vmax.f32 %v2083_v41, 1e-10 }
 0x571   : > { %6029 = vst [vmem:[#allocation56_spill] sm:$0xff] %v5276_v0  ;;  %v2134_v42 = vadd.f32 %v5020_v14, %v5122_v2  ;;  %v5297_v26 = vmul.f32 %v5199_v57, %v2207_v1  ;;  %v2237_v31 = vsub.f32 1.0, %v2236_v46  ;;  %vm2150_vm14 = vweird.f32 %v5022_v44 }
 0x572   : > { %6030 = vst [vmem:[#allocation57_spill] sm:$0xff] %v5278_v51  ;;  %v2291_v51 = vand.u32 2147483648, %v5205_v11  ;;  %v2251_v41 = vmul.f32 %v5273_v3, %v5196_v60  ;;  %v2088_v2 = vadd.f32 %v5047_v27, %v2087_v33  ;;  %vm2090_vm13 = vweird.f32 %v5047_v27 }
 0x573   : > { %6031 = vst [vmem:[#allocation58_spill] sm:$0xff] %v5280_v13  ;;  %v2311_v13 = vmul.f32 %v5259_v5, %v5187_v63  ;;  %v5302_v54 = vpop.xlane.xlu2 %2522  ;;  %v5304_v0 = vpop.xlane.xlu1 %2528  ;;  %v2139_v1 = vand.u32 2147483647, %v4915_v19  ;;  %vm2089_vm4 = vweird.f32 %v4545_v29  ;;  %v2095_v33 = vand.u32 2147483648, %v4545_v29 }
 0x574   : > { %v5292_v45 = vpop.xlane.xlu0 %2534  ;;  %6033 = vst [vmem:[#allocation60_spill] sm:$0xff] %v5302_v54  ;;  %vm2226_vm0 = vweird.f32 %v5158_v28  ;;  %3128 = vrcp.f32 %v5290_v6  ;;  %v2093_v54 = vand.u32 2147483647, %v4545_v29  ;;  %v2138_v19 = vsel %vm5316_vm15, %v5020_v14, %v2134_v42  ;;  %vm5342_vm10 = vmor %vm2089_vm4, %vm2090_vm13 }
 0x575   : > { %6032 = vst [vmem:[#allocation59_spill] sm:$0xff] %v5292_v45  ;;  %v2281_v45 = vmul.f32 %v5283_v58, %v5205_v11  ;;  %vm2166_vm7 = vweird.f32 %v5169_v47  ;;  %v2312_v11 = vsub.f32 1.0, %v2311_v13  ;;  %v5338_v60 = vor.u32 1.1754944e-38, %v2291_v51  ;;  %vm5360_vm13 = vmor %vm2180_vm11, %vm2181_vm8 }
 0x576   : > { %6034 = vst [vmem:[#allocation61_spill] sm:$0xff] %v5304_v0  ;;  %v5320_v0 = vor.u32 1.1754944e-38, %v2261_v50  ;;  %v2179_v50 = vadd.f32 %v5066_v55, %v5178_v25  ;;  %v2119_v14 = vadd.f32 %v5087_v15, %v5192_v10  ;;  %v5348_v42 = vpop.eup %3126  ;;  %vm2225_vm6 = vweird.f32 %v5061_v9 }
 0x577   : > { %vm2196_vm15 = vweird.f32 %v5175_v39  ;;  %v2252_v25 = vsub.f32 1.0, %v2251_v41  ;;  %v2092_v51 = vsel %vm5342_vm10, %v5047_v27, %v2088_v2  ;;  %vm2140_vm3 = vcmp.eq.f32.partialorder %v2139_v1, 8.507059e+37  ;;  %vm5371_vm10 = vmor %vm2120_vm5, %vm2121_vm9 }
 0x578   : > { %6037 = vst [vmem:[#allocation62_spill] sm:$0xff] %v5320_v0  ;;  %v5336_v0 = vmul.f32 %v5237_v48, %v2237_v31  ;;  %v2184_v13 = vand.u32 2147483647, %v4971_v40  ;;  %vm2165_vm4 = vweird.f32 %v5068_v12  ;;  %v2282_v31 = vsub.f32 1.0, %v2281_v45 }
 0x579   : > { %v2096_v46 = vor.u32 1.1754944e-38, %v2095_v33  ;;  %v2143_v41 = vsel %vm2140_vm3, %v5033_v34, %v2138_v19  ;;  %v2124_v21 = vand.u32 2147483647, %v4985_v23  ;;  %vm2195_vm8 = vweird.f32 %v5081_v36 }
 0x57a   : > { %v2306_v40 = vand.u32 2147483648, %v5248_v24  ;;  %vm2094_vm11 = vcmp.eq.f32.partialorder %v2093_v54, 8.507059e+37  ;;  %v2183_v34 = vsel %vm5360_vm13, %v5066_v55, %v2179_v50  ;;  %v2149_v45 = vadd.f32 %v5113_v22, %v5246_v59  ;;  %v5399_v50 = vpop.eup %3128  ;;  %vm5407_vm13 = vmor %vm2150_vm14, %vm2151_vm12 }
 0x57b   : > { %v5386_v23 = vmul.f32 %v5259_v5, %v2312_v11  ;;  %v5390_v1 = vmul.f32 %v5348_v42, %v5248_v24  ;;  %v2097_v33 = vsel %vm2094_vm11, %v2096_v46, %v2092_v51  ;;  %v5392_v54 = vpop.xlane.xlu2 %2531  ;;  %v5394_v19 = vpop.xlane.xlu1 %2537  ;;  %v2123_v55 = vsel %vm5371_vm10, %v5087_v15, %v2119_v14  ;;  %vm5455_vm12 = vmor %vm2165_vm4, %vm2166_vm7 }
 0x57c   : > { %v5377_v2 = vpop.xlane.xlu0 %2543  ;;  %v2098_v59 = vmul.f32 %v2097_v33, %v4681_v7  ;;  %vm2356_vm9 = vcmp.ne.f32.partialorder %v2143_v41, %v2143_v41  ;;  %vm2185_vm5 = vcmp.eq.f32.partialorder %v2184_v13, 8.507059e+37  ;;  %v2154_v11 = vand.u32 2147483647, %v5022_v44  ;;  %vm5474_vm7 = vmor %vm2195_vm8, %vm2196_vm15 }
 0x57d   : > { %vm2270_vm11 = vweird.f32 %v5094_v62  ;;  %v5413_v15 = vmul.f32 %v5273_v3, %v2252_v25  ;;  %v5416_v14 = vmul.f32 %v5283_v58, %v2282_v31  ;;  %v2188_v13 = vsel %vm2185_vm5, %v5116_v56, %v2183_v34 }
 0x57e   : > { %vm2125_vm10 = vcmp.eq.f32.partialorder %v2124_v21, 8.507059e+37  ;;  %v2153_v44 = vsel %vm5407_vm13, %v5113_v22, %v2149_v45  ;;  %v2224_v46 = vadd.f32 %v5158_v28, %v5253_v18  ;;  %v2229_v25 = vand.u32 2147483647, %v5061_v9  ;;  %vm5444_vm13 = vmor %vm2225_vm6, %vm2226_vm0  ;;  %v6068_v45 = vld [vmem:[#allocation30_spill] sm:$0xff] }
 0x57f   : > { %v2128_v10 = vsel %vm2125_vm10, %v5124_v49, %v2123_v55  ;;  %v2297_v27 = vsub.f32 1.0, %v5390_v1  ;;  %v5430_v31 = vmul.f32 %v5399_v50, %v5290_v6  ;;  %v2372_v56 = vsel %vm2356_vm9, 0.0, %v2143_v41 }
 0x580   : > { %v2164_v49 = vadd.f32 %v5169_v47, %v5263_v52  ;;  %v5436_v21 = vmax.f32 %v2098_v59, 1e-10  ;;  %vm2359_vm14 = vcmp.ne.f32.partialorder %v2188_v13, %v2188_v13  ;;  %vm2155_vm5 = vcmp.eq.f32.partialorder %v2154_v11, 8.507059e+37  ;;  %v6054_v59 = vld [vmem:[#allocation3_spill] sm:$0xff] }
 0x581   : > { %v2194_v22 = vadd.f32 %v5175_v39, %v5266_v4  ;;  %vm2241_vm9 = vweird.f32 %v5237_v48  ;;  %vm5917_vm10 = vcmask 23552   ;;  %vm2355_vm3 = vcmp.ne.f32.partialorder %v2128_v10, %v2128_v10  ;;  %v6065_v4 = vld [vmem:[#allocation46_spill] sm:$0xff] }
 0x582   : > { %v2158_v52 = vsel %vm2155_vm5, %v5171_v38, %v2153_v44  ;;  %v2169_v41 = vand.u32 2147483647, %v5068_v12  ;;  %v2662_v9 = vsel %vm1084_vm1, %v4683_v43, %v5165_v32  ;;  %v2228_v38 = vsel %vm5444_vm13, %v5158_v28, %v2224_v46 }
 0x583   : > { %vm5465_vm0 = vcmp.eq.f32.partialorder %v2229_v25, 8.507059e+37  ;;  %v2199_v33 = vand.u32 2147483647, %v5081_v36  ;;  %vm2240_vm6 = vweird.f32 %v5145_v20  ;;  %vm2726_vm4 = vcmask 39936   ;;  %v5480_v28 = vpop.xlane.xlu2 %2540  ;;  %v5482_v32 = vpop.xlane.xlu1 %2546 }
 0x584   : > { %v2586_v34 = vpop.xlane.xlu0 %2585  ;;  %v2168_v55 = vsel %vm5455_vm12, %v5169_v47, %v2164_v49  ;;  %v2269_v36 = vadd.f32 %v5189_v37, %v5287_v8  ;;  %vm2743_vm15 = vcmask 48128   ;;  %vm2357_vm8 = vcmp.ne.f32.partialorder %v2158_v52, %v2158_v52 }
 0x585   : > { %v2678_v43 = vsel %vm5918_vm2, %v2662_v9, %v2586_v34  ;;  %v2198_v51 = vsel %vm5474_vm7, %v5175_v39, %v2194_v22  ;;  %vm6055_vm12 = vcmask 31744   ;;  %v2233_v8 = vsel %vm5465_vm0, %v5194_v30, %v2228_v38  ;;  %v6066_v9 = vld [vmem:[#allocation35_spill] sm:$0xff]  ;;  %v6067_v38 = vld [vmem:[#allocation48_spill] sm:$0xff] }
 0x586   : > { %v2695_v11 = vsel %vm5917_vm10, %v2678_v43, %v6054_v59  ;;  %vm2170_vm5 = vcmp.eq.f32.partialorder %v2169_v41, 8.507059e+37  ;;  %v2274_v44 = vand.u32 2147483647, %v5094_v62  ;;  %vm6056_vm13 = vweird.f32 %v5189_v37 }
 0x587   : > { %v2711_v47 = vsel %vm6055_vm12, %v2695_v11, %v4540_v53  ;;  %vm5510_vm10 = vmor %vm2270_vm11, %vm6056_vm13  ;;  %v2173_v53 = vsel %vm2170_vm5, %v5214_v61, %v2168_v55  ;;  %vm2200_vm12 = vcmp.eq.f32.partialorder %v2199_v33, 8.507059e+37  ;;  %v2209_v30 = vadd.f32 %v5199_v57, %v5297_v26  ;;  %v6073_v55 = vld [vmem:[#allocation9_spill] sm:$0xff] }
 0x588   : > { %v2728_v39 = vsel %vm2726_vm4, %v2711_v47, %v2372_v56  ;;  %3130 = vrcp.f32 %v5436_v21  ;;  %v2203_v62 = vsel %vm2200_vm12, %v5255_v16, %v2198_v51  ;;  %v2273_v25 = vsel %vm5510_vm10, %v5189_v37, %v2269_v36 }
 0x589   : > { %2745 = vst.msk [vmem:[%s5493_s13 + $0x8] sm:$0xff] %vm2743_vm15, %v2728_v39  ;;  %v2214_v49 = vand.u32 2147483647, %v5106_v17  ;;  %vm2315_vm11 = vweird.f32 %v5187_v63  ;;  %v2327_v61 = vsub.f32 1.0, %v5430_v31  ;;  %v2375_v56 = vsel %vm2359_vm14, 0.0, %v2188_v13  ;;  %v6063_v13 = vld [vmem:[#allocation36_spill] sm:$0xff] }
 0x58a   : > { %v2371_v26 = vsel %vm2355_vm3, 0.0, %v2128_v10  ;;  %v2373_v22 = vsel %vm2357_vm8, 0.0, %v2158_v52  ;;  %vm6059_vm0 = vweird.f32 %v5199_v57  ;;  %vm6060_vm5 = vweird.f32 %v5106_v17  ;;  %v6064_v52 = vld [vmem:[#allocation55_spill] sm:$0xff]  ;;  %vm5566_vm8 = vmor %vm2240_vm6, %vm2241_vm9  ;;  %v6077_v39 = vld [vmem:[#allocation4_spill] sm:$0xff] }
 0x58b   : > { %vm5536_vm13 = vmor %vm6060_vm5, %vm6059_vm0  ;;  %vm2362_vm10 = vcmp.ne.f32.partialorder %v2233_v8, %v2233_v8  ;;  %vm2358_vm12 = vcmp.ne.f32.partialorder %v2173_v53, %v2173_v53  ;;  %vm2275_vm7 = vcmp.eq.f32.partialorder %v2274_v44, 8.507059e+37  ;;  %v2239_v37 = vadd.f32 %v5237_v48, %v5336_v0  ;;  %v2589_v12 = vpop.xlane.xlu1 %2588  ;;  %v6075_v44 = vld [vmem:[#allocation18_spill] sm:$0xff] }
 0x58c   : > { %v2665_v10 = vsel %vm1084_vm1, %v6063_v13, %v5233_v35  ;;  %v2595_v18 = vpop.xlane.xlu0 %2594  ;;  %vm2360_vm3 = vcmp.ne.f32.partialorder %v2203_v62, %v2203_v62  ;;  %v5546_v41 = vsel %vm2275_vm7, %v6064_v52, %v2273_v25  ;;  %v2213_v17 = vsel %vm5536_vm13, %v5199_v57, %v2209_v30  ;;  %v2583_v35 = vpop.xlane.xlu2 %2582  ;;  %v6079_v25 = vld [vmem:[#allocation6_spill] sm:$0xff]  ;;  %v6081_v13 = vld [vmem:[#allocation19_spill] sm:$0xff] }
 0x58d   : > { %v2663_v34 = vsel %vm1084_vm1, %v6066_v9, %v6065_v4  ;;  %v2661_v0 = vsel %vm1084_vm1, %v6068_v45, %v6067_v38  ;;  %v2681_v33 = vsel %vm5918_vm2, %v2665_v10, %v2595_v18  ;;  %vm5558_vm14 = vcmp.eq.f32.partialorder %v2214_v49, 8.507059e+37  ;;  %v6083_v18 = vld [vmem:[#allocation20_spill] sm:$0xff]  ;;  %v6085_v9 = vld [vmem:[#allocation51_spill] sm:$0xff]  ;;  %v6095_v57 = vld [vmem:[#allocation38_spill] sm:$0xff] }
 0x58e   : > { %vm6074_vm7 = vcmask 23552   ;;  %v2677_v59 = vsel %vm5918_vm2, %v2661_v0, %v2583_v35  ;;  %v2679_v11 = vsel %vm5918_vm2, %v2663_v34, %v2589_v12  ;;  %v2244_v51 = vand.u32 2147483647, %v5145_v20  ;;  %v5575_v47 = vpop.eup %3130  ;;  %v6091_v0 = vld [vmem:[#allocation52_spill] sm:$0xff]  ;;  %v6093_v35 = vld [vmem:[#allocation39_spill] sm:$0xff] }
 0x58f   : > { %v2698_v36 = vsel %vm6074_vm7, %v2681_v33, %v6073_v55  ;;  %vm2256_vm0 = vweird.f32 %v5273_v3  ;;  %vm6076_vm5 = vcmask 31744   ;;  %vm6078_vm9 = vmmov %vm6074_vm7  ;;  %v2243_v16 = vsel %vm5566_vm8, %v5237_v48, %v2239_v37  ;;  %v6086_v37 = vld [vmem:[#allocation56_spill] sm:$0xff] }
 0x590   : > { %v2714_v46 = vsel %vm6076_vm5, %v2698_v36, %v6075_v44  ;;  %v2694_v30 = vsel %vm6078_vm9, %v2677_v59, %v6077_v39  ;;  %vm6080_vm6 = vmmov %vm6074_vm7  ;;  %v2314_v4 = vadd.f32 %v5259_v5, %v5386_v23  ;;  %v2319_v38 = vand.u32 2147483647, %v5187_v63  ;;  %v6092_v33 = vld [vmem:[#allocation60_spill] sm:$0xff]  ;;  %v6096_v36 = vld [vmem:[#allocation50_spill] sm:$0xff] }
 0x591   : > { %v2696_v49 = vsel %vm6080_vm6, %v2679_v11, %v6079_v25  ;;  %v2731_v20 = vsel %vm2726_vm4, %v2714_v46, %v2375_v56  ;;  %vm6082_vm13 = vmmov %vm6076_vm5  ;;  %v2218_v56 = vsel %vm5558_vm14, %v6086_v37, %v2213_v17  ;;  %vm2286_vm8 = vweird.f32 %v5283_v58  ;;  %v6090_v17 = vld [vmem:[#allocation57_spill] sm:$0xff]  ;;  %v6098_v39 = vld [vmem:[#allocation12_spill] sm:$0xff] }
 0x592   : > { %v2710_v10 = vsel %vm6082_vm13, %v2694_v30, %v6081_v13  ;;  %vm6084_vm7 = vmmov %vm6076_vm5  ;;  %vm2255_vm5 = vweird.f32 %v6085_v9  ;;  %2748 = vst.msk [vmem:[%s5493_s13 + $0x20] sm:$0xff] %vm2743_vm15, %v2731_v20  ;;  %v2298_v23 = vmul.f32 %v5348_v42, %v2297_v27  ;;  %v5609_v45 = vmul.f32 %v5575_v47, %v5436_v21  ;;  %v6097_v59 = vld [vmem:[#allocation33_spill] sm:$0xff]  ;;  %v6109_v37 = vld [vmem:[#allocation23_spill] sm:$0xff] }
 0x593   : > { %v2712_v52 = vsel %vm6084_vm7, %v2696_v49, %v6083_v18  ;;  %v2727_v34 = vsel %vm2726_vm4, %v2710_v10, %v2371_v26  ;;  %v2378_v26 = vsel %vm2362_vm10, 0.0, %v2233_v8  ;;  %vm2245_vm9 = vcmp.eq.f32.partialorder %v2244_v51, 8.507059e+37  ;;  %v2598_v46 = vpop.xlane.xlu1 %2597  ;;  %v6100_v25 = vld [vmem:[#allocation21_spill] sm:$0xff]  ;;  %v6106_v18 = vld [vmem:[#allocation58_spill] sm:$0xff] }
 0x594   : > { %v2729_v48 = vsel %vm2726_vm4, %v2712_v52, %v2373_v22  ;;  %2744 = vst.msk [vmem:[%s5493_s13] sm:$0xff] %vm2743_vm15, %v2727_v34  ;;  %vm6087_vm6 = vweird.f32 %v5259_v5  ;;  %v2374_v1 = vsel %vm2358_vm12, 0.0, %v2173_v53  ;;  %v2376_v27 = vsel %vm2360_vm3, 0.0, %v2203_v62  ;;  %v2604_v12 = vpop.xlane.xlu0 %2603  ;;  %v6094_v62 = vld [vmem:[#allocation49_spill] sm:$0xff]  ;;  %v2592_v44 = vpop.xlane.xlu2 %2591  ;;  %v6107_v34 = vld [vmem:[#allocation22_spill] sm:$0xff] }
 0x595   : > { %vm5618_vm14 = vmor %vm2315_vm11, %vm6087_vm6  ;;  %2746 = vst.msk [vmem:[%s5493_s13 + $0x10] sm:$0xff] %vm2743_vm15, %v2729_v48  ;;  %vm2365_vm13 = vcmp.ne.f32.partialorder %v5546_v41, %v5546_v41  ;;  %v2248_v8 = vsel %vm2245_vm9, %v6090_v17, %v2243_v16  ;;  %vm2285_vm10 = vweird.f32 %v6091_v0  ;;  %v2668_v63 = vsel %vm1084_vm1, %v6093_v35, %v6092_v33  ;;  %v6102_v16 = vld [vmem:[#allocation7_spill] sm:$0xff]  ;;  %v6104_v13 = vld [vmem:[#allocation5_spill] sm:$0xff] }
 0x596   : > { %vm2361_vm11 = vcmp.ne.f32.partialorder %v2218_v56, %v2218_v56  ;;  %v2318_v43 = vsel %vm5618_vm14, %v5259_v5, %v2314_v4  ;;  %v2254_v53 = vadd.f32 %v5273_v3, %v5413_v15  ;;  %v2666_v55 = vsel %vm1084_vm1, %v6095_v57, %v6094_v62  ;;  %v6120_v57 = vld [vmem:[#allocation54_spill] sm:$0xff] }
 0x597   : > { %v2664_v11 = vsel %vm1084_vm1, %v6097_v59, %v6096_v36  ;;  %v2684_v51 = vsel %vm5918_vm2, %v2668_v63, %v2604_v12  ;;  %vm2320_vm12 = vcmp.eq.f32.partialorder %v2319_v38, 8.507059e+37  ;;  %vm6099_vm3 = vcmask 23552  }
 0x598   : > { %v2701_v5 = vsel %vm6099_vm3, %v2684_v51, %v6098_v39  ;;  %v2680_v30 = vsel %vm5918_vm2, %v2664_v11, %v2592_v44  ;;  %v2682_v15 = vsel %vm5918_vm2, %v2666_v55, %v2598_v46  ;;  %vm2363_vm7 = vcmp.ne.f32.partialorder %v2248_v8, %v2248_v8  ;;  %vm6103_vm6 = vmmov %vm6099_vm3  ;;  %v6121_v55 = vld [vmem:[#allocation34_spill] sm:$0xff] }
 0x599   : > { %vm6101_vm9 = vcmask 31744   ;;  %v2697_v20 = vsel %vm6103_vm6, %v2680_v30, %v6102_v16  ;;  %vm6105_vm14 = vmmov %vm6099_vm3  ;;  %v2323_v52 = vsel %vm2320_vm12, %v6106_v18, %v2318_v43  ;;  %v2259_v22 = vand.u32 2147483647, %v6085_v9  ;;  %v6127_v30 = vld [vmem:[#allocation24_spill] sm:$0xff] }
 0x59a   : > { %v2717_v49 = vsel %vm6101_vm9, %v2701_v5, %v6100_v25  ;;  %v2699_v10 = vsel %vm6105_vm14, %v2682_v15, %v6104_v13  ;;  %vm6108_vm3 = vmmov %vm6101_vm9  ;;  %vm2301_vm9 = vweird.f32 %v5348_v42  ;;  %v2336_v17 = vand.u32 2147483648, %v5290_v6  ;;  %v6129_v25 = vld [vmem:[#allocation10_spill] sm:$0xff]  ;;  %v6130_v16 = vld [vmem:[#allocation8_spill] sm:$0xff] }
 0x59b   : > { %v2734_v4 = vsel %vm2726_vm4, %v2717_v49, %v2378_v26  ;;  %v2713_v48 = vsel %vm6108_vm3, %v2697_v20, %v6107_v34  ;;  %vm6110_vm2 = vmmov %vm6108_vm3  ;;  %v2328_v63 = vmul.f32 %v5399_v50, %v2327_v61  ;;  %v2342_v12 = vsub.f32 1.0, %v5609_v45  ;;  %v6113_v45 = vld [vmem:[#allocation42_spill] sm:$0xff]  ;;  %v2607_v11 = vpop.xlane.xlu1 %2606 }
 0x59c   : > { %v2715_v38 = vsel %vm6110_vm2, %v2699_v10, %v6109_v37  ;;  %2751 = vst.msk [vmem:[%s5493_s13 + $0x38] sm:$0xff] %vm2743_vm15, %v2734_v4  ;;  %v2730_v33 = vsel %vm2726_vm4, %v2713_v48, %v2374_v1  ;;  %vm5672_vm12 = vmor %vm2255_vm5, %vm2256_vm0  ;;  %v2381_v1 = vsel %vm2365_vm13, 0.0, %v5546_v41  ;;  %v2284_v9 = vadd.f32 %v5283_v58, %v5416_v14  ;;  %v2613_v62 = vpop.xlane.xlu0 %2612  ;;  %v6132_v13 = vld [vmem:[#allocation62_spill] sm:$0xff]  ;;  %v6133_v4 = vld [vmem:[#allocation25_spill] sm:$0xff] }
 0x59d   : > { %v2732_v35 = vsel %vm2726_vm4, %v2715_v38, %v2376_v27  ;;  %2747 = vst.msk [vmem:[%s5493_s13 + $0x18] sm:$0xff] %vm2743_vm15, %v2730_v33  ;;  %v2377_v27 = vsel %vm2361_vm11, 0.0, %v2218_v56  ;;  %v2379_v31 = vsel %vm2363_vm7, 0.0, %v2248_v8  ;;  %vm2368_vm2 = vcmp.ne.f32.partialorder %v2323_v52, %v2323_v52  ;;  %vm5710_vm5 = vmor %vm2285_vm10, %vm2286_vm8  ;;  %v6118_v8 = vld [vmem:[#allocation53_spill] sm:$0xff]  ;;  %v6134_v34 = vld [vmem:[#allocation26_spill] sm:$0xff] }
 0x59e   : > { %2749 = vst.msk [vmem:[%s5493_s13 + $0x28] sm:$0xff] %vm2743_vm15, %v2732_v35  ;;  %v2258_v61 = vsel %vm5672_vm12, %v5273_v3, %v2254_v53  ;;  %v2671_v43 = vsel %vm1084_vm1, %v6113_v45, %v5392_v54  ;;  %vm5698_vm0 = vcmp.eq.f32.partialorder %v2259_v22, 8.507059e+37  ;;  %v2289_v14 = vand.u32 2147483647, %v6091_v0  ;;  %v6119_v54 = vld [vmem:[#allocation41_spill] sm:$0xff]  ;;  %v6123_v0 = vld [vmem:[#allocation15_spill] sm:$0xff]  ;;  %vm6124_vm8 = vmmov %vm6103_vm6 }
 0x59f   : > { %v5704_v56 = vadd.f32 %v5348_v42, %v2298_v23  ;;  %v2669_v53 = vsel %vm1084_vm1, %v6119_v54, %v6118_v8  ;;  %v2667_v36 = vsel %vm1084_vm1, %v6121_v55, %v6120_v57  ;;  %vm6122_vm13 = vcmask 15360   ;;  %v2601_v23 = vpop.xlane.xlu2 %2600  ;;  %vm6128_vm7 = vmmov %vm6108_vm3  ;;  %v6144_v45 = vld [vmem:[#allocation37_spill] sm:$0xff]  ;;  %v6151_v57 = vld [vmem:[#allocation27_spill] sm:$0xff] }
 0x5a0   : > { %v2687_v59 = vsel %vm6122_vm13, %v2671_v43, %v2613_v62  ;;  %v2304_v51 = vand.u32 2147483647, %v5248_v24  ;;  %vm6125_vm10 = vmmov %vm6122_vm13  ;;  %v2288_v5 = vsel %vm5710_vm5, %v5283_v58, %v2284_v9  ;;  %v2263_v10 = vsel %vm5698_vm0, %v6132_v13, %v2258_v61 }
 0x5a1   : > { %v2704_v44 = vsel %vm6124_vm8, %v2687_v59, %v6123_v0  ;;  %v2683_v46 = vsel %vm6125_vm10, %v2667_v36, %v2601_v23  ;;  %vm6126_vm11 = vmmov %vm6125_vm10  ;;  %vm2290_vm5 = vcmp.eq.f32.partialorder %v2289_v14, 8.507059e+37  ;;  %vm2300_vm13 = vweird.f32 %v5248_v24  ;;  %v6153_v36 = vld [vmem:[#allocation13_spill] sm:$0xff]  ;;  %v6157_v0 = vld [vmem:[#allocation28_spill] sm:$0xff] }
 0x5a2   : > { %v2685_v39 = vsel %vm6126_vm11, %v2669_v53, %v2607_v11  ;;  %v2720_v15 = vsel %vm6128_vm7, %v2704_v44, %v6127_v30  ;;  %v2700_v49 = vsel %vm6103_vm6, %v2683_v46, %v6129_v25  ;;  %vm6131_vm14 = vmmov %vm6103_vm6  ;;  %v2293_v22 = vsel %vm2290_vm5, %v5338_v60, %v2288_v5 }
 0x5a3   : > { %v2702_v20 = vsel %vm6131_vm14, %v2685_v39, %v6130_v16  ;;  %v2737_v18 = vsel %vm2726_vm4, %v2720_v15, %v2381_v1  ;;  %v2716_v58 = vsel %vm6108_vm3, %v2700_v49, %v6133_v4  ;;  %vm6135_vm12 = vmmov %vm6108_vm3  ;;  %v2307_v33 = vor.u32 1.1754944e-38, %v2306_v40  ;;  %v6138_v40 = vld [vmem:[#allocation45_spill] sm:$0xff]  ;;  %v2616_v41 = vpop.xlane.xlu1 %2615 }
 0x5a4   : > { %v2718_v48 = vsel %vm6135_vm12, %v2702_v20, %v6134_v34  ;;  %2754 = vst.msk [vmem:[%s5493_s13 + $0x50] sm:$0xff] %vm2743_vm15, %v2737_v18  ;;  %v2733_v37 = vsel %vm2726_vm4, %v2716_v58, %v2377_v27  ;;  %vm2330_vm0 = vweird.f32 %v5290_v6  ;;  %vm2331_vm8 = vweird.f32 %v5399_v50  ;;  %vm5757_vm10 = vmor %vm2300_vm13, %vm2301_vm9  ;;  %v2622_v9 = vpop.xlane.xlu0 %2621  ;;  %v6159_v39 = vld [vmem:[#allocation29_spill] sm:$0xff]  ;;  %v6161_v20 = vld [vmem:[#allocation47_spill] sm:$0xff] }
 0x5a5   : > { %v2735_v38 = vsel %vm2726_vm4, %v2718_v48, %v2379_v31  ;;  %v2337_v35 = vor.u32 1.1754944e-38, %v2336_v17  ;;  %2750 = vst.msk [vmem:[%s5493_s13 + $0x30] sm:$0xff] %vm2743_vm15, %v2733_v37  ;;  %v2343_v1 = vmul.f32 %v5575_v47, %v2342_v12  ;;  %v2384_v24 = vsel %vm2368_vm2, 0.0, %v2323_v52  ;;  %v6141_v31 = vld [vmem:[#allocation59_spill] sm:$0xff]  ;;  %v6142_v52 = vld [vmem:[#allocation44_spill] sm:$0xff]  ;;  %vm5789_vm6 = vmor %vm2330_vm0, %vm2331_vm8 }
 0x5a6   : > { %2752 = vst.msk [vmem:[%s5493_s13 + $0x40] sm:$0xff] %vm2743_vm15, %v2735_v38  ;;  %vm2364_vm11 = vcmp.ne.f32.partialorder %v2263_v10, %v2263_v10  ;;  %v2329_v60 = vadd.f32 %v5399_v50, %v2328_v63  ;;  %v2674_v17 = vsel %vm1084_vm1, %v6138_v40, %v5480_v28  ;;  %vm2366_vm7 = vcmp.ne.f32.partialorder %v2293_v22, %v2293_v22  ;;  %v6143_v63 = vld [vmem:[#allocation61_spill] sm:$0xff]  ;;  %vm6154_vm13 = vmmov %vm6131_vm14  ;;  %v6172_v40 = vld [vmem:[#allocation32_spill] sm:$0xff] }
 0x5a7   : > { %v2303_v27 = vsel %vm5757_vm10, %v5348_v42, %v5704_v56  ;;  %vm5773_vm9 = vcmp.eq.f32.partialorder %v2304_v51, 8.507059e+37  ;;  %v2672_v61 = vsel %vm1084_vm1, %v6142_v52, %v6141_v31  ;;  %v2670_v43 = vsel %vm1084_vm1, %v6144_v45, %v6143_v63  ;;  %v2610_v62 = vpop.xlane.xlu2 %2609  ;;  %v6148_v56 = vld [vmem:[#allocation17_spill] sm:$0xff]  ;;  %vm6156_vm0 = vmmov %vm6154_vm13 }
 0x5a8   : > { %vm6145_vm2 = vcmask 15360   ;;  %v2334_v14 = vand.u32 2147483647, %v5290_v6  ;;  %v2380_v8 = vsel %vm2364_vm11, 0.0, %v2263_v10  ;;  %vm6152_vm5 = vcmask 31744   ;;  %v6155_v6 = vld [vmem:[#allocation11_spill] sm:$0xff] }
 0x5a9   : > { %v2690_v28 = vsel %vm6145_vm2, %v2674_v17, %v2622_v9  ;;  %vm6149_vm3 = vmmov %vm6145_vm2  ;;  %v2333_v11 = vsel %vm5789_vm6, %v5399_v50, %v2329_v60  ;;  %v2382_v46 = vsel %vm2366_vm7, 0.0, %v2293_v22  ;;  %v2308_v25 = vsel %vm5773_vm9, %v2307_v33, %v2303_v27  ;;  %v6162_v10 = vld [vmem:[#allocation40_spill] sm:$0xff] }
 0x5aa   : > { %v2707_v3 = vsel %vm6131_vm14, %v2690_v28, %v6148_v56  ;;  %v2686_v54 = vsel %vm6149_vm3, %v2670_v43, %v2610_v62  ;;  %vm6150_vm12 = vmmov %vm6145_vm2  ;;  %vm2335_vm11 = vcmp.eq.f32.partialorder %v2334_v14, 8.507059e+37  ;;  %vm2346_vm2 = vweird.f32 %v5575_v47  ;;  %v6166_v22 = vld [vmem:[#allocation16_spill] sm:$0xff] }
 0x5ab   : > { %v2688_v53 = vsel %vm6150_vm12, %v2672_v61, %v2616_v41  ;;  %v2723_v55 = vsel %vm6152_vm5, %v2707_v3, %v6151_v57  ;;  %v2703_v59 = vsel %vm6154_vm13, %v2686_v54, %v6153_v36  ;;  %vm6158_vm8 = vmmov %vm6152_vm5  ;;  %v2338_v50 = vsel %vm2335_vm11, %v2337_v35, %v2333_v11  ;;  %v2625_v58 = vpop.xlane.xlu1 %2624 }
 0x5ac   : > { %v2705_v23 = vsel %vm6156_vm0, %v2688_v53, %v6155_v6  ;;  %v2740_v51 = vsel %vm2726_vm4, %v2723_v55, %v2384_v24  ;;  %v2719_v44 = vsel %vm6158_vm8, %v2703_v59, %v6157_v0  ;;  %vm6160_vm10 = vmmov %vm6152_vm5  ;;  %v2351_v49 = vand.u32 2147483648, %v5436_v21 }
 0x5ad   : > { %v2721_v5 = vsel %vm6160_vm10, %v2705_v23, %v6159_v39  ;;  %2757 = vst.msk [vmem:[%s5493_s13 + $0x68] sm:$0xff] %vm2743_vm15, %v2740_v51  ;;  %v2736_v30 = vsel %vm2726_vm4, %v2719_v44, %v2380_v8  ;;  %v2344_v16 = vadd.f32 %v5575_v47, %v2343_v1  ;;  %vm2345_vm7 = vweird.f32 %v5436_v21  ;;  %vm6165_vm12 = vmmov %vm6149_vm3  ;;  %v6170_v1 = vld [vmem:[#allocation31_spill] sm:$0xff] }
 0x5ae   : > { %v2738_v15 = vsel %vm2726_vm4, %v2721_v5, %v2382_v46  ;;  %2753 = vst.msk [vmem:[%s5493_s13 + $0x48] sm:$0xff] %vm2743_vm15, %v2736_v30  ;;  %vm2367_vm6 = vcmp.ne.f32.partialorder %v2308_v25, %v2308_v25  ;;  %v2675_v13 = vsel %vm1084_vm1, %v6161_v20, %v5377_v2  ;;  %v2673_v18 = vsel %vm1084_vm1, %v6162_v10, %v5394_v19  ;;  %vm5833_vm14 = vmor %vm2345_vm7, %vm2346_vm2  ;;  %v6168_v19 = vld [vmem:[#allocation14_spill] sm:$0xff] }
 0x5af   : > { %2755 = vst.msk [vmem:[%s5493_s13 + $0x58] sm:$0xff] %vm2743_vm15, %v2738_v15  ;;  %v2619_v4 = vpop.xlane.xlu2 %2618  ;;  %vm2369_vm9 = vcmp.ne.f32.partialorder %v2338_v50, %v2338_v50  ;;  %v2349_v34 = vand.u32 2147483647, %v5436_v21  ;;  %v2691_v38 = vsel %vm6165_vm12, %v2675_v13, %v2625_v58  ;;  %v2352_v2 = vor.u32 1.1754944e-38, %v2351_v49  ;;  %vm6167_vm5 = vmmov %vm6156_vm0 }
 0x5b0   : > { %v2689_v37 = vsel %vm6149_vm3, %v2673_v18, %v2619_v4  ;;  %vm6169_vm13 = vmmov %vm6156_vm0  ;;  %v2348_v21 = vsel %vm5833_vm14, %v5575_v47, %v2344_v16  ;;  %v2383_v26 = vsel %vm2367_vm6, 0.0, %v2308_v25  ;;  %v2385_v60 = vsel %vm2369_vm9, 0.0, %v2338_v50  ;;  %v6174_v47 = vld [vmem:[#allocation43_spill] sm:$0xff] }
 0x5b1   : > { %v2706_v33 = vsel %vm6167_vm5, %v2689_v37, %v6166_v22  ;;  %v2708_v35 = vsel %vm6169_vm13, %v2691_v38, %v6168_v19  ;;  %vm6171_vm0 = vmmov %vm6158_vm8  ;;  %vm2350_vm10 = vcmp.eq.f32.partialorder %v2349_v34, 8.507059e+37  ;;  %v2676_v31 = vsel %vm1084_vm1, %v6174_v47, %v5482_v32 }
 0x5b2   : > { %v2722_v24 = vsel %vm6171_vm0, %v2706_v33, %v6170_v1  ;;  %vm6173_vm8 = vmmov %vm6171_vm0  ;;  %v2353_v12 = vsel %vm2350_vm10, %v2352_v2, %v2348_v21 }
 0x5b3   : > { %v2724_v17 = vsel %vm6173_vm8, %v2708_v35, %v6172_v40  ;;  %v2739_v9 = vsel %vm2726_vm4, %v2722_v24, %v2383_v26  ;;  %vm2370_vm11 = vcmp.ne.f32.partialorder %v2353_v12, %v2353_v12  ;;  %vm6175_vm2 = vmmov %vm6149_vm3 }
 0x5b4   : > { %v2741_v27 = vsel %vm2726_vm4, %v2724_v17, %v2385_v60  ;;  %2756 = vst.msk [vmem:[%s5493_s13 + $0x60] sm:$0xff] %vm2743_vm15, %v2739_v9  ;;  %vm6176_vm7 = vmmov %vm6167_vm5  ;;  %v2386_v45 = vsel %vm2370_vm11, 0.0, %v2353_v12 }
 0x5b5   : > { %2758 = vst.msk [vmem:[%s5493_s13 + $0x70] sm:$0xff] %vm2743_vm15, %v2741_v27  ;;  %vm6177_vm6 = vmmov %vm6171_vm0 }
 0x5b7   : > { %v2628_v52 = vpop.xlane.xlu2 %2627 }
 0x5b8   : > { %v2692_v61 = vsel %vm6175_vm2, %v2676_v31, %v2628_v52 }
 0x5b9   : > { %v2709_v63 = vsel %vm6176_vm7, %v2692_v61, %v4545_v29 }
 0x5ba   : > { %v2725_v43 = vsel %vm6177_vm6, %v2709_v63, %v4681_v7 }
 0x5bb   : > { %v2742_v28 = vsel %vm2726_vm4, %v2725_v43, %v2386_v45 }
 0x5bc   : > { %2759 = vst.msk [vmem:[%s5493_s13 + $0x78] sm:$0xff] %vm2743_vm15, %v2742_v28 }
 0x5bd PF: > { %p13_p9 = scmp.ge.s32.totalorder %s3228_s22, 4   ;;  %s6178_s18 = smov %s3166_s19 }
 0x5be   : > { %s6179_s19 = smov %s3237_s25  ;;  %s6180_s20 = smov %s3228_s22 }
 0x5bf   :  { %15 = sbr.rel (!%p13_p9) target bundleno = 2 (0x2), region = 138 }

</bundles_post_ra>
